<compile_context>
chip_gen: v6e
topology: v6e:2x2x1
jax: 0.10.0
libtpu: 0.0.40
codegen_flags: <defaults>
</compile_context>

<pallas_src>
import numpy as np
import jax
import jax.numpy as jnp
from jax.experimental import pallas as pl
from jax.experimental.pallas import tpu as pltpu

BN_EPS = 1e-5
MAX_TILE = 1024                      # lane-axis tile over N*H*W (fits v7x 64MiB VMEM easily)
COMPUTE_DTYPE = jnp.bfloat16         # MXU operand dtype for the 3x3 convs (f32 accumulate)


def _compiler_params():
    return pltpu.CompilerParams(
        dimension_semantics=("parallel",),
        vmem_limit_bytes=32 * 1024 * 1024,
    )


def _pick_tile(nhw):
    """Largest 128-multiple tile <= MAX_TILE dividing nhw, else the whole axis."""
    if nhw <= MAX_TILE:
        return nhw
    t = MAX_TILE
    while t >= 128:
        if nhw % t == 0:
            return t
        t -= 128
    return nhw


def _data_spec(rows, tile):
    return pl.BlockSpec((rows, tile), lambda i: (0, i))


def _full_spec(shape):
    zeros = tuple(0 for _ in shape)
    return pl.BlockSpec(shape, lambda i, _z=zeros: _z)


# ---------------------------------------------------------------------------
# Pallas kernels
# ---------------------------------------------------------------------------

def _conv3x3_stats_kernel(cols_ref, w_ref, y_ref, ssum_ref, ssq_ref):
    # cols: (9*Cin, T) bf16   w: (Cout, 9*Cin) bf16
    # y: (Cout, T) f32        ssum/ssq: (1, Cout, 1) per-tile BN partial stats
    y = jnp.dot(w_ref[...], cols_ref[...], preferred_element_type=jnp.float32)
    y_ref[...] = y
    ssum_ref[...] = jnp.sum(y, axis=1, keepdims=True)[None]
    ssq_ref[...] = jnp.sum(y * y, axis=1, keepdims=True)[None]


def _bn_relu_kernel(y_ref, scale_ref, shift_ref, o_ref):
    # y: (Cout, T)  scale/shift: (Cout, 1)
    o_ref[...] = jnp.maximum(y_ref[...] * scale_ref[...] + shift_ref[...], 0.0)


def _maxpool_kernel(a_ref, b_ref, c_ref, d_ref, o_ref):
    # 4 corner slabs of each 2x2 window, all (C, T)
    o_ref[...] = jnp.maximum(jnp.maximum(a_ref[...], b_ref[...]),
                             jnp.maximum(c_ref[...], d_ref[...]))


def _convT2x2_kernel(x_ref, w_ref, b_ref, o_ref):
    # ConvTranspose2d(k=2, s=2) as one matmul over all 4 taps.
    # x: (Cin, T)  w: (4*Cout, Cin)  b: (4*Cout, 1)  o: (4*Cout, T)
    o_ref[...] = jnp.dot(w_ref[...], x_ref[...],
                         preferred_element_type=jnp.float32) + b_ref[...]


def _outc_head_kernel(u_ref, x_ref, w_ref, b_ref, o_ref):
    # fused: 1x1 out conv + residual add + depth/xyz split + L2 normalize(xyz)
    # u: (C1, T)  x: (4, T)  w: (4, C1)  b: (4, 1)  o: (4, T)
    y = jnp.dot(w_ref[...], u_ref[...], preferred_element_type=jnp.float32)
    y = y + b_ref[...] + x_ref[...]
    ch = jax.lax.broadcasted_iota(jnp.int32, y.shape, 0)        # channel index
    is_xyz = (ch >= 1).astype(jnp.float32)
    sumsq = jnp.sum(y * y * is_xyz, axis=0, keepdims=True)
    inv = jax.lax.rsqrt(jnp.maximum(sumsq, 1e-24))              # F.normalize eps=1e-12
    o_ref[...] = jnp.where(ch >= 1, y * inv, y)


# ---------------------------------------------------------------------------
# Wrappers (glue: padding, im2col, corner extraction, reshapes)
# ---------------------------------------------------------------------------

def _im2col3x3(x):
    # x: (C, N, H, W) -> (9*C, N*H*W), tap-major ordering (kh, kw, cin)
    c, n, h, w = x.shape
    xp = jnp.pad(x, ((0, 0), (0, 0), (1, 1), (1, 1)))
    taps = [xp[:, :, kh:kh + h, kw:kw + w].reshape(c, n * h * w)
            for kh in range(3) for kw in range(3)]
    return jnp.concatenate(taps, axis=0)


def conv3x3_bn_relu(x, w):
    # x: (Cin, N, H, W) f32   w: (Cout, 9*Cin) f32
    cin, n, h, wd = x.shape
    cout = w.shape[0]
    nhw = n * h * wd
    t = _pick_tile(nhw)
    g = nhw // t

    cols = _im2col3x3(x).astype(COMPUTE_DTYPE)                    # (9*Cin, NHW)
    y, ssum, ssq = pl.pallas_call(
        _conv3x3_stats_kernel,
        grid=(g,),
        in_specs=[_data_spec(9 * cin, t), _full_spec((cout, 9 * cin))],
        out_specs=(_data_spec(cout, t),
                   pl.BlockSpec((1, cout, 1), lambda i: (i, 0, 0)),
                   pl.BlockSpec((1, cout, 1), lambda i: (i, 0, 0))),
        out_shape=(jax.ShapeDtypeStruct((cout, nhw), jnp.float32),
                   jax.ShapeDtypeStruct((g, cout, 1), jnp.float32),
                   jax.ShapeDtypeStruct((g, cout, 1), jnp.float32)),
        compiler_params=_compiler_params(),
    )(cols, w.astype(COMPUTE_DTYPE))

    # BatchNorm2d finalize (training-mode batch stats, gamma=1, beta=0) -- tiny.
    mean = jnp.sum(ssum, axis=0) / nhw                            # (Cout, 1)
    var = jnp.maximum(jnp.sum(ssq, axis=0) / nhw - mean * mean, 0.0)
    scale = jax.lax.rsqrt(var + BN_EPS)
    shift = -mean * scale

    out = pl.pallas_call(
        _bn_relu_kernel,
        grid=(g,),
        in_specs=[_data_spec(cout, t), _full_spec((cout, 1)), _full_spec((cout, 1))],
        out_specs=_data_spec(cout, t),
        out_shape=jax.ShapeDtypeStruct((cout, nhw), jnp.float32),
        compiler_params=_compiler_params(),
    )(y, scale, shift)
    return out.reshape(cout, n, h, wd)


def maxpool2x2(x):
    c, n, h, w = x.shape
    ho, wo = h // 2, w // 2
    nhw = n * ho * wo
    xr = x.reshape(c, n, ho, 2, wo, 2)
    corners = [xr[:, :, :, i, :, j].reshape(c, nhw)
               for i in range(2) for j in range(2)]
    t = _pick_tile(nhw)
    g = nhw // t
    y = pl.pallas_call(
        _maxpool_kernel,
        grid=(g,),
        in_specs=[_data_spec(c, t)] * 4,
        out_specs=_data_spec(c, t),
        out_shape=jax.ShapeDtypeStruct((c, nhw), jnp.float32),
        compiler_params=_compiler_params(),
    )(*corners)
    return y.reshape(c, n, ho, wo)


def conv_transpose2x2(x, w, b):
    # x: (Cin, N, H, W)  w: (4*Cout, Cin)  b: (Cout,)
    cin, n, h, wd = x.shape
    cout4 = w.shape[0]
    cout = cout4 // 4
    nhw = n * h * wd
    t = _pick_tile(nhw)
    g = nhw // t
    b_full = jnp.tile(b, 4).reshape(cout4, 1)
    y = pl.pallas_call(
        _convT2x2_kernel,
        grid=(g,),
        in_specs=[_data_spec(cin, t), _full_spec((cout4, cin)), _full_spec((cout4, 1))],
        out_specs=_data_spec(cout4, t),
        out_shape=jax.ShapeDtypeStruct((cout4, nhw), jnp.float32),
        compiler_params=_compiler_params(),
    )(x.reshape(cin, nhw), w, b_full)
    # scatter taps: out[c, n, 2h+i, 2w+j] = y[(i*2+j)*Cout + c, n, h, w]
    y = y.reshape(2, 2, cout, n, h, wd).transpose(2, 3, 4, 0, 5, 1)
    return y.reshape(cout, n, 2 * h, 2 * wd)


def outc_head(u, x_in, w, b):
    # u: (C1, N, H, W)  x_in: (4, N, H, W)  w: (4, C1)  b: (4,)
    c1, n, h, wd = u.shape
    nhw = n * h * wd
    t = _pick_tile(nhw)
    g = nhw // t
    out = pl.pallas_call(
        _outc_head_kernel,
        grid=(g,),
        in_specs=[_data_spec(c1, t), _data_spec(4, t),
                  _full_spec((4, c1)), _full_spec((4, 1))],
        out_specs=_data_spec(4, t),
        out_shape=jax.ShapeDtypeStruct((4, nhw), jnp.float32),
        compiler_params=_compiler_params(),
    )(u.reshape(c1, nhw), x_in.reshape(4, nhw), w, b.reshape(4, 1))
    return out.reshape(4, n, h, wd)


# ---------------------------------------------------------------------------
# Parameters (xavier_uniform weights, zero biases)
# ---------------------------------------------------------------------------

def init_params(key, base=8):
    keys = iter(jax.random.split(key, 32))

    def xavier(shape, fan_in, fan_out):
        lim = float(np.sqrt(6.0 / (fan_in + fan_out)))
        return jax.random.uniform(next(keys), shape, jnp.float32, -lim, lim)

    p = {}

    def add_conv3(name, cin, cout):
        # fused (Cout, 9*Cin) weight; conv bias omitted: a per-channel bias before
        # training-mode BN(beta=0) is exactly cancelled by the mean subtraction.
        p[name + "_w"] = xavier((cout, 9 * cin), cin * 9, cout * 9)

    def add_double(name, cin, cmid, cout):
        add_conv3(name + "_1", cin, cmid)
        add_conv3(name + "_2", cmid, cout)

    c1, c2, c3 = base, base * 2, base * 4
    add_double("inc", 4, c1, c1)
    add_double("down1", c1, c2, c2)
    add_double("down2", c2, c3, c3)
    # ConvTranspose2d fans (PyTorch): fan_in = Cout*k*k, fan_out = Cin*k*k
    p["up1_tw"] = xavier((4 * c2, c3), c2 * 4, c3 * 4)
    p["up1_tb"] = jnp.zeros((c2,), jnp.float32)
    add_double("up1", c3, c2, c2)          # cat(skip c2, up c2) -> c3 input
    p["up2_tw"] = xavier((4 * c1, c2), c1 * 4, c2 * 4)
    p["up2_tb"] = jnp.zeros((c1,), jnp.float32)
    add_double("up2", c2, c1, c1)          # cat(skip c1, up c1) -> c2 input
    p["outc_w"] = xavier((4, c1), c1, 4)
    p["outc_b"] = jnp.zeros((4,), jnp.float32)
    return p


# ---------------------------------------------------------------------------
# Forward passes
# ---------------------------------------------------------------------------

def double_conv(x, p, name):
    x = conv3x3_bn_relu(x, p[name + "_1_w"])
    x = conv3x3_bn_relu(x, p[name + "_2_w"])
    return x


def unet_forward(p, x):                                      # x: (4, N, H, W)
    x1 = double_conv(x, p, "inc")                            # (8,  N, H,   W)
    x2 = double_conv(maxpool2x2(x1), p, "down1")             # (16, N, H/2, W/2)
    x3 = double_conv(maxpool2x2(x2), p, "down2")             # (32, N, H/4, W/4)
    u1 = conv_transpose2x2(x3, p["up1_tw"], p["up1_tb"])     # (16, N, H/2, W/2)
    u1 = double_conv(jnp.concatenate([x2, u1], axis=0), p, "up1")
    u2 = conv_transpose2x2(u1, p["up2_tw"], p["up2_tb"])     # (8, N, H, W)
    u2 = double_conv(jnp.concatenate([x1, u2], axis=0), p, "up2")
    return u2                                                # (8, N, H, W)


def cons_net_forward(params, depth, xyz_map):
    # depth: (N,1,H,W), xyz_map: (N,3,H,W)   -- PyTorch NCHW convention
    inp = jnp.concatenate([depth, xyz_map], axis=1)          # (N,4,H,W)
    x = jnp.transpose(inp, (1, 0, 2, 3))                     # channel-major (4,N,H,W)
    u2 = unet_forward(params, x)
    out = outc_head(u2, x, params["outc_w"], params["outc_b"])   # (4,N,H,W)
    depth_o = jnp.transpose(out[0:1], (1, 0, 2, 3))          # (N,1,H,W)
    xyz_o = jnp.transpose(out[1:4], (1, 0, 2, 3))            # (N,3,H,W)
    return depth_o, xyz_o


# ---------------------------------------------------------------------------

if __name__ == "__main__":
    key = jax.random.PRNGKey(0)
    kd, kx, kp = jax.random.split(key, 3)
    N, H, W = 2, 16, 16
    depth = jax.random.normal(kd, (N, 1, H, W), jnp.float32)
    xyz_map = jax.random.normal(kx, (N, 3, H, W), jnp.float32)
    params = init_params(kp)

    fwd = jax.jit(cons_net_forward)
    d_out, x_out = fwd(params, depth, xyz_map)
    jax.block_until_ready((d_out, x_out))

    assert d_out.shape == (N, 1, H, W), d_out.shape
    assert x_out.shape == (N, 3, H, W), x_out.shape
    assert bool(jnp.all(jnp.isfinite(d_out))) and bool(jnp.all(jnp.isfinite(x_out)))
    # xyz output should be unit-norm along the channel dim
    norms = jnp.sqrt(jnp.sum(x_out * x_out, axis=1))
    assert bool(jnp.all(jnp.abs(norms - 1.0) < 1e-3))
    print("KERNEL_OK")
</pallas_src>

<mosaic_0001>
module attributes {stable_mosaic.version = 11 : i64} {
  func.func @_conv3x3_stats_kernel(%arg0: i32, %arg1: memref<36x512xbf16, #tpu.memory_space<vmem>>, %arg2: memref<8x36xbf16, #tpu.memory_space<vmem>>, %arg3: memref<8x512xf32, #tpu.memory_space<vmem>>, %arg4: memref<1x8x1xf32, #tpu.memory_space<vmem>>, %arg5: memref<1x8x1xf32, #tpu.memory_space<vmem>>) attributes {dimension_semantics = [#tpu.dimension_semantics<parallel>], iteration_bounds = array<i64: 1>, scalar_prefetch = 0 : i64, scratch_operands = 0 : i64, tpu.core_type = #tpu.core_type<tc>, window_params = [{transform_indices = @transform_0, window_bounds = array<i64: 36, 512>}, {pipeline_mode = #tpu.pipeline_mode<synchronous>, transform_indices = @transform_1, window_bounds = array<i64: 8, 36>}, {transform_indices = @transform_2, window_bounds = array<i64: 8, 512>}, {transform_indices = @transform_3, window_bounds = array<i64: 1, 8, 1>}, {transform_indices = @transform_4, window_bounds = array<i64: 1, 8, 1>}]} {
    %c0 = arith.constant 0 : index
    %c0_0 = arith.constant 0 : index
    %0 = vector.load %arg2[%c0, %c0_0] : memref<8x36xbf16, #tpu.memory_space<vmem>>, vector<8x36xbf16>
    %c0_1 = arith.constant 0 : index
    %c0_2 = arith.constant 0 : index
    %1 = vector.load %arg1[%c0_1, %c0_2] : memref<36x512xbf16, #tpu.memory_space<vmem>>, vector<36x512xbf16>
    %cst = arith.constant dense<0.000000e+00> : vector<8x512xf32>
    %2 = tpu.matmul %0, %1, %cst {dimension_numbers = #tpu.dot_dimension_numbers<[1], [0], [0], [1], [0, 0, 1, 1], [], []>} : vector<8x36xbf16>, vector<36x512xbf16>, vector<8x512xf32> -> vector<8x512xf32>
    %c0_3 = arith.constant 0 : index
    %c0_4 = arith.constant 0 : index
    %3 = vector.load %arg3[%c0_3, %c0_4] : memref<8x512xf32, #tpu.memory_space<vmem>>, vector<8x512xf32>
    tpu.vector_store %arg3[%c0_3, %c0_4], %2 {strides = array<i32>} : memref<8x512xf32, #tpu.memory_space<vmem>>, vector<8x512xf32>,
    %cst_5 = arith.constant dense<0.000000e+00> : vector<8xf32>
    %4 = vector.multi_reduction <add>, %2, %cst_5 [1] : vector<8x512xf32> to vector<8xf32>
    %5 = vector.shape_cast %4 : vector<8xf32> to vector<8x1xf32>
    %6 = vector.shape_cast %5 : vector<8x1xf32> to vector<1x8x1xf32>
    %c0_6 = arith.constant 0 : index
    %c0_7 = arith.constant 0 : index
    %c0_8 = arith.constant 0 : index
    %7 = vector.load %arg4[%c0_6, %c0_7, %c0_8] : memref<1x8x1xf32, #tpu.memory_space<vmem>>, vector<1x8x1xf32>
    tpu.vector_store %arg4[%c0_6, %c0_7, %c0_8], %6 {strides = array<i32>} : memref<1x8x1xf32, #tpu.memory_space<vmem>>, vector<1x8x1xf32>,
    %8 = arith.mulf %2, %2 : vector<8x512xf32>
    %cst_9 = arith.constant dense<0.000000e+00> : vector<8xf32>
    %9 = vector.multi_reduction <add>, %8, %cst_9 [1] : vector<8x512xf32> to vector<8xf32>
    %10 = vector.shape_cast %9 : vector<8xf32> to vector<8x1xf32>
    %11 = vector.shape_cast %10 : vector<8x1xf32> to vector<1x8x1xf32>
    %c0_10 = arith.constant 0 : index
    %c0_11 = arith.constant 0 : index
    %c0_12 = arith.constant 0 : index
    %12 = vector.load %arg5[%c0_10, %c0_11, %c0_12] : memref<1x8x1xf32, #tpu.memory_space<vmem>>, vector<1x8x1xf32>
    tpu.vector_store %arg5[%c0_10, %c0_11, %c0_12], %11 {strides = array<i32>} : memref<1x8x1xf32, #tpu.memory_space<vmem>>, vector<1x8x1xf32>,
    return
  }
  func.func @transform_0(%arg0: i32) -> (i32, i32) {
    %c0_i32 = arith.constant 0 : i32
    %c0_i32_0 = arith.constant 0 : i32
    return %c0_i32, %arg0 : i32, i32
  }
  func.func @transform_1(%arg0: i32) -> (i32, i32) {
    %c0_i32 = arith.constant 0 : i32
    %c0_i32_0 = arith.constant 0 : i32
    %c0_i32_1 = arith.constant 0 : i32
    return %c0_i32, %c0_i32_0 : i32, i32
  }
  func.func @transform_2(%arg0: i32) -> (i32, i32) {
    %c0_i32 = arith.constant 0 : i32
    %c0_i32_0 = arith.constant 0 : i32
    return %c0_i32, %arg0 : i32, i32
  }
  func.func @transform_3(%arg0: i32) -> (i32, i32, i32) {
    %c0_i32 = arith.constant 0 : i32
    %c0_i32_0 = arith.constant 0 : i32
    %c0_i32_1 = arith.constant 0 : i32
    return %arg0, %c0_i32, %c0_i32_0 : i32, i32, i32
  }
  func.func @transform_4(%arg0: i32) -> (i32, i32, i32) {
    %c0_i32 = arith.constant 0 : i32
    %c0_i32_0 = arith.constant 0 : i32
    %c0_i32_1 = arith.constant 0 : i32
    return %arg0, %c0_i32, %c0_i32_0 : i32, i32, i32
  }
}

module attributes {stable_mosaic.version = 11 : i64} {
  func.func @_bn_relu_kernel(%arg0: i32, %arg1: memref<8x512xf32, #tpu.memory_space<vmem>>, %arg2: memref<8x1xf32, #tpu.memory_space<vmem>>, %arg3: memref<8x1xf32, #tpu.memory_space<vmem>>, %arg4: memref<8x512xf32, #tpu.memory_space<vmem>>) attributes {dimension_semantics = [#tpu.dimension_semantics<parallel>], iteration_bounds = array<i64: 1>, scalar_prefetch = 0 : i64, scratch_operands = 0 : i64, tpu.core_type = #tpu.core_type<tc>, window_params = [{transform_indices = @transform_0, window_bounds = array<i64: 8, 512>}, {pipeline_mode = #tpu.pipeline_mode<synchronous>, transform_indices = @transform_1, window_bounds = array<i64: 8, 1>}, {pipeline_mode = #tpu.pipeline_mode<synchronous>, transform_indices = @transform_2, window_bounds = array<i64: 8, 1>}, {transform_indices = @transform_3, window_bounds = array<i64: 8, 512>}]} {
    %c0 = arith.constant 0 : index
    %c0_0 = arith.constant 0 : index
    %0 = vector.load %arg1[%c0, %c0_0] : memref<8x512xf32, #tpu.memory_space<vmem>>, vector<8x512xf32>
    %c0_1 = arith.constant 0 : index
    %c0_2 = arith.constant 0 : index
    %1 = vector.load %arg2[%c0_1, %c0_2] : memref<8x1xf32, #tpu.memory_space<vmem>>, vector<8x1xf32>
    %2 = vector.broadcast %1 : vector<8x1xf32> to vector<8x512xf32>
    %3 = arith.mulf %0, %2 : vector<8x512xf32>
    %c0_3 = arith.constant 0 : index
    %c0_4 = arith.constant 0 : index
    %4 = vector.load %arg3[%c0_3, %c0_4] : memref<8x1xf32, #tpu.memory_space<vmem>>, vector<8x1xf32>
    %5 = vector.broadcast %4 : vector<8x1xf32> to vector<8x512xf32>
    %6 = arith.addf %3, %5 : vector<8x512xf32>
    %cst = arith.constant 0.000000e+00 : f32
    %7 = vector.broadcast %cst : f32 to vector<8x512xf32>
    %8 = arith.maximumf %6, %7 : vector<8x512xf32>
    %c0_5 = arith.constant 0 : index
    %c0_6 = arith.constant 0 : index
    %9 = vector.load %arg4[%c0_5, %c0_6] : memref<8x512xf32, #tpu.memory_space<vmem>>, vector<8x512xf32>
    tpu.vector_store %arg4[%c0_5, %c0_6], %8 {strides = array<i32>} : memref<8x512xf32, #tpu.memory_space<vmem>>, vector<8x512xf32>,
    return
  }
  func.func @transform_0(%arg0: i32) -> (i32, i32) {
    %c0_i32 = arith.constant 0 : i32
    %c0_i32_0 = arith.constant 0 : i32
    return %c0_i32, %arg0 : i32, i32
  }
  func.func @transform_1(%arg0: i32) -> (i32, i32) {
    %c0_i32 = arith.constant 0 : i32
    %c0_i32_0 = arith.constant 0 : i32
    %c0_i32_1 = arith.constant 0 : i32
    return %c0_i32, %c0_i32_0 : i32, i32
  }
  func.func @transform_2(%arg0: i32) -> (i32, i32) {
    %c0_i32 = arith.constant 0 : i32
    %c0_i32_0 = arith.constant 0 : i32
    %c0_i32_1 = arith.constant 0 : i32
    return %c0_i32, %c0_i32_0 : i32, i32
  }
  func.func @transform_3(%arg0: i32) -> (i32, i32) {
    %c0_i32 = arith.constant 0 : i32
    %c0_i32_0 = arith.constant 0 : i32
    return %c0_i32, %arg0 : i32, i32
  }
}

module attributes {stable_mosaic.version = 11 : i64} {
  func.func @_conv3x3_stats_kernel(%arg0: i32, %arg1: memref<72x512xbf16, #tpu.memory_space<vmem>>, %arg2: memref<8x72xbf16, #tpu.memory_space<vmem>>, %arg3: memref<8x512xf32, #tpu.memory_space<vmem>>, %arg4: memref<1x8x1xf32, #tpu.memory_space<vmem>>, %arg5: memref<1x8x1xf32, #tpu.memory_space<vmem>>) attributes {dimension_semantics = [#tpu.dimension_semantics<parallel>], iteration_bounds = array<i64: 1>, scalar_prefetch = 0 : i64, scratch_operands = 0 : i64, tpu.core_type = #tpu.core_type<tc>, window_params = [{transform_indices = @transform_0, window_bounds = array<i64: 72, 512>}, {pipeline_mode = #tpu.pipeline_mode<synchronous>, transform_indices = @transform_1, window_bounds = array<i64: 8, 72>}, {transform_indices = @transform_2, window_bounds = array<i64: 8, 512>}, {transform_indices = @transform_3, window_bounds = array<i64: 1, 8, 1>}, {transform_indices = @transform_4, window_bounds = array<i64: 1, 8, 1>}]} {
    %c0 = arith.constant 0 : index
    %c0_0 = arith.constant 0 : index
    %0 = vector.load %arg2[%c0, %c0_0] : memref<8x72xbf16, #tpu.memory_space<vmem>>, vector<8x72xbf16>
    %c0_1 = arith.constant 0 : index
    %c0_2 = arith.constant 0 : index
    %1 = vector.load %arg1[%c0_1, %c0_2] : memref<72x512xbf16, #tpu.memory_space<vmem>>, vector<72x512xbf16>
    %cst = arith.constant dense<0.000000e+00> : vector<8x512xf32>
    %2 = tpu.matmul %0, %1, %cst {dimension_numbers = #tpu.dot_dimension_numbers<[1], [0], [0], [1], [0, 0, 1, 1], [], []>} : vector<8x72xbf16>, vector<72x512xbf16>, vector<8x512xf32> -> vector<8x512xf32>
    %c0_3 = arith.constant 0 : index
    %c0_4 = arith.constant 0 : index
    %3 = vector.load %arg3[%c0_3, %c0_4] : memref<8x512xf32, #tpu.memory_space<vmem>>, vector<8x512xf32>
    tpu.vector_store %arg3[%c0_3, %c0_4], %2 {strides = array<i32>} : memref<8x512xf32, #tpu.memory_space<vmem>>, vector<8x512xf32>,
    %cst_5 = arith.constant dense<0.000000e+00> : vector<8xf32>
    %4 = vector.multi_reduction <add>, %2, %cst_5 [1] : vector<8x512xf32> to vector<8xf32>
    %5 = vector.shape_cast %4 : vector<8xf32> to vector<8x1xf32>
    %6 = vector.shape_cast %5 : vector<8x1xf32> to vector<1x8x1xf32>
    %c0_6 = arith.constant 0 : index
    %c0_7 = arith.constant 0 : index
    %c0_8 = arith.constant 0 : index
    %7 = vector.load %arg4[%c0_6, %c0_7, %c0_8] : memref<1x8x1xf32, #tpu.memory_space<vmem>>, vector<1x8x1xf32>
    tpu.vector_store %arg4[%c0_6, %c0_7, %c0_8], %6 {strides = array<i32>} : memref<1x8x1xf32, #tpu.memory_space<vmem>>, vector<1x8x1xf32>,
    %8 = arith.mulf %2, %2 : vector<8x512xf32>
    %cst_9 = arith.constant dense<0.000000e+00> : vector<8xf32>
    %9 = vector.multi_reduction <add>, %8, %cst_9 [1] : vector<8x512xf32> to vector<8xf32>
    %10 = vector.shape_cast %9 : vector<8xf32> to vector<8x1xf32>
    %11 = vector.shape_cast %10 : vector<8x1xf32> to vector<1x8x1xf32>
    %c0_10 = arith.constant 0 : index
    %c0_11 = arith.constant 0 : index
    %c0_12 = arith.constant 0 : index
    %12 = vector.load %arg5[%c0_10, %c0_11, %c0_12] : memref<1x8x1xf32, #tpu.memory_space<vmem>>, vector<1x8x1xf32>
    tpu.vector_store %arg5[%c0_10, %c0_11, %c0_12], %11 {strides = array<i32>} : memref<1x8x1xf32, #tpu.memory_space<vmem>>, vector<1x8x1xf32>,
    return
  }
  func.func @transform_0(%arg0: i32) -> (i32, i32) {
    %c0_i32 = arith.constant 0 : i32
    %c0_i32_0 = arith.constant 0 : i32
    return %c0_i32, %arg0 : i32, i32
  }
  func.func @transform_1(%arg0: i32) -> (i32, i32) {
    %c0_i32 = arith.constant 0 : i32
    %c0_i32_0 = arith.constant 0 : i32
    %c0_i32_1 = arith.constant 0 : i32
    return %c0_i32, %c0_i32_0 : i32, i32
  }
  func.func @transform_2(%arg0: i32) -> (i32, i32) {
    %c0_i32 = arith.constant 0 : i32
    %c0_i32_0 = arith.constant 0 : i32
    return %c0_i32, %arg0 : i32, i32
  }
  func.func @transform_3(%arg0: i32) -> (i32, i32, i32) {
    %c0_i32 = arith.constant 0 : i32
    %c0_i32_0 = arith.constant 0 : i32
    %c0_i32_1 = arith.constant 0 : i32
    return %arg0, %c0_i32, %c0_i32_0 : i32, i32, i32
  }
  func.func @transform_4(%arg0: i32) -> (i32, i32, i32) {
    %c0_i32 = arith.constant 0 : i32
    %c0_i32_0 = arith.constant 0 : i32
    %c0_i32_1 = arith.constant 0 : i32
    return %arg0, %c0_i32, %c0_i32_0 : i32, i32, i32
  }
}

module attributes {stable_mosaic.version = 11 : i64} {
  func.func @_maxpool_kernel(%arg0: i32, %arg1: memref<8x128xf32, #tpu.memory_space<vmem>>, %arg2: memref<8x128xf32, #tpu.memory_space<vmem>>, %arg3: memref<8x128xf32, #tpu.memory_space<vmem>>, %arg4: memref<8x128xf32, #tpu.memory_space<vmem>>, %arg5: memref<8x128xf32, #tpu.memory_space<vmem>>) attributes {dimension_semantics = [#tpu.dimension_semantics<parallel>], iteration_bounds = array<i64: 1>, scalar_prefetch = 0 : i64, scratch_operands = 0 : i64, tpu.core_type = #tpu.core_type<tc>, window_params = [{transform_indices = @transform_0, window_bounds = array<i64: 8, 128>}, {transform_indices = @transform_1, window_bounds = array<i64: 8, 128>}, {transform_indices = @transform_2, window_bounds = array<i64: 8, 128>}, {transform_indices = @transform_3, window_bounds = array<i64: 8, 128>}, {transform_indices = @transform_4, window_bounds = array<i64: 8, 128>}]} {
    %c0 = arith.constant 0 : index
    %c0_0 = arith.constant 0 : index
    %0 = vector.load %arg1[%c0, %c0_0] : memref<8x128xf32, #tpu.memory_space<vmem>>, vector<8x128xf32>
    %c0_1 = arith.constant 0 : index
    %c0_2 = arith.constant 0 : index
    %1 = vector.load %arg2[%c0_1, %c0_2] : memref<8x128xf32, #tpu.memory_space<vmem>>, vector<8x128xf32>
    %2 = arith.maximumf %0, %1 : vector<8x128xf32>
    %c0_3 = arith.constant 0 : index
    %c0_4 = arith.constant 0 : index
    %3 = vector.load %arg3[%c0_3, %c0_4] : memref<8x128xf32, #tpu.memory_space<vmem>>, vector<8x128xf32>
    %c0_5 = arith.constant 0 : index
    %c0_6 = arith.constant 0 : index
    %4 = vector.load %arg4[%c0_5, %c0_6] : memref<8x128xf32, #tpu.memory_space<vmem>>, vector<8x128xf32>
    %5 = arith.maximumf %3, %4 : vector<8x128xf32>
    %6 = arith.maximumf %2, %5 : vector<8x128xf32>
    %c0_7 = arith.constant 0 : index
    %c0_8 = arith.constant 0 : index
    %7 = vector.load %arg5[%c0_7, %c0_8] : memref<8x128xf32, #tpu.memory_space<vmem>>, vector<8x128xf32>
    tpu.vector_store %arg5[%c0_7, %c0_8], %6 {strides = array<i32>} : memref<8x128xf32, #tpu.memory_space<vmem>>, vector<8x128xf32>,
    return
  }
  func.func @transform_0(%arg0: i32) -> (i32, i32) {
    %c0_i32 = arith.constant 0 : i32
    %c0_i32_0 = arith.constant 0 : i32
    return %c0_i32, %arg0 : i32, i32
  }
  func.func @transform_1(%arg0: i32) -> (i32, i32) {
    %c0_i32 = arith.constant 0 : i32
    %c0_i32_0 = arith.constant 0 : i32
    return %c0_i32, %arg0 : i32, i32
  }
  func.func @transform_2(%arg0: i32) -> (i32, i32) {
    %c0_i32 = arith.constant 0 : i32
    %c0_i32_0 = arith.constant 0 : i32
    return %c0_i32, %arg0 : i32, i32
  }
  func.func @transform_3(%arg0: i32) -> (i32, i32) {
    %c0_i32 = arith.constant 0 : i32
    %c0_i32_0 = arith.constant 0 : i32
    return %c0_i32, %arg0 : i32, i32
  }
  func.func @transform_4(%arg0: i32) -> (i32, i32) {
    %c0_i32 = arith.constant 0 : i32
    %c0_i32_0 = arith.constant 0 : i32
    return %c0_i32, %arg0 : i32, i32
  }
}

module attributes {stable_mosaic.version = 11 : i64} {
  func.func @_conv3x3_stats_kernel(%arg0: i32, %arg1: memref<72x128xbf16, #tpu.memory_space<vmem>>, %arg2: memref<16x72xbf16, #tpu.memory_space<vmem>>, %arg3: memref<16x128xf32, #tpu.memory_space<vmem>>, %arg4: memref<1x16x1xf32, #tpu.memory_space<vmem>>, %arg5: memref<1x16x1xf32, #tpu.memory_space<vmem>>) attributes {dimension_semantics = [#tpu.dimension_semantics<parallel>], iteration_bounds = array<i64: 1>, scalar_prefetch = 0 : i64, scratch_operands = 0 : i64, tpu.core_type = #tpu.core_type<tc>, window_params = [{transform_indices = @transform_0, window_bounds = array<i64: 72, 128>}, {pipeline_mode = #tpu.pipeline_mode<synchronous>, transform_indices = @transform_1, window_bounds = array<i64: 16, 72>}, {transform_indices = @transform_2, window_bounds = array<i64: 16, 128>}, {transform_indices = @transform_3, window_bounds = array<i64: 1, 16, 1>}, {transform_indices = @transform_4, window_bounds = array<i64: 1, 16, 1>}]} {
    %c0 = arith.constant 0 : index
    %c0_0 = arith.constant 0 : index
    %0 = vector.load %arg2[%c0, %c0_0] : memref<16x72xbf16, #tpu.memory_space<vmem>>, vector<16x72xbf16>
    %c0_1 = arith.constant 0 : index
    %c0_2 = arith.constant 0 : index
    %1 = vector.load %arg1[%c0_1, %c0_2] : memref<72x128xbf16, #tpu.memory_space<vmem>>, vector<72x128xbf16>
    %cst = arith.constant dense<0.000000e+00> : vector<16x128xf32>
    %2 = tpu.matmul %0, %1, %cst {dimension_numbers = #tpu.dot_dimension_numbers<[1], [0], [0], [1], [0, 0, 1, 1], [], []>} : vector<16x72xbf16>, vector<72x128xbf16>, vector<16x128xf32> -> vector<16x128xf32>
    %c0_3 = arith.constant 0 : index
    %c0_4 = arith.constant 0 : index
    %3 = vector.load %arg3[%c0_3, %c0_4] : memref<16x128xf32, #tpu.memory_space<vmem>>, vector<16x128xf32>
    tpu.vector_store %arg3[%c0_3, %c0_4], %2 {strides = array<i32>} : memref<16x128xf32, #tpu.memory_space<vmem>>, vector<16x128xf32>,
    %cst_5 = arith.constant dense<0.000000e+00> : vector<16xf32>
    %4 = vector.multi_reduction <add>, %2, %cst_5 [1] : vector<16x128xf32> to vector<16xf32>
    %5 = vector.shape_cast %4 : vector<16xf32> to vector<16x1xf32>
    %6 = vector.shape_cast %5 : vector<16x1xf32> to vector<1x16x1xf32>
    %c0_6 = arith.constant 0 : index
    %c0_7 = arith.constant 0 : index
    %c0_8 = arith.constant 0 : index
    %7 = vector.load %arg4[%c0_6, %c0_7, %c0_8] : memref<1x16x1xf32, #tpu.memory_space<vmem>>, vector<1x16x1xf32>
    tpu.vector_store %arg4[%c0_6, %c0_7, %c0_8], %6 {strides = array<i32>} : memref<1x16x1xf32, #tpu.memory_space<vmem>>, vector<1x16x1xf32>,
    %8 = arith.mulf %2, %2 : vector<16x128xf32>
    %cst_9 = arith.constant dense<0.000000e+00> : vector<16xf32>
    %9 = vector.multi_reduction <add>, %8, %cst_9 [1] : vector<16x128xf32> to vector<16xf32>
    %10 = vector.shape_cast %9 : vector<16xf32> to vector<16x1xf32>
    %11 = vector.shape_cast %10 : vector<16x1xf32> to vector<1x16x1xf32>
    %c0_10 = arith.constant 0 : index
    %c0_11 = arith.constant 0 : index
    %c0_12 = arith.constant 0 : index
    %12 = vector.load %arg5[%c0_10, %c0_11, %c0_12] : memref<1x16x1xf32, #tpu.memory_space<vmem>>, vector<1x16x1xf32>
    tpu.vector_store %arg5[%c0_10, %c0_11, %c0_12], %11 {strides = array<i32>} : memref<1x16x1xf32, #tpu.memory_space<vmem>>, vector<1x16x1xf32>,
    return
  }
  func.func @transform_0(%arg0: i32) -> (i32, i32) {
    %c0_i32 = arith.constant 0 : i32
    %c0_i32_0 = arith.constant 0 : i32
    return %c0_i32, %arg0 : i32, i32
  }
  func.func @transform_1(%arg0: i32) -> (i32, i32) {
    %c0_i32 = arith.constant 0 : i32
    %c0_i32_0 = arith.constant 0 : i32
    %c0_i32_1 = arith.constant 0 : i32
    return %c0_i32, %c0_i32_0 : i32, i32
  }
  func.func @transform_2(%arg0: i32) -> (i32, i32) {
    %c0_i32 = arith.constant 0 : i32
    %c0_i32_0 = arith.constant 0 : i32
    return %c0_i32, %arg0 : i32, i32
  }
  func.func @transform_3(%arg0: i32) -> (i32, i32, i32) {
    %c0_i32 = arith.constant 0 : i32
    %c0_i32_0 = arith.constant 0 : i32
    %c0_i32_1 = arith.constant 0 : i32
    return %arg0, %c0_i32, %c0_i32_0 : i32, i32, i32
  }
  func.func @transform_4(%arg0: i32) -> (i32, i32, i32) {
    %c0_i32 = arith.constant 0 : i32
    %c0_i32_0 = arith.constant 0 : i32
    %c0_i32_1 = arith.constant 0 : i32
    return %arg0, %c0_i32, %c0_i32_0 : i32, i32, i32
  }
}

module attributes {stable_mosaic.version = 11 : i64} {
  func.func @_bn_relu_kernel(%arg0: i32, %arg1: memref<16x128xf32, #tpu.memory_space<vmem>>, %arg2: memref<16x1xf32, #tpu.memory_space<vmem>>, %arg3: memref<16x1xf32, #tpu.memory_space<vmem>>, %arg4: memref<16x128xf32, #tpu.memory_space<vmem>>) attributes {dimension_semantics = [#tpu.dimension_semantics<parallel>], iteration_bounds = array<i64: 1>, scalar_prefetch = 0 : i64, scratch_operands = 0 : i64, tpu.core_type = #tpu.core_type<tc>, window_params = [{transform_indices = @transform_0, window_bounds = array<i64: 16, 128>}, {pipeline_mode = #tpu.pipeline_mode<synchronous>, transform_indices = @transform_1, window_bounds = array<i64: 16, 1>}, {pipeline_mode = #tpu.pipeline_mode<synchronous>, transform_indices = @transform_2, window_bounds = array<i64: 16, 1>}, {transform_indices = @transform_3, window_bounds = array<i64: 16, 128>}]} {
    %c0 = arith.constant 0 : index
    %c0_0 = arith.constant 0 : index
    %0 = vector.load %arg1[%c0, %c0_0] : memref<16x128xf32, #tpu.memory_space<vmem>>, vector<16x128xf32>
    %c0_1 = arith.constant 0 : index
    %c0_2 = arith.constant 0 : index
    %1 = vector.load %arg2[%c0_1, %c0_2] : memref<16x1xf32, #tpu.memory_space<vmem>>, vector<16x1xf32>
    %2 = vector.broadcast %1 : vector<16x1xf32> to vector<16x128xf32>
    %3 = arith.mulf %0, %2 : vector<16x128xf32>
    %c0_3 = arith.constant 0 : index
    %c0_4 = arith.constant 0 : index
    %4 = vector.load %arg3[%c0_3, %c0_4] : memref<16x1xf32, #tpu.memory_space<vmem>>, vector<16x1xf32>
    %5 = vector.broadcast %4 : vector<16x1xf32> to vector<16x128xf32>
    %6 = arith.addf %3, %5 : vector<16x128xf32>
    %cst = arith.constant 0.000000e+00 : f32
    %7 = vector.broadcast %cst : f32 to vector<16x128xf32>
    %8 = arith.maximumf %6, %7 : vector<16x128xf32>
    %c0_5 = arith.constant 0 : index
    %c0_6 = arith.constant 0 : index
    %9 = vector.load %arg4[%c0_5, %c0_6] : memref<16x128xf32, #tpu.memory_space<vmem>>, vector<16x128xf32>
    tpu.vector_store %arg4[%c0_5, %c0_6], %8 {strides = array<i32>} : memref<16x128xf32, #tpu.memory_space<vmem>>, vector<16x128xf32>,
    return
  }
  func.func @transform_0(%arg0: i32) -> (i32, i32) {
    %c0_i32 = arith.constant 0 : i32
    %c0_i32_0 = arith.constant 0 : i32
    return %c0_i32, %arg0 : i32, i32
  }
  func.func @transform_1(%arg0: i32) -> (i32, i32) {
    %c0_i32 = arith.constant 0 : i32
    %c0_i32_0 = arith.constant 0 : i32
    %c0_i32_1 = arith.constant 0 : i32
    return %c0_i32, %c0_i32_0 : i32, i32
  }
  func.func @transform_2(%arg0: i32) -> (i32, i32) {
    %c0_i32 = arith.constant 0 : i32
    %c0_i32_0 = arith.constant 0 : i32
    %c0_i32_1 = arith.constant 0 : i32
    return %c0_i32, %c0_i32_0 : i32, i32
  }
  func.func @transform_3(%arg0: i32) -> (i32, i32) {
    %c0_i32 = arith.constant 0 : i32
    %c0_i32_0 = arith.constant 0 : i32
    return %c0_i32, %arg0 : i32, i32
  }
}

module attributes {stable_mosaic.version = 11 : i64} {
  func.func @_conv3x3_stats_kernel(%arg0: i32, %arg1: memref<144x128xbf16, #tpu.memory_space<vmem>>, %arg2: memref<16x144xbf16, #tpu.memory_space<vmem>>, %arg3: memref<16x128xf32, #tpu.memory_space<vmem>>, %arg4: memref<1x16x1xf32, #tpu.memory_space<vmem>>, %arg5: memref<1x16x1xf32, #tpu.memory_space<vmem>>) attributes {dimension_semantics = [#tpu.dimension_semantics<parallel>], iteration_bounds = array<i64: 1>, scalar_prefetch = 0 : i64, scratch_operands = 0 : i64, tpu.core_type = #tpu.core_type<tc>, window_params = [{transform_indices = @transform_0, window_bounds = array<i64: 144, 128>}, {pipeline_mode = #tpu.pipeline_mode<synchronous>, transform_indices = @transform_1, window_bounds = array<i64: 16, 144>}, {transform_indices = @transform_2, window_bounds = array<i64: 16, 128>}, {transform_indices = @transform_3, window_bounds = array<i64: 1, 16, 1>}, {transform_indices = @transform_4, window_bounds = array<i64: 1, 16, 1>}]} {
    %c0 = arith.constant 0 : index
    %c0_0 = arith.constant 0 : index
    %0 = vector.load %arg2[%c0, %c0_0] : memref<16x144xbf16, #tpu.memory_space<vmem>>, vector<16x144xbf16>
    %c0_1 = arith.constant 0 : index
    %c0_2 = arith.constant 0 : index
    %1 = vector.load %arg1[%c0_1, %c0_2] : memref<144x128xbf16, #tpu.memory_space<vmem>>, vector<144x128xbf16>
    %cst = arith.constant dense<0.000000e+00> : vector<16x128xf32>
    %2 = tpu.matmul %0, %1, %cst {dimension_numbers = #tpu.dot_dimension_numbers<[1], [0], [0], [1], [0, 0, 1, 1], [], []>} : vector<16x144xbf16>, vector<144x128xbf16>, vector<16x128xf32> -> vector<16x128xf32>
    %c0_3 = arith.constant 0 : index
    %c0_4 = arith.constant 0 : index
    %3 = vector.load %arg3[%c0_3, %c0_4] : memref<16x128xf32, #tpu.memory_space<vmem>>, vector<16x128xf32>
    tpu.vector_store %arg3[%c0_3, %c0_4], %2 {strides = array<i32>} : memref<16x128xf32, #tpu.memory_space<vmem>>, vector<16x128xf32>,
    %cst_5 = arith.constant dense<0.000000e+00> : vector<16xf32>
    %4 = vector.multi_reduction <add>, %2, %cst_5 [1] : vector<16x128xf32> to vector<16xf32>
    %5 = vector.shape_cast %4 : vector<16xf32> to vector<16x1xf32>
    %6 = vector.shape_cast %5 : vector<16x1xf32> to vector<1x16x1xf32>
    %c0_6 = arith.constant 0 : index
    %c0_7 = arith.constant 0 : index
    %c0_8 = arith.constant 0 : index
    %7 = vector.load %arg4[%c0_6, %c0_7, %c0_8] : memref<1x16x1xf32, #tpu.memory_space<vmem>>, vector<1x16x1xf32>
    tpu.vector_store %arg4[%c0_6, %c0_7, %c0_8], %6 {strides = array<i32>} : memref<1x16x1xf32, #tpu.memory_space<vmem>>, vector<1x16x1xf32>,
    %8 = arith.mulf %2, %2 : vector<16x128xf32>
    %cst_9 = arith.constant dense<0.000000e+00> : vector<16xf32>
    %9 = vector.multi_reduction <add>, %8, %cst_9 [1] : vector<16x128xf32> to vector<16xf32>
    %10 = vector.shape_cast %9 : vector<16xf32> to vector<16x1xf32>
    %11 = vector.shape_cast %10 : vector<16x1xf32> to vector<1x16x1xf32>
    %c0_10 = arith.constant 0 : index
    %c0_11 = arith.constant 0 : index
    %c0_12 = arith.constant 0 : index
    %12 = vector.load %arg5[%c0_10, %c0_11, %c0_12] : memref<1x16x1xf32, #tpu.memory_space<vmem>>, vector<1x16x1xf32>
    tpu.vector_store %arg5[%c0_10, %c0_11, %c0_12], %11 {strides = array<i32>} : memref<1x16x1xf32, #tpu.memory_space<vmem>>, vector<1x16x1xf32>,
    return
  }
  func.func @transform_0(%arg0: i32) -> (i32, i32) {
    %c0_i32 = arith.constant 0 : i32
    %c0_i32_0 = arith.constant 0 : i32
    return %c0_i32, %arg0 : i32, i32
  }
  func.func @transform_1(%arg0: i32) -> (i32, i32) {
    %c0_i32 = arith.constant 0 : i32
    %c0_i32_0 = arith.constant 0 : i32
    %c0_i32_1 = arith.constant 0 : i32
    return %c0_i32, %c0_i32_0 : i32, i32
  }
  func.func @transform_2(%arg0: i32) -> (i32, i32) {
    %c0_i32 = arith.constant 0 : i32
    %c0_i32_0 = arith.constant 0 : i32
    return %c0_i32, %arg0 : i32, i32
  }
  func.func @transform_3(%arg0: i32) -> (i32, i32, i32) {
    %c0_i32 = arith.constant 0 : i32
    %c0_i32_0 = arith.constant 0 : i32
    %c0_i32_1 = arith.constant 0 : i32
    return %arg0, %c0_i32, %c0_i32_0 : i32, i32, i32
  }
  func.func @transform_4(%arg0: i32) -> (i32, i32, i32) {
    %c0_i32 = arith.constant 0 : i32
    %c0_i32_0 = arith.constant 0 : i32
    %c0_i32_1 = arith.constant 0 : i32
    return %arg0, %c0_i32, %c0_i32_0 : i32, i32, i32
  }
}

module attributes {stable_mosaic.version = 11 : i64} {
  func.func @_maxpool_kernel(%arg0: i32, %arg1: memref<16x32xf32, #tpu.memory_space<vmem>>, %arg2: memref<16x32xf32, #tpu.memory_space<vmem>>, %arg3: memref<16x32xf32, #tpu.memory_space<vmem>>, %arg4: memref<16x32xf32, #tpu.memory_space<vmem>>, %arg5: memref<16x32xf32, #tpu.memory_space<vmem>>) attributes {dimension_semantics = [#tpu.dimension_semantics<parallel>], iteration_bounds = array<i64: 1>, scalar_prefetch = 0 : i64, scratch_operands = 0 : i64, tpu.core_type = #tpu.core_type<tc>, window_params = [{transform_indices = @transform_0, window_bounds = array<i64: 16, 32>}, {transform_indices = @transform_1, window_bounds = array<i64: 16, 32>}, {transform_indices = @transform_2, window_bounds = array<i64: 16, 32>}, {transform_indices = @transform_3, window_bounds = array<i64: 16, 32>}, {transform_indices = @transform_4, window_bounds = array<i64: 16, 32>}]} {
    %c0 = arith.constant 0 : index
    %c0_0 = arith.constant 0 : index
    %0 = vector.load %arg1[%c0, %c0_0] : memref<16x32xf32, #tpu.memory_space<vmem>>, vector<16x32xf32>
    %c0_1 = arith.constant 0 : index
    %c0_2 = arith.constant 0 : index
    %1 = vector.load %arg2[%c0_1, %c0_2] : memref<16x32xf32, #tpu.memory_space<vmem>>, vector<16x32xf32>
    %2 = arith.maximumf %0, %1 : vector<16x32xf32>
    %c0_3 = arith.constant 0 : index
    %c0_4 = arith.constant 0 : index
    %3 = vector.load %arg3[%c0_3, %c0_4] : memref<16x32xf32, #tpu.memory_space<vmem>>, vector<16x32xf32>
    %c0_5 = arith.constant 0 : index
    %c0_6 = arith.constant 0 : index
    %4 = vector.load %arg4[%c0_5, %c0_6] : memref<16x32xf32, #tpu.memory_space<vmem>>, vector<16x32xf32>
    %5 = arith.maximumf %3, %4 : vector<16x32xf32>
    %6 = arith.maximumf %2, %5 : vector<16x32xf32>
    %c0_7 = arith.constant 0 : index
    %c0_8 = arith.constant 0 : index
    %7 = vector.load %arg5[%c0_7, %c0_8] : memref<16x32xf32, #tpu.memory_space<vmem>>, vector<16x32xf32>
    tpu.vector_store %arg5[%c0_7, %c0_8], %6 {strides = array<i32>} : memref<16x32xf32, #tpu.memory_space<vmem>>, vector<16x32xf32>,
    return
  }
  func.func @transform_0(%arg0: i32) -> (i32, i32) {
    %c0_i32 = arith.constant 0 : i32
    %c0_i32_0 = arith.constant 0 : i32
    return %c0_i32, %arg0 : i32, i32
  }
  func.func @transform_1(%arg0: i32) -> (i32, i32) {
    %c0_i32 = arith.constant 0 : i32
    %c0_i32_0 = arith.constant 0 : i32
    return %c0_i32, %arg0 : i32, i32
  }
  func.func @transform_2(%arg0: i32) -> (i32, i32) {
    %c0_i32 = arith.constant 0 : i32
    %c0_i32_0 = arith.constant 0 : i32
    return %c0_i32, %arg0 : i32, i32
  }
  func.func @transform_3(%arg0: i32) -> (i32, i32) {
    %c0_i32 = arith.constant 0 : i32
    %c0_i32_0 = arith.constant 0 : i32
    return %c0_i32, %arg0 : i32, i32
  }
  func.func @transform_4(%arg0: i32) -> (i32, i32) {
    %c0_i32 = arith.constant 0 : i32
    %c0_i32_0 = arith.constant 0 : i32
    return %c0_i32, %arg0 : i32, i32
  }
}

module attributes {stable_mosaic.version = 11 : i64} {
  func.func @_conv3x3_stats_kernel(%arg0: i32, %arg1: memref<144x32xbf16, #tpu.memory_space<vmem>>, %arg2: memref<32x144xbf16, #tpu.memory_space<vmem>>, %arg3: memref<32x32xf32, #tpu.memory_space<vmem>>, %arg4: memref<1x32x1xf32, #tpu.memory_space<vmem>>, %arg5: memref<1x32x1xf32, #tpu.memory_space<vmem>>) attributes {dimension_semantics = [#tpu.dimension_semantics<parallel>], iteration_bounds = array<i64: 1>, scalar_prefetch = 0 : i64, scratch_operands = 0 : i64, tpu.core_type = #tpu.core_type<tc>, window_params = [{transform_indices = @transform_0, window_bounds = array<i64: 144, 32>}, {pipeline_mode = #tpu.pipeline_mode<synchronous>, transform_indices = @transform_1, window_bounds = array<i64: 32, 144>}, {transform_indices = @transform_2, window_bounds = array<i64: 32, 32>}, {transform_indices = @transform_3, window_bounds = array<i64: 1, 32, 1>}, {transform_indices = @transform_4, window_bounds = array<i64: 1, 32, 1>}]} {
    %c0 = arith.constant 0 : index
    %c0_0 = arith.constant 0 : index
    %0 = vector.load %arg2[%c0, %c0_0] : memref<32x144xbf16, #tpu.memory_space<vmem>>, vector<32x144xbf16>
    %c0_1 = arith.constant 0 : index
    %c0_2 = arith.constant 0 : index
    %1 = vector.load %arg1[%c0_1, %c0_2] : memref<144x32xbf16, #tpu.memory_space<vmem>>, vector<144x32xbf16>
    %cst = arith.constant dense<0.000000e+00> : vector<32x32xf32>
    %2 = tpu.matmul %0, %1, %cst {dimension_numbers = #tpu.dot_dimension_numbers<[1], [0], [0], [1], [0, 0, 1, 1], [], []>} : vector<32x144xbf16>, vector<144x32xbf16>, vector<32x32xf32> -> vector<32x32xf32>
    %c0_3 = arith.constant 0 : index
    %c0_4 = arith.constant 0 : index
    %3 = vector.load %arg3[%c0_3, %c0_4] : memref<32x32xf32, #tpu.memory_space<vmem>>, vector<32x32xf32>
    tpu.vector_store %arg3[%c0_3, %c0_4], %2 {strides = array<i32>} : memref<32x32xf32, #tpu.memory_space<vmem>>, vector<32x32xf32>,
    %cst_5 = arith.constant dense<0.000000e+00> : vector<32xf32>
    %4 = vector.multi_reduction <add>, %2, %cst_5 [1] : vector<32x32xf32> to vector<32xf32>
    %5 = vector.shape_cast %4 : vector<32xf32> to vector<32x1xf32>
    %6 = vector.shape_cast %5 : vector<32x1xf32> to vector<1x32x1xf32>
    %c0_6 = arith.constant 0 : index
    %c0_7 = arith.constant 0 : index
    %c0_8 = arith.constant 0 : index
    %7 = vector.load %arg4[%c0_6, %c0_7, %c0_8] : memref<1x32x1xf32, #tpu.memory_space<vmem>>, vector<1x32x1xf32>
    tpu.vector_store %arg4[%c0_6, %c0_7, %c0_8], %6 {strides = array<i32>} : memref<1x32x1xf32, #tpu.memory_space<vmem>>, vector<1x32x1xf32>,
    %8 = arith.mulf %2, %2 : vector<32x32xf32>
    %cst_9 = arith.constant dense<0.000000e+00> : vector<32xf32>
    %9 = vector.multi_reduction <add>, %8, %cst_9 [1] : vector<32x32xf32> to vector<32xf32>
    %10 = vector.shape_cast %9 : vector<32xf32> to vector<32x1xf32>
    %11 = vector.shape_cast %10 : vector<32x1xf32> to vector<1x32x1xf32>
    %c0_10 = arith.constant 0 : index
    %c0_11 = arith.constant 0 : index
    %c0_12 = arith.constant 0 : index
    %12 = vector.load %arg5[%c0_10, %c0_11, %c0_12] : memref<1x32x1xf32, #tpu.memory_space<vmem>>, vector<1x32x1xf32>
    tpu.vector_store %arg5[%c0_10, %c0_11, %c0_12], %11 {strides = array<i32>} : memref<1x32x1xf32, #tpu.memory_space<vmem>>, vector<1x32x1xf32>,
    return
  }
  func.func @transform_0(%arg0: i32) -> (i32, i32) {
    %c0_i32 = arith.constant 0 : i32
    %c0_i32_0 = arith.constant 0 : i32
    return %c0_i32, %arg0 : i32, i32
  }
  func.func @transform_1(%arg0: i32) -> (i32, i32) {
    %c0_i32 = arith.constant 0 : i32
    %c0_i32_0 = arith.constant 0 : i32
    %c0_i32_1 = arith.constant 0 : i32
    return %c0_i32, %c0_i32_0 : i32, i32
  }
  func.func @transform_2(%arg0: i32) -> (i32, i32) {
    %c0_i32 = arith.constant 0 : i32
    %c0_i32_0 = arith.constant 0 : i32
    return %c0_i32, %arg0 : i32, i32
  }
  func.func @transform_3(%arg0: i32) -> (i32, i32, i32) {
    %c0_i32 = arith.constant 0 : i32
    %c0_i32_0 = arith.constant 0 : i32
    %c0_i32_1 = arith.constant 0 : i32
    return %arg0, %c0_i32, %c0_i32_0 : i32, i32, i32
  }
  func.func @transform_4(%arg0: i32) -> (i32, i32, i32) {
    %c0_i32 = arith.constant 0 : i32
    %c0_i32_0 = arith.constant 0 : i32
    %c0_i32_1 = arith.constant 0 : i32
    return %arg0, %c0_i32, %c0_i32_0 : i32, i32, i32
  }
}

module attributes {stable_mosaic.version = 11 : i64} {
  func.func @_bn_relu_kernel(%arg0: i32, %arg1: memref<32x32xf32, #tpu.memory_space<vmem>>, %arg2: memref<32x1xf32, #tpu.memory_space<vmem>>, %arg3: memref<32x1xf32, #tpu.memory_space<vmem>>, %arg4: memref<32x32xf32, #tpu.memory_space<vmem>>) attributes {dimension_semantics = [#tpu.dimension_semantics<parallel>], iteration_bounds = array<i64: 1>, scalar_prefetch = 0 : i64, scratch_operands = 0 : i64, tpu.core_type = #tpu.core_type<tc>, window_params = [{transform_indices = @transform_0, window_bounds = array<i64: 32, 32>}, {pipeline_mode = #tpu.pipeline_mode<synchronous>, transform_indices = @transform_1, window_bounds = array<i64: 32, 1>}, {pipeline_mode = #tpu.pipeline_mode<synchronous>, transform_indices = @transform_2, window_bounds = array<i64: 32, 1>}, {transform_indices = @transform_3, window_bounds = array<i64: 32, 32>}]} {
    %c0 = arith.constant 0 : index
    %c0_0 = arith.constant 0 : index
    %0 = vector.load %arg1[%c0, %c0_0] : memref<32x32xf32, #tpu.memory_space<vmem>>, vector<32x32xf32>
    %c0_1 = arith.constant 0 : index
    %c0_2 = arith.constant 0 : index
    %1 = vector.load %arg2[%c0_1, %c0_2] : memref<32x1xf32, #tpu.memory_space<vmem>>, vector<32x1xf32>
    %2 = vector.broadcast %1 : vector<32x1xf32> to vector<32x32xf32>
    %3 = arith.mulf %0, %2 : vector<32x32xf32>
    %c0_3 = arith.constant 0 : index
    %c0_4 = arith.constant 0 : index
    %4 = vector.load %arg3[%c0_3, %c0_4] : memref<32x1xf32, #tpu.memory_space<vmem>>, vector<32x1xf32>
    %5 = vector.broadcast %4 : vector<32x1xf32> to vector<32x32xf32>
    %6 = arith.addf %3, %5 : vector<32x32xf32>
    %cst = arith.constant 0.000000e+00 : f32
    %7 = vector.broadcast %cst : f32 to vector<32x32xf32>
    %8 = arith.maximumf %6, %7 : vector<32x32xf32>
    %c0_5 = arith.constant 0 : index
    %c0_6 = arith.constant 0 : index
    %9 = vector.load %arg4[%c0_5, %c0_6] : memref<32x32xf32, #tpu.memory_space<vmem>>, vector<32x32xf32>
    tpu.vector_store %arg4[%c0_5, %c0_6], %8 {strides = array<i32>} : memref<32x32xf32, #tpu.memory_space<vmem>>, vector<32x32xf32>,
    return
  }
  func.func @transform_0(%arg0: i32) -> (i32, i32) {
    %c0_i32 = arith.constant 0 : i32
    %c0_i32_0 = arith.constant 0 : i32
    return %c0_i32, %arg0 : i32, i32
  }
  func.func @transform_1(%arg0: i32) -> (i32, i32) {
    %c0_i32 = arith.constant 0 : i32
    %c0_i32_0 = arith.constant 0 : i32
    %c0_i32_1 = arith.constant 0 : i32
    return %c0_i32, %c0_i32_0 : i32, i32
  }
  func.func @transform_2(%arg0: i32) -> (i32, i32) {
    %c0_i32 = arith.constant 0 : i32
    %c0_i32_0 = arith.constant 0 : i32
    %c0_i32_1 = arith.constant 0 : i32
    return %c0_i32, %c0_i32_0 : i32, i32
  }
  func.func @transform_3(%arg0: i32) -> (i32, i32) {
    %c0_i32 = arith.constant 0 : i32
    %c0_i32_0 = arith.constant 0 : i32
    return %c0_i32, %arg0 : i32, i32
  }
}

module attributes {stable_mosaic.version = 11 : i64} {
  func.func @_conv3x3_stats_kernel(%arg0: i32, %arg1: memref<288x32xbf16, #tpu.memory_space<vmem>>, %arg2: memref<32x288xbf16, #tpu.memory_space<vmem>>, %arg3: memref<32x32xf32, #tpu.memory_space<vmem>>, %arg4: memref<1x32x1xf32, #tpu.memory_space<vmem>>, %arg5: memref<1x32x1xf32, #tpu.memory_space<vmem>>) attributes {dimension_semantics = [#tpu.dimension_semantics<parallel>], iteration_bounds = array<i64: 1>, scalar_prefetch = 0 : i64, scratch_operands = 0 : i64, tpu.core_type = #tpu.core_type<tc>, window_params = [{transform_indices = @transform_0, window_bounds = array<i64: 288, 32>}, {pipeline_mode = #tpu.pipeline_mode<synchronous>, transform_indices = @transform_1, window_bounds = array<i64: 32, 288>}, {transform_indices = @transform_2, window_bounds = array<i64: 32, 32>}, {transform_indices = @transform_3, window_bounds = array<i64: 1, 32, 1>}, {transform_indices = @transform_4, window_bounds = array<i64: 1, 32, 1>}]} {
    %c0 = arith.constant 0 : index
    %c0_0 = arith.constant 0 : index
    %0 = vector.load %arg2[%c0, %c0_0] : memref<32x288xbf16, #tpu.memory_space<vmem>>, vector<32x288xbf16>
    %c0_1 = arith.constant 0 : index
    %c0_2 = arith.constant 0 : index
    %1 = vector.load %arg1[%c0_1, %c0_2] : memref<288x32xbf16, #tpu.memory_space<vmem>>, vector<288x32xbf16>
    %cst = arith.constant dense<0.000000e+00> : vector<32x32xf32>
    %2 = tpu.matmul %0, %1, %cst {dimension_numbers = #tpu.dot_dimension_numbers<[1], [0], [0], [1], [0, 0, 1, 1], [], []>} : vector<32x288xbf16>, vector<288x32xbf16>, vector<32x32xf32> -> vector<32x32xf32>
    %c0_3 = arith.constant 0 : index
    %c0_4 = arith.constant 0 : index
    %3 = vector.load %arg3[%c0_3, %c0_4] : memref<32x32xf32, #tpu.memory_space<vmem>>, vector<32x32xf32>
    tpu.vector_store %arg3[%c0_3, %c0_4], %2 {strides = array<i32>} : memref<32x32xf32, #tpu.memory_space<vmem>>, vector<32x32xf32>,
    %cst_5 = arith.constant dense<0.000000e+00> : vector<32xf32>
    %4 = vector.multi_reduction <add>, %2, %cst_5 [1] : vector<32x32xf32> to vector<32xf32>
    %5 = vector.shape_cast %4 : vector<32xf32> to vector<32x1xf32>
    %6 = vector.shape_cast %5 : vector<32x1xf32> to vector<1x32x1xf32>
    %c0_6 = arith.constant 0 : index
    %c0_7 = arith.constant 0 : index
    %c0_8 = arith.constant 0 : index
    %7 = vector.load %arg4[%c0_6, %c0_7, %c0_8] : memref<1x32x1xf32, #tpu.memory_space<vmem>>, vector<1x32x1xf32>
    tpu.vector_store %arg4[%c0_6, %c0_7, %c0_8], %6 {strides = array<i32>} : memref<1x32x1xf32, #tpu.memory_space<vmem>>, vector<1x32x1xf32>,
    %8 = arith.mulf %2, %2 : vector<32x32xf32>
    %cst_9 = arith.constant dense<0.000000e+00> : vector<32xf32>
    %9 = vector.multi_reduction <add>, %8, %cst_9 [1] : vector<32x32xf32> to vector<32xf32>
    %10 = vector.shape_cast %9 : vector<32xf32> to vector<32x1xf32>
    %11 = vector.shape_cast %10 : vector<32x1xf32> to vector<1x32x1xf32>
    %c0_10 = arith.constant 0 : index
    %c0_11 = arith.constant 0 : index
    %c0_12 = arith.constant 0 : index
    %12 = vector.load %arg5[%c0_10, %c0_11, %c0_12] : memref<1x32x1xf32, #tpu.memory_space<vmem>>, vector<1x32x1xf32>
    tpu.vector_store %arg5[%c0_10, %c0_11, %c0_12], %11 {strides = array<i32>} : memref<1x32x1xf32, #tpu.memory_space<vmem>>, vector<1x32x1xf32>,
    return
  }
  func.func @transform_0(%arg0: i32) -> (i32, i32) {
    %c0_i32 = arith.constant 0 : i32
    %c0_i32_0 = arith.constant 0 : i32
    return %c0_i32, %arg0 : i32, i32
  }
  func.func @transform_1(%arg0: i32) -> (i32, i32) {
    %c0_i32 = arith.constant 0 : i32
    %c0_i32_0 = arith.constant 0 : i32
    %c0_i32_1 = arith.constant 0 : i32
    return %c0_i32, %c0_i32_0 : i32, i32
  }
  func.func @transform_2(%arg0: i32) -> (i32, i32) {
    %c0_i32 = arith.constant 0 : i32
    %c0_i32_0 = arith.constant 0 : i32
    return %c0_i32, %arg0 : i32, i32
  }
  func.func @transform_3(%arg0: i32) -> (i32, i32, i32) {
    %c0_i32 = arith.constant 0 : i32
    %c0_i32_0 = arith.constant 0 : i32
    %c0_i32_1 = arith.constant 0 : i32
    return %arg0, %c0_i32, %c0_i32_0 : i32, i32, i32
  }
  func.func @transform_4(%arg0: i32) -> (i32, i32, i32) {
    %c0_i32 = arith.constant 0 : i32
    %c0_i32_0 = arith.constant 0 : i32
    %c0_i32_1 = arith.constant 0 : i32
    return %arg0, %c0_i32, %c0_i32_0 : i32, i32, i32
  }
}

module attributes {stable_mosaic.version = 11 : i64} {
  func.func @_convT2x2_kernel(%arg0: i32, %arg1: memref<32x32xf32, #tpu.memory_space<vmem>>, %arg2: memref<64x32xf32, #tpu.memory_space<vmem>>, %arg3: memref<64x1xf32, #tpu.memory_space<vmem>>, %arg4: memref<64x32xf32, #tpu.memory_space<vmem>>) attributes {dimension_semantics = [#tpu.dimension_semantics<parallel>], iteration_bounds = array<i64: 1>, scalar_prefetch = 0 : i64, scratch_operands = 0 : i64, tpu.core_type = #tpu.core_type<tc>, window_params = [{transform_indices = @transform_0, window_bounds = array<i64: 32, 32>}, {pipeline_mode = #tpu.pipeline_mode<synchronous>, transform_indices = @transform_1, window_bounds = array<i64: 64, 32>}, {pipeline_mode = #tpu.pipeline_mode<synchronous>, transform_indices = @transform_2, window_bounds = array<i64: 64, 1>}, {transform_indices = @transform_3, window_bounds = array<i64: 64, 32>}]} {
    %c0 = arith.constant 0 : index
    %c0_0 = arith.constant 0 : index
    %0 = vector.load %arg2[%c0, %c0_0] : memref<64x32xf32, #tpu.memory_space<vmem>>, vector<64x32xf32>
    %c0_1 = arith.constant 0 : index
    %c0_2 = arith.constant 0 : index
    %1 = vector.load %arg1[%c0_1, %c0_2] : memref<32x32xf32, #tpu.memory_space<vmem>>, vector<32x32xf32>
    %cst = arith.constant dense<0.000000e+00> : vector<64x32xf32>
    %2 = tpu.matmul %0, %1, %cst {dimension_numbers = #tpu.dot_dimension_numbers<[1], [0], [0], [1], [0, 0, 1, 1], [], []>} : vector<64x32xf32>, vector<32x32xf32>, vector<64x32xf32> -> vector<64x32xf32>
    %c0_3 = arith.constant 0 : index
    %c0_4 = arith.constant 0 : index
    %3 = vector.load %arg3[%c0_3, %c0_4] : memref<64x1xf32, #tpu.memory_space<vmem>>, vector<64x1xf32>
    %4 = vector.broadcast %3 : vector<64x1xf32> to vector<64x32xf32>
    %5 = arith.addf %2, %4 : vector<64x32xf32>
    %c0_5 = arith.constant 0 : index
    %c0_6 = arith.constant 0 : index
    %6 = vector.load %arg4[%c0_5, %c0_6] : memref<64x32xf32, #tpu.memory_space<vmem>>, vector<64x32xf32>
    tpu.vector_store %arg4[%c0_5, %c0_6], %5 {strides = array<i32>} : memref<64x32xf32, #tpu.memory_space<vmem>>, vector<64x32xf32>,
    return
  }
  func.func @transform_0(%arg0: i32) -> (i32, i32) {
    %c0_i32 = arith.constant 0 : i32
    %c0_i32_0 = arith.constant 0 : i32
    return %c0_i32, %arg0 : i32, i32
  }
  func.func @transform_1(%arg0: i32) -> (i32, i32) {
    %c0_i32 = arith.constant 0 : i32
    %c0_i32_0 = arith.constant 0 : i32
    %c0_i32_1 = arith.constant 0 : i32
    return %c0_i32, %c0_i32_0 : i32, i32
  }
  func.func @transform_2(%arg0: i32) -> (i32, i32) {
    %c0_i32 = arith.constant 0 : i32
    %c0_i32_0 = arith.constant 0 : i32
    %c0_i32_1 = arith.constant 0 : i32
    return %c0_i32, %c0_i32_0 : i32, i32
  }
  func.func @transform_3(%arg0: i32) -> (i32, i32) {
    %c0_i32 = arith.constant 0 : i32
    %c0_i32_0 = arith.constant 0 : i32
    return %c0_i32, %arg0 : i32, i32
  }
}

module attributes {stable_mosaic.version = 11 : i64} {
  func.func @_convT2x2_kernel(%arg0: i32, %arg1: memref<16x128xf32, #tpu.memory_space<vmem>>, %arg2: memref<32x16xf32, #tpu.memory_space<vmem>>, %arg3: memref<32x1xf32, #tpu.memory_space<vmem>>, %arg4: memref<32x128xf32, #tpu.memory_space<vmem>>) attributes {dimension_semantics = [#tpu.dimension_semantics<parallel>], iteration_bounds = array<i64: 1>, scalar_prefetch = 0 : i64, scratch_operands = 0 : i64, tpu.core_type = #tpu.core_type<tc>, window_params = [{transform_indices = @transform_0, window_bounds = array<i64: 16, 128>}, {pipeline_mode = #tpu.pipeline_mode<synchronous>, transform_indices = @transform_1, window_bounds = array<i64: 32, 16>}, {pipeline_mode = #tpu.pipeline_mode<synchronous>, transform_indices = @transform_2, window_bounds = array<i64: 32, 1>}, {transform_indices = @transform_3, window_bounds = array<i64: 32, 128>}]} {
    %c0 = arith.constant 0 : index
    %c0_0 = arith.constant 0 : index
    %0 = vector.load %arg2[%c0, %c0_0] : memref<32x16xf32, #tpu.memory_space<vmem>>, vector<32x16xf32>
    %c0_1 = arith.constant 0 : index
    %c0_2 = arith.constant 0 : index
    %1 = vector.load %arg1[%c0_1, %c0_2] : memref<16x128xf32, #tpu.memory_space<vmem>>, vector<16x128xf32>
    %cst = arith.constant dense<0.000000e+00> : vector<32x128xf32>
    %2 = tpu.matmul %0, %1, %cst {dimension_numbers = #tpu.dot_dimension_numbers<[1], [0], [0], [1], [0, 0, 1, 1], [], []>} : vector<32x16xf32>, vector<16x128xf32>, vector<32x128xf32> -> vector<32x128xf32>
    %c0_3 = arith.constant 0 : index
    %c0_4 = arith.constant 0 : index
    %3 = vector.load %arg3[%c0_3, %c0_4] : memref<32x1xf32, #tpu.memory_space<vmem>>, vector<32x1xf32>
    %4 = vector.broadcast %3 : vector<32x1xf32> to vector<32x128xf32>
    %5 = arith.addf %2, %4 : vector<32x128xf32>
    %c0_5 = arith.constant 0 : index
    %c0_6 = arith.constant 0 : index
    %6 = vector.load %arg4[%c0_5, %c0_6] : memref<32x128xf32, #tpu.memory_space<vmem>>, vector<32x128xf32>
    tpu.vector_store %arg4[%c0_5, %c0_6], %5 {strides = array<i32>} : memref<32x128xf32, #tpu.memory_space<vmem>>, vector<32x128xf32>,
    return
  }
  func.func @transform_0(%arg0: i32) -> (i32, i32) {
    %c0_i32 = arith.constant 0 : i32
    %c0_i32_0 = arith.constant 0 : i32
    return %c0_i32, %arg0 : i32, i32
  }
  func.func @transform_1(%arg0: i32) -> (i32, i32) {
    %c0_i32 = arith.constant 0 : i32
    %c0_i32_0 = arith.constant 0 : i32
    %c0_i32_1 = arith.constant 0 : i32
    return %c0_i32, %c0_i32_0 : i32, i32
  }
  func.func @transform_2(%arg0: i32) -> (i32, i32) {
    %c0_i32 = arith.constant 0 : i32
    %c0_i32_0 = arith.constant 0 : i32
    %c0_i32_1 = arith.constant 0 : i32
    return %c0_i32, %c0_i32_0 : i32, i32
  }
  func.func @transform_3(%arg0: i32) -> (i32, i32) {
    %c0_i32 = arith.constant 0 : i32
    %c0_i32_0 = arith.constant 0 : i32
    return %c0_i32, %arg0 : i32, i32
  }
}

module attributes {stable_mosaic.version = 11 : i64} {
  func.func @_conv3x3_stats_kernel(%arg0: i32, %arg1: memref<288x128xbf16, #tpu.memory_space<vmem>>, %arg2: memref<16x288xbf16, #tpu.memory_space<vmem>>, %arg3: memref<16x128xf32, #tpu.memory_space<vmem>>, %arg4: memref<1x16x1xf32, #tpu.memory_space<vmem>>, %arg5: memref<1x16x1xf32, #tpu.memory_space<vmem>>) attributes {dimension_semantics = [#tpu.dimension_semantics<parallel>], iteration_bounds = array<i64: 1>, scalar_prefetch = 0 : i64, scratch_operands = 0 : i64, tpu.core_type = #tpu.core_type<tc>, window_params = [{transform_indices = @transform_0, window_bounds = array<i64: 288, 128>}, {pipeline_mode = #tpu.pipeline_mode<synchronous>, transform_indices = @transform_1, window_bounds = array<i64: 16, 288>}, {transform_indices = @transform_2, window_bounds = array<i64: 16, 128>}, {transform_indices = @transform_3, window_bounds = array<i64: 1, 16, 1>}, {transform_indices = @transform_4, window_bounds = array<i64: 1, 16, 1>}]} {
    %c0 = arith.constant 0 : index
    %c0_0 = arith.constant 0 : index
    %0 = vector.load %arg2[%c0, %c0_0] : memref<16x288xbf16, #tpu.memory_space<vmem>>, vector<16x288xbf16>
    %c0_1 = arith.constant 0 : index
    %c0_2 = arith.constant 0 : index
    %1 = vector.load %arg1[%c0_1, %c0_2] : memref<288x128xbf16, #tpu.memory_space<vmem>>, vector<288x128xbf16>
    %cst = arith.constant dense<0.000000e+00> : vector<16x128xf32>
    %2 = tpu.matmul %0, %1, %cst {dimension_numbers = #tpu.dot_dimension_numbers<[1], [0], [0], [1], [0, 0, 1, 1], [], []>} : vector<16x288xbf16>, vector<288x128xbf16>, vector<16x128xf32> -> vector<16x128xf32>
    %c0_3 = arith.constant 0 : index
    %c0_4 = arith.constant 0 : index
    %3 = vector.load %arg3[%c0_3, %c0_4] : memref<16x128xf32, #tpu.memory_space<vmem>>, vector<16x128xf32>
    tpu.vector_store %arg3[%c0_3, %c0_4], %2 {strides = array<i32>} : memref<16x128xf32, #tpu.memory_space<vmem>>, vector<16x128xf32>,
    %cst_5 = arith.constant dense<0.000000e+00> : vector<16xf32>
    %4 = vector.multi_reduction <add>, %2, %cst_5 [1] : vector<16x128xf32> to vector<16xf32>
    %5 = vector.shape_cast %4 : vector<16xf32> to vector<16x1xf32>
    %6 = vector.shape_cast %5 : vector<16x1xf32> to vector<1x16x1xf32>
    %c0_6 = arith.constant 0 : index
    %c0_7 = arith.constant 0 : index
    %c0_8 = arith.constant 0 : index
    %7 = vector.load %arg4[%c0_6, %c0_7, %c0_8] : memref<1x16x1xf32, #tpu.memory_space<vmem>>, vector<1x16x1xf32>
    tpu.vector_store %arg4[%c0_6, %c0_7, %c0_8], %6 {strides = array<i32>} : memref<1x16x1xf32, #tpu.memory_space<vmem>>, vector<1x16x1xf32>,
    %8 = arith.mulf %2, %2 : vector<16x128xf32>
    %cst_9 = arith.constant dense<0.000000e+00> : vector<16xf32>
    %9 = vector.multi_reduction <add>, %8, %cst_9 [1] : vector<16x128xf32> to vector<16xf32>
    %10 = vector.shape_cast %9 : vector<16xf32> to vector<16x1xf32>
    %11 = vector.shape_cast %10 : vector<16x1xf32> to vector<1x16x1xf32>
    %c0_10 = arith.constant 0 : index
    %c0_11 = arith.constant 0 : index
    %c0_12 = arith.constant 0 : index
    %12 = vector.load %arg5[%c0_10, %c0_11, %c0_12] : memref<1x16x1xf32, #tpu.memory_space<vmem>>, vector<1x16x1xf32>
    tpu.vector_store %arg5[%c0_10, %c0_11, %c0_12], %11 {strides = array<i32>} : memref<1x16x1xf32, #tpu.memory_space<vmem>>, vector<1x16x1xf32>,
    return
  }
  func.func @transform_0(%arg0: i32) -> (i32, i32) {
    %c0_i32 = arith.constant 0 : i32
    %c0_i32_0 = arith.constant 0 : i32
    return %c0_i32, %arg0 : i32, i32
  }
  func.func @transform_1(%arg0: i32) -> (i32, i32) {
    %c0_i32 = arith.constant 0 : i32
    %c0_i32_0 = arith.constant 0 : i32
    %c0_i32_1 = arith.constant 0 : i32
    return %c0_i32, %c0_i32_0 : i32, i32
  }
  func.func @transform_2(%arg0: i32) -> (i32, i32) {
    %c0_i32 = arith.constant 0 : i32
    %c0_i32_0 = arith.constant 0 : i32
    return %c0_i32, %arg0 : i32, i32
  }
  func.func @transform_3(%arg0: i32) -> (i32, i32, i32) {
    %c0_i32 = arith.constant 0 : i32
    %c0_i32_0 = arith.constant 0 : i32
    %c0_i32_1 = arith.constant 0 : i32
    return %arg0, %c0_i32, %c0_i32_0 : i32, i32, i32
  }
  func.func @transform_4(%arg0: i32) -> (i32, i32, i32) {
    %c0_i32 = arith.constant 0 : i32
    %c0_i32_0 = arith.constant 0 : i32
    %c0_i32_1 = arith.constant 0 : i32
    return %arg0, %c0_i32, %c0_i32_0 : i32, i32, i32
  }
}

module attributes {stable_mosaic.version = 11 : i64} {
  func.func @_conv3x3_stats_kernel(%arg0: i32, %arg1: memref<144x512xbf16, #tpu.memory_space<vmem>>, %arg2: memref<8x144xbf16, #tpu.memory_space<vmem>>, %arg3: memref<8x512xf32, #tpu.memory_space<vmem>>, %arg4: memref<1x8x1xf32, #tpu.memory_space<vmem>>, %arg5: memref<1x8x1xf32, #tpu.memory_space<vmem>>) attributes {dimension_semantics = [#tpu.dimension_semantics<parallel>], iteration_bounds = array<i64: 1>, scalar_prefetch = 0 : i64, scratch_operands = 0 : i64, tpu.core_type = #tpu.core_type<tc>, window_params = [{transform_indices = @transform_0, window_bounds = array<i64: 144, 512>}, {pipeline_mode = #tpu.pipeline_mode<synchronous>, transform_indices = @transform_1, window_bounds = array<i64: 8, 144>}, {transform_indices = @transform_2, window_bounds = array<i64: 8, 512>}, {transform_indices = @transform_3, window_bounds = array<i64: 1, 8, 1>}, {transform_indices = @transform_4, window_bounds = array<i64: 1, 8, 1>}]} {
    %c0 = arith.constant 0 : index
    %c0_0 = arith.constant 0 : index
    %0 = vector.load %arg2[%c0, %c0_0] : memref<8x144xbf16, #tpu.memory_space<vmem>>, vector<8x144xbf16>
    %c0_1 = arith.constant 0 : index
    %c0_2 = arith.constant 0 : index
    %1 = vector.load %arg1[%c0_1, %c0_2] : memref<144x512xbf16, #tpu.memory_space<vmem>>, vector<144x512xbf16>
    %cst = arith.constant dense<0.000000e+00> : vector<8x512xf32>
    %2 = tpu.matmul %0, %1, %cst {dimension_numbers = #tpu.dot_dimension_numbers<[1], [0], [0], [1], [0, 0, 1, 1], [], []>} : vector<8x144xbf16>, vector<144x512xbf16>, vector<8x512xf32> -> vector<8x512xf32>
    %c0_3 = arith.constant 0 : index
    %c0_4 = arith.constant 0 : index
    %3 = vector.load %arg3[%c0_3, %c0_4] : memref<8x512xf32, #tpu.memory_space<vmem>>, vector<8x512xf32>
    tpu.vector_store %arg3[%c0_3, %c0_4], %2 {strides = array<i32>} : memref<8x512xf32, #tpu.memory_space<vmem>>, vector<8x512xf32>,
    %cst_5 = arith.constant dense<0.000000e+00> : vector<8xf32>
    %4 = vector.multi_reduction <add>, %2, %cst_5 [1] : vector<8x512xf32> to vector<8xf32>
    %5 = vector.shape_cast %4 : vector<8xf32> to vector<8x1xf32>
    %6 = vector.shape_cast %5 : vector<8x1xf32> to vector<1x8x1xf32>
    %c0_6 = arith.constant 0 : index
    %c0_7 = arith.constant 0 : index
    %c0_8 = arith.constant 0 : index
    %7 = vector.load %arg4[%c0_6, %c0_7, %c0_8] : memref<1x8x1xf32, #tpu.memory_space<vmem>>, vector<1x8x1xf32>
    tpu.vector_store %arg4[%c0_6, %c0_7, %c0_8], %6 {strides = array<i32>} : memref<1x8x1xf32, #tpu.memory_space<vmem>>, vector<1x8x1xf32>,
    %8 = arith.mulf %2, %2 : vector<8x512xf32>
    %cst_9 = arith.constant dense<0.000000e+00> : vector<8xf32>
    %9 = vector.multi_reduction <add>, %8, %cst_9 [1] : vector<8x512xf32> to vector<8xf32>
    %10 = vector.shape_cast %9 : vector<8xf32> to vector<8x1xf32>
    %11 = vector.shape_cast %10 : vector<8x1xf32> to vector<1x8x1xf32>
    %c0_10 = arith.constant 0 : index
    %c0_11 = arith.constant 0 : index
    %c0_12 = arith.constant 0 : index
    %12 = vector.load %arg5[%c0_10, %c0_11, %c0_12] : memref<1x8x1xf32, #tpu.memory_space<vmem>>, vector<1x8x1xf32>
    tpu.vector_store %arg5[%c0_10, %c0_11, %c0_12], %11 {strides = array<i32>} : memref<1x8x1xf32, #tpu.memory_space<vmem>>, vector<1x8x1xf32>,
    return
  }
  func.func @transform_0(%arg0: i32) -> (i32, i32) {
    %c0_i32 = arith.constant 0 : i32
    %c0_i32_0 = arith.constant 0 : i32
    return %c0_i32, %arg0 : i32, i32
  }
  func.func @transform_1(%arg0: i32) -> (i32, i32) {
    %c0_i32 = arith.constant 0 : i32
    %c0_i32_0 = arith.constant 0 : i32
    %c0_i32_1 = arith.constant 0 : i32
    return %c0_i32, %c0_i32_0 : i32, i32
  }
  func.func @transform_2(%arg0: i32) -> (i32, i32) {
    %c0_i32 = arith.constant 0 : i32
    %c0_i32_0 = arith.constant 0 : i32
    return %c0_i32, %arg0 : i32, i32
  }
  func.func @transform_3(%arg0: i32) -> (i32, i32, i32) {
    %c0_i32 = arith.constant 0 : i32
    %c0_i32_0 = arith.constant 0 : i32
    %c0_i32_1 = arith.constant 0 : i32
    return %arg0, %c0_i32, %c0_i32_0 : i32, i32, i32
  }
  func.func @transform_4(%arg0: i32) -> (i32, i32, i32) {
    %c0_i32 = arith.constant 0 : i32
    %c0_i32_0 = arith.constant 0 : i32
    %c0_i32_1 = arith.constant 0 : i32
    return %arg0, %c0_i32, %c0_i32_0 : i32, i32, i32
  }
}

module attributes {stable_mosaic.version = 11 : i64} {
  func.func @_outc_head_kernel(%arg0: i32, %arg1: memref<8x512xf32, #tpu.memory_space<vmem>>, %arg2: memref<4x512xf32, #tpu.memory_space<vmem>>, %arg3: memref<4x8xf32, #tpu.memory_space<vmem>>, %arg4: memref<4x1xf32, #tpu.memory_space<vmem>>, %arg5: memref<4x512xf32, #tpu.memory_space<vmem>>) attributes {dimension_semantics = [#tpu.dimension_semantics<parallel>], iteration_bounds = array<i64: 1>, scalar_prefetch = 0 : i64, scratch_operands = 0 : i64, tpu.core_type = #tpu.core_type<tc>, window_params = [{transform_indices = @transform_0, window_bounds = array<i64: 8, 512>}, {transform_indices = @transform_1, window_bounds = array<i64: 4, 512>}, {pipeline_mode = #tpu.pipeline_mode<synchronous>, transform_indices = @transform_2, window_bounds = array<i64: 4, 8>}, {pipeline_mode = #tpu.pipeline_mode<synchronous>, transform_indices = @transform_3, window_bounds = array<i64: 4, 1>}, {transform_indices = @transform_4, window_bounds = array<i64: 4, 512>}]} {
    %c0 = arith.constant 0 : index
    %c0_0 = arith.constant 0 : index
    %0 = vector.load %arg3[%c0, %c0_0] : memref<4x8xf32, #tpu.memory_space<vmem>>, vector<4x8xf32>
    %c0_1 = arith.constant 0 : index
    %c0_2 = arith.constant 0 : index
    %1 = vector.load %arg1[%c0_1, %c0_2] : memref<8x512xf32, #tpu.memory_space<vmem>>, vector<8x512xf32>
    %cst = arith.constant dense<0.000000e+00> : vector<4x512xf32>
    %2 = tpu.matmul %0, %1, %cst {dimension_numbers = #tpu.dot_dimension_numbers<[1], [0], [0], [1], [0, 0, 1, 1], [], []>} : vector<4x8xf32>, vector<8x512xf32>, vector<4x512xf32> -> vector<4x512xf32>
    %c0_3 = arith.constant 0 : index
    %c0_4 = arith.constant 0 : index
    %3 = vector.load %arg4[%c0_3, %c0_4] : memref<4x1xf32, #tpu.memory_space<vmem>>, vector<4x1xf32>
    %4 = vector.broadcast %3 : vector<4x1xf32> to vector<4x512xf32>
    %5 = arith.addf %2, %4 : vector<4x512xf32>
    %c0_5 = arith.constant 0 : index
    %c0_6 = arith.constant 0 : index
    %6 = vector.load %arg2[%c0_5, %c0_6] : memref<4x512xf32, #tpu.memory_space<vmem>>, vector<4x512xf32>
    %7 = arith.addf %5, %6 : vector<4x512xf32>
    %8 = tpu.iota {dimensions = array<i32: 0>} : vector<4x512xi32>
    %c1_i32 = arith.constant 1 : i32
    %9 = vector.broadcast %c1_i32 : i32 to vector<4x512xi32>
    %10 = arith.cmpi sge, %8, %9 : vector<4x512xi32>
    %11 = arith.extui %10 : vector<4x512xi1> to vector<4x512xi32>
    %12 = arith.sitofp %11 : vector<4x512xi32> to vector<4x512xf32>
    %13 = arith.mulf %7, %7 : vector<4x512xf32>
    %14 = arith.mulf %13, %12 : vector<4x512xf32>
    %cst_7 = arith.constant dense<0.000000e+00> : vector<512xf32>
    %15 = vector.multi_reduction <add>, %14, %cst_7 [0] : vector<4x512xf32> to vector<512xf32>
    %16 = vector.shape_cast %15 : vector<512xf32> to vector<1x512xf32>
    %cst_8 = arith.constant 1.000000e-24 : f32
    %17 = vector.broadcast %cst_8 : f32 to vector<1x512xf32>
    %18 = arith.maximumf %16, %17 : vector<1x512xf32>
    %19 = math.rsqrt %18 : vector<1x512xf32>
    %c1_i32_9 = arith.constant 1 : i32
    %20 = vector.broadcast %c1_i32_9 : i32 to vector<4x512xi32>
    %21 = arith.cmpi sge, %8, %20 : vector<4x512xi32>
    %22 = vector.broadcast %19 : vector<1x512xf32> to vector<4x512xf32>
    %23 = arith.mulf %7, %22 : vector<4x512xf32>
    %24 = arith.select %21, %23, %7 : vector<4x512xi1>, vector<4x512xf32>
    %c0_10 = arith.constant 0 : index
    %c0_11 = arith.constant 0 : index
    %25 = vector.load %arg5[%c0_10, %c0_11] : memref<4x512xf32, #tpu.memory_space<vmem>>, vector<4x512xf32>
    tpu.vector_store %arg5[%c0_10, %c0_11], %24 {strides = array<i32>} : memref<4x512xf32, #tpu.memory_space<vmem>>, vector<4x512xf32>,
    return
  }
  func.func @transform_0(%arg0: i32) -> (i32, i32) {
    %c0_i32 = arith.constant 0 : i32
    %c0_i32_0 = arith.constant 0 : i32
    return %c0_i32, %arg0 : i32, i32
  }
  func.func @transform_1(%arg0: i32) -> (i32, i32) {
    %c0_i32 = arith.constant 0 : i32
    %c0_i32_0 = arith.constant 0 : i32
    return %c0_i32, %arg0 : i32, i32
  }
  func.func @transform_2(%arg0: i32) -> (i32, i32) {
    %c0_i32 = arith.constant 0 : i32
    %c0_i32_0 = arith.constant 0 : i32
    %c0_i32_1 = arith.constant 0 : i32
    return %c0_i32, %c0_i32_0 : i32, i32
  }
  func.func @transform_3(%arg0: i32) -> (i32, i32) {
    %c0_i32 = arith.constant 0 : i32
    %c0_i32_0 = arith.constant 0 : i32
    %c0_i32_1 = arith.constant 0 : i32
    return %c0_i32, %c0_i32_0 : i32, i32
  }
  func.func @transform_4(%arg0: i32) -> (i32, i32) {
    %c0_i32 = arith.constant 0 : i32
    %c0_i32_0 = arith.constant 0 : i32
    return %c0_i32, %arg0 : i32, i32
  }
}

</mosaic_0001>

<bundles_post_ra>
// kernel: tile.13
= control target key start
LH: loop header
LB: loop body
LE: loop exit
PB: predicated region body
PF: predicated region fallthrough
CT: control target
= control target key end

     0   :  { %s22_s0 = inlined_call_operand.vmem [shape: f32[16], index: 0, kind: input, shape index: {}]   ;;  %s23_s1 = inlined_call_operand.vmem [shape: f32[4,16], index: 1, kind: output, shape index: {}]  }
   0x1   :  { %v4_v0 = vld [vmem:[%s22_s0] ss:$0 sm:$0xff] }
   0x2   :  { %5 = vst [vmem:[%s23_s1] sm:$0xf] %v4_v0 }

// kernel: tile.18
= control target key start
LH: loop header
LB: loop body
LE: loop exit
PB: predicated region body
PF: predicated region fallthrough
CT: control target
= control target key end

     0   :  { %s22_s0 = inlined_call_operand.vmem [shape: f32[8], index: 0, kind: input, shape index: {}]   ;;  %s23_s1 = inlined_call_operand.vmem [shape: f32[4,8], index: 1, kind: output, shape index: {}]  }
   0x1   :  { %v4_v0 = vld [vmem:[%s22_s0] ss:$0 sm:$0xff] }
   0x2   :  { %5 = vst [vmem:[%s23_s1] sm:$0xf] %v4_v0 }

// kernel: tile.1
= control target key start
LH: loop header
LB: loop body
LE: loop exit
PB: predicated region body
PF: predicated region fallthrough
CT: control target
= control target key end

     0   :  { %s67_s8 = smov 125   ;;  %vm8_vm0 = vcmask 7168   ;;  %s68_s11 = smov 126   ;;  %s118_s0 = inlined_call_operand.vmem [shape: f32[4,8], index: 0, kind: input, shape index: {}]   ;;  %s119_s1 = inlined_call_operand.vmem [shape: f32[32,1], index: 1, kind: output, shape index: {}]  }
   0x1   :  { %v5_v0 = vld [vmem:[%s118_s0] sm:$0xf]  ;;  %s66_s0 = smov 127   ;;  %s69_s12 = smov 124  }
   0x2   :  { %6 = vst [vmem:[#allocation0] sm:$0xf] %v5_v0  ;;  %s70_s13 = smov 123   ;;  %s71_s14 = smov 122  }
   0x3   :  { %s72_s15 = smov 121  }
   0x9   :  { %v10_v1 = vld [vmem:[#allocation0] sm:$0xf]  }
   0xa   :  { %v22_v2 = vld [vmem:[#allocation0] sm:$0xf]   ;;  %11 = vrot.lane.b32.xlu0 %v10_v1, %s66_s0 }
   0xb   :  { %23 = vrot.lane.b32.xlu1 %v22_v2, %s67_s8  ;;  %v16_v3 = vld [vmem:[#allocation0] sm:$0xf]  }
   0xc   :  { %v28_v4 = vld [vmem:[#allocation0] sm:$0xf]  }
   0xd   :  { %v7_v5 = vld [vmem:[#allocation0] sm:$0xf]  }
   0xe   :  { %9 = vst.msk [vmem:[%s119_s1] ss:$8 sm:$0xf] %vm8_vm0, %v7_v5   ;;  %17 = vrot.lane.b32.xlu0 %v16_v3, %s68_s11  ;;  %v34_v6 = vld [vmem:[#allocation0] sm:$0xf]  }
   0xf   :  { %29 = vrot.lane.b32.xlu1 %v28_v4, %s69_s12  ;;  %v40_v7 = vld [vmem:[#allocation0] sm:$0xf]  }
  0x10   :  { %v46_v8 = vld [vmem:[#allocation0] sm:$0xf]  }
  0x12   :  { %35 = vrot.lane.b32.xlu0 %v34_v6, %s70_s13 }
  0x13   :  { %41 = vrot.lane.b32.xlu1 %v40_v7, %s71_s14 }
  0x16   :  { %47 = vrot.lane.b32.xlu0 %v46_v8, %s72_s15 }
  0x7c   :  { %v12_v9 = vpop.permute.xlu0 %11  }
  0x7d   :  { %v24_v10 = vpop.permute.xlu1 %23   ;;  %52 = vst.msk [vmem:[%s119_s1 + $0x1] ss:$8 sm:$0xf] %vm8_vm0, %v12_v9  }
  0x7e   :  { %54 = vst.msk [vmem:[%s119_s1 + $0x3] ss:$8 sm:$0xf] %vm8_vm0, %v24_v10  }
  0x80   :  { %v18_v11 = vpop.permute.xlu0 %17  }
  0x81   :  { %v30_v12 = vpop.permute.xlu1 %29   ;;  %53 = vst.msk [vmem:[%s119_s1 + $0x2] ss:$8 sm:$0xf] %vm8_vm0, %v18_v11  }
  0x82   :  { %55 = vst.msk [vmem:[%s119_s1 + $0x4] ss:$8 sm:$0xf] %vm8_vm0, %v30_v12  }
  0x84   :  { %v36_v13 = vpop.permute.xlu0 %35  }
  0x85   :  { %v42_v14 = vpop.permute.xlu1 %41   ;;  %56 = vst.msk [vmem:[%s119_s1 + $0x5] ss:$8 sm:$0xf] %vm8_vm0, %v36_v13  }
  0x86   :  { %57 = vst.msk [vmem:[%s119_s1 + $0x6] ss:$8 sm:$0xf] %vm8_vm0, %v42_v14  }
  0x88   :  { %v48_v15 = vpop.permute.xlu0 %47  }
  0x89   :  { %58 = vst.msk [vmem:[%s119_s1 + $0x7] ss:$8 sm:$0xf] %vm8_vm0, %v48_v15  }

// kernel: tile.0
= control target key start
LH: loop header
LB: loop body
LE: loop exit
PB: predicated region body
PF: predicated region fallthrough
CT: control target
= control target key end

     0   :  { %s177_s8 = smov 125   ;;  %s178_s9 = smov 126   ;;  %vm8_vm0 = vcmask 7168   ;;  %s332_s0 = inlined_call_operand.vmem [shape: f32[4,16], index: 0, kind: input, shape index: {}]   ;;  %s333_s1 = inlined_call_operand.vmem [shape: f32[64,1], index: 1, kind: output, shape index: {}]  }
   0x1   :  { %v5_v0 = vld [vmem:[%s332_s0] sm:$0xf]  ;;  %s176_s0 = smov 127   ;;  %s179_s10 = smov 124  }
   0x2   :  { %6 = vst [vmem:[#allocation0] sm:$0xf] %v5_v0  ;;  %s180_s11 = smov 123   ;;  %s181_s12 = smov 122  }
   0x3   :  { %s182_s13 = smov 121   ;;  %s183_s14 = smov 120  }
   0x4   :  { %s184_s19 = smov 119   ;;  %s185_s20 = smov 118  }
   0x5   :  { %s186_s21 = smov 117   ;;  %s187_s22 = smov 116  }
   0x6   :  { %s188_s23 = smov 115   ;;  %s189_s24 = smov 114  }
   0x7   :  { %s190_s25 = smov 113  }
   0x9   :  { %v11_v1 = vld [vmem:[#allocation0] sm:$0xf]  }
   0xa   :  { %v27_v2 = vld [vmem:[#allocation0] sm:$0xf]   ;;  %12 = vrot.lane.b32.xlu0 %v11_v1, %s176_s0 }
   0xb   :  { %28 = vrot.lane.b32.xlu1 %v27_v2, %s177_s8  ;;  %v19_v3 = vld [vmem:[#allocation0] sm:$0xf]  }
   0xc   :  { %v35_v4 = vld [vmem:[#allocation0] sm:$0xf]  }
   0xd   :  { %v43_v5 = vld [vmem:[#allocation0] sm:$0xf]  }
   0xe   :  { %20 = vrot.lane.b32.xlu0 %v19_v3, %s178_s9  ;;  %v51_v6 = vld [vmem:[#allocation0] sm:$0xf]  }
   0xf   :  { %36 = vrot.lane.b32.xlu1 %v35_v4, %s179_s10  ;;  %v59_v7 = vld [vmem:[#allocation0] sm:$0xf]  }
  0x10   :  { %v67_v8 = vld [vmem:[#allocation0] sm:$0xf]  }
  0x11   :  { %v75_v9 = vld [vmem:[#allocation0] sm:$0xf]  }
  0x12   :  { %44 = vrot.lane.b32.xlu0 %v43_v5, %s180_s11  ;;  %v83_v10 = vld [vmem:[#allocation0] sm:$0xf]  }
  0x13   :  { %52 = vrot.lane.b32.xlu1 %v51_v6, %s181_s12  ;;  %v7_v11 = vld [vmem:[#allocation0] sm:$0xf]  }
  0x14   :  { %9 = vst.msk [vmem:[%s333_s1] ss:$16 sm:$0x3] %vm8_vm0, %v7_v11   ;;  %10 = vst.msk [vmem:[%s333_s1] ss:$16 sm:$0xc] %vm8_vm0, %v7_v11  }
  0x15   :  { %v91_v12 = vld [vmem:[#allocation0] sm:$0xf]  }
  0x16   :  { %60 = vrot.lane.b32.xlu0 %v59_v7, %s182_s13  ;;  %v99_v13 = vld [vmem:[#allocation0] sm:$0xf]  }
  0x17   :  { %68 = vrot.lane.b32.xlu1 %v67_v8, %s183_s14  ;;  %v107_v14 = vld [vmem:[#allocation0] sm:$0xf]  }
  0x18   :  { %v115_v15 = vld [vmem:[#allocation0] sm:$0xf]  }
  0x19   :  { %v123_v16 = vld [vmem:[#allocation0] sm:$0xf]  }
  0x1a   :  { %76 = vrot.lane.b32.xlu0 %v75_v9, %s184_s19 }
  0x1b   :  { %84 = vrot.lane.b32.xlu1 %v83_v10, %s185_s20 }
  0x1e   :  { %92 = vrot.lane.b32.xlu0 %v91_v12, %s186_s21 }
  0x1f   :  { %100 = vrot.lane.b32.xlu1 %v99_v13, %s187_s22 }
  0x22   :  { %108 = vrot.lane.b32.xlu0 %v107_v14, %s188_s23 }
  0x23   :  { %116 = vrot.lane.b32.xlu1 %v115_v15, %s189_s24 }
  0x26   :  { %124 = vrot.lane.b32.xlu0 %v123_v16, %s190_s25 }
  0x7c   :  { %v13_v17 = vpop.permute.xlu0 %12  }
  0x7d   :  { %v29_v18 = vpop.permute.xlu1 %28   ;;  %131 = vst.msk [vmem:[%s333_s1 + $0x1] ss:$16 sm:$0x3] %vm8_vm0, %v13_v17   ;;  %132 = vst.msk [vmem:[%s333_s1 + $0x1] ss:$16 sm:$0xc] %vm8_vm0, %v13_v17  }
  0x7e   :  { %135 = vst.msk [vmem:[%s333_s1 + $0x3] ss:$16 sm:$0x3] %vm8_vm0, %v29_v18   ;;  %136 = vst.msk [vmem:[%s333_s1 + $0x3] ss:$16 sm:$0xc] %vm8_vm0, %v29_v18  }
  0x80   :  { %v21_v19 = vpop.permute.xlu0 %20  }
  0x81   :  { %v37_v20 = vpop.permute.xlu1 %36   ;;  %133 = vst.msk [vmem:[%s333_s1 + $0x2] ss:$16 sm:$0x3] %vm8_vm0, %v21_v19   ;;  %134 = vst.msk [vmem:[%s333_s1 + $0x2] ss:$16 sm:$0xc] %vm8_vm0, %v21_v19  }
  0x82   :  { %137 = vst.msk [vmem:[%s333_s1 + $0x4] ss:$16 sm:$0x3] %vm8_vm0, %v37_v20   ;;  %138 = vst.msk [vmem:[%s333_s1 + $0x4] ss:$16 sm:$0xc] %vm8_vm0, %v37_v20  }
  0x84   :  { %v45_v21 = vpop.permute.xlu0 %44  }
  0x85   :  { %v53_v22 = vpop.permute.xlu1 %52   ;;  %139 = vst.msk [vmem:[%s333_s1 + $0x5] ss:$16 sm:$0x3] %vm8_vm0, %v45_v21   ;;  %140 = vst.msk [vmem:[%s333_s1 + $0x5] ss:$16 sm:$0xc] %vm8_vm0, %v45_v21  }
  0x86   :  { %141 = vst.msk [vmem:[%s333_s1 + $0x6] ss:$16 sm:$0x3] %vm8_vm0, %v53_v22   ;;  %142 = vst.msk [vmem:[%s333_s1 + $0x6] ss:$16 sm:$0xc] %vm8_vm0, %v53_v22  }
  0x88   :  { %v61_v23 = vpop.permute.xlu0 %60  }
  0x89   :  { %v69_v24 = vpop.permute.xlu1 %68   ;;  %143 = vst.msk [vmem:[%s333_s1 + $0x7] ss:$16 sm:$0x3] %vm8_vm0, %v61_v23   ;;  %144 = vst.msk [vmem:[%s333_s1 + $0x7] ss:$16 sm:$0xc] %vm8_vm0, %v61_v23  }
  0x8a   :  { %145 = vst.msk [vmem:[%s333_s1 + $0x8] ss:$16 sm:$0x3] %vm8_vm0, %v69_v24   ;;  %146 = vst.msk [vmem:[%s333_s1 + $0x8] ss:$16 sm:$0xc] %vm8_vm0, %v69_v24  }
  0x8c   :  { %v77_v25 = vpop.permute.xlu0 %76  }
  0x8d   :  { %v85_v26 = vpop.permute.xlu1 %84   ;;  %147 = vst.msk [vmem:[%s333_s1 + $0x9] ss:$16 sm:$0x3] %vm8_vm0, %v77_v25   ;;  %148 = vst.msk [vmem:[%s333_s1 + $0x9] ss:$16 sm:$0xc] %vm8_vm0, %v77_v25  }
  0x8e   :  { %149 = vst.msk [vmem:[%s333_s1 + $0xa] ss:$16 sm:$0x3] %vm8_vm0, %v85_v26   ;;  %150 = vst.msk [vmem:[%s333_s1 + $0xa] ss:$16 sm:$0xc] %vm8_vm0, %v85_v26  }
  0x90   :  { %v93_v27 = vpop.permute.xlu0 %92  }
  0x91   :  { %v101_v28 = vpop.permute.xlu1 %100   ;;  %151 = vst.msk [vmem:[%s333_s1 + $0xb] ss:$16 sm:$0x3] %vm8_vm0, %v93_v27   ;;  %152 = vst.msk [vmem:[%s333_s1 + $0xb] ss:$16 sm:$0xc] %vm8_vm0, %v93_v27  }
  0x92   :  { %153 = vst.msk [vmem:[%s333_s1 + $0xc] ss:$16 sm:$0x3] %vm8_vm0, %v101_v28   ;;  %154 = vst.msk [vmem:[%s333_s1 + $0xc] ss:$16 sm:$0xc] %vm8_vm0, %v101_v28  }
  0x94   :  { %v109_v29 = vpop.permute.xlu0 %108  }
  0x95   :  { %v117_v30 = vpop.permute.xlu1 %116   ;;  %155 = vst.msk [vmem:[%s333_s1 + $0xd] ss:$16 sm:$0x3] %vm8_vm0, %v109_v29   ;;  %156 = vst.msk [vmem:[%s333_s1 + $0xd] ss:$16 sm:$0xc] %vm8_vm0, %v109_v29  }
  0x96   :  { %157 = vst.msk [vmem:[%s333_s1 + $0xe] ss:$16 sm:$0x3] %vm8_vm0, %v117_v30   ;;  %158 = vst.msk [vmem:[%s333_s1 + $0xe] ss:$16 sm:$0xc] %vm8_vm0, %v117_v30  }
  0x98   :  { %v125_v31 = vpop.permute.xlu0 %124  }
  0x99   :  { %159 = vst.msk [vmem:[%s333_s1 + $0xf] ss:$16 sm:$0x3] %vm8_vm0, %v125_v31   ;;  %160 = vst.msk [vmem:[%s333_s1 + $0xf] ss:$16 sm:$0xc] %vm8_vm0, %v125_v31  }

// kernel: cons_net_forward.26
= control target key start
LH: loop header
LB: loop body
LE: loop exit
PB: predicated region body
PF: predicated region fallthrough
CT: control target
= control target key end

     0   :  { %v52_v0 = vmov 0   ;;  %s103_s1 = inlined_call_operand.vmem [shape: f32[8,1], index: 1, kind: input, shape index: {}]   ;;  %s104_s2 = inlined_call_operand.vmem [shape: f32[8,1], index: 2, kind: input, shape index: {}]   ;;  %s105_s0 = inlined_call_operand.vmem [shape: f32[8,512], index: 0, kind: input, shape index: {}]   ;;  %s106_s3 = inlined_call_operand.vmem [shape: f32[8,512], index: 3, kind: output, shape index: {}]  }
   0x1   :  { %51 = vset.pattern.permute.xlu0 %v52_v0  ;;  %v18_v1 = vld [vmem:[%s103_s1] sm:$0xff]  ;;  %v15_v5 = vld [vmem:[%s105_s0 + $0x8] sm:$0xff]  ;;  %v16_v6 = vld [vmem:[%s105_s0 + $0x10] sm:$0xff] }
   0x2   :  { %21 = vperm.xlu0 %51, %v18_v1   ;;  %v28_v2 = vld [vmem:[%s104_s2] sm:$0xff]  ;;  %v17_v7 = vld [vmem:[%s105_s0 + $0x18] sm:$0xff] }
   0x3   :  { %v14_v3 = vld [vmem:[%s105_s0] sm:$0xff] }
   0x6   :  { %31 = vperm.xlu0 %51, %v28_v2  }
  0x7d   :  { %v22_v4 = vpop.permute.xlu0 %21 }
  0x7e   :  { %v24_v8 = vmul.f32 %v22_v4, %v14_v3  ;;  %v25_v9 = vmul.f32 %v22_v4, %v15_v5  ;;  %v26_v10 = vmul.f32 %v22_v4, %v16_v6  ;;  %v27_v11 = vmul.f32 %v22_v4, %v17_v7 }
  0x81   :  { %v32_v12 = vpop.permute.xlu0 %31 }
  0x82   :  { %v34_v13 = vadd.f32 %v32_v12, %v24_v8  ;;  %v35_v14 = vadd.f32 %v32_v12, %v25_v9  ;;  %v36_v15 = vadd.f32 %v32_v12, %v26_v10  ;;  %v37_v16 = vadd.f32 %v32_v12, %v27_v11 }
  0x84   :  { %v38_v17 = vmax.f32 %v34_v13, 0.0  ;;  %v39_v18 = vmax.f32 %v35_v14, 0.0  ;;  %v40_v19 = vmax.f32 %v36_v15, 0.0  ;;  %v41_v20 = vmax.f32 %v37_v16, 0.0 }
  0x86   :  { %42 = vst [vmem:[%s106_s3] sm:$0xff] %v38_v17  ;;  %43 = vst [vmem:[%s106_s3 + $0x8] sm:$0xff] %v39_v18 }
  0x87   :  { %44 = vst [vmem:[%s106_s3 + $0x10] sm:$0xff] %v40_v19  ;;  %45 = vst [vmem:[%s106_s3 + $0x18] sm:$0xff] %v41_v20 }

// kernel: cons_net_forward.25
= control target key start
LH: loop header
LB: loop body
LE: loop exit
PB: predicated region body
PF: predicated region fallthrough
CT: control target
= control target key end

     0   :  { %vm80_vm0 = vcmask 1041408   ;;  %v241_v2 = vmov 0   ;;  %vm76_vm1 = vcmask 293888   ;;  %vm184_vm2 = vcmask 7168   ;;  %s318_s0 = inlined_call_operand.vmem [shape: bf16[36,512], index: 0, kind: input, shape index: {}]   ;;  %s319_s1 = inlined_call_operand.vmem [shape: bf16[8,36], index: 1, kind: input, shape index: {}]   ;;  %s320_s2 = inlined_call_operand.vmem [shape: f32[8,512], index: 2, kind: output, shape index: {0}]   ;;  %s321_s3 = inlined_call_operand.vmem [shape: f32[1,8,1], index: 3, kind: output, shape index: {1}]   ;;  %s322_s4 = inlined_call_operand.vmem [shape: f32[1,8,1], index: 4, kind: output, shape index: {2}]  }
   0x1   :  { %v24_v0 = vld [vmem:[%s318_s0 + $0x40] sm:$0x33]  ;;  %v25_v1 = vld [vmem:[%s318_s0 + $0x48] sm:$0x33]  ;;  %125 = vmatprep.mubr.bf16.mxu0 %v241_v2  ;;  %166 = vmatprep.mubr.bf16.mxu1 %v241_v2 }
   0x2   :  { %v217_v3 = vcombine.high %v24_v0, %v24_v0  ;;  %v219_v4 = vcombine.high %v25_v1, %v25_v1  ;;  %v216_v5 = vcombine.low %v24_v0, %v24_v0  ;;  %v218_v6 = vcombine.low %v25_v1, %v25_v1  ;;  %v229_v7 = vld [vmem:[%s318_s0 + $0x24] ss:$16 sps:$4 sm:$0xff]   ;;  %v231_v8 = vld [vmem:[%s318_s0 + $0x2c] ss:$16 sps:$4 sm:$0xff]   ;;  %v233_v11 = vld [vmem:[%s318_s0 + $0x20] ss:$16 sps:$4 sm:$0xff]  }
   0x3   :  { %v234_v12 = vld [vmem:[%s318_s0 + $0x28] ss:$16 sps:$4 sm:$0xff]   ;;  %v235_v13 = vld [vmem:[%s318_s0 + $0x4] ss:$16 sps:$4 sm:$0xff]   ;;  %v237_v14 = vld [vmem:[%s318_s0 + $0xc] ss:$16 sps:$4 sm:$0xff]  }
   0x4   :  { %220 = vmatprep.subr.msk.bf16.mxu0 %vm80_vm0, %v217_v3  ;;  %222 = vmatprep.subr.msk.bf16.mxu1 %vm80_vm0, %v219_v4  ;;  %v82_v9 = vsel %vm80_vm0, %v216_v5, 0  ;;  %v88_v10 = vsel %vm80_vm0, %v218_v6, 0  ;;  %v239_v15 = vld [vmem:[%s318_s0] ss:$16 sps:$4 sm:$0xff]   ;;  %v240_v16 = vld [vmem:[%s318_s0 + $0x8] ss:$16 sps:$4 sm:$0xff]  }
   0x5   :  { %104 = vmatpush1.bf16.msra.mxu0 %v82_v9  ;;  %145 = vmatpush1.bf16.msra.mxu1 %v88_v10  ;;  %v15_v17 = vld [vmem:[%s319_s1] sm:$0xf] }
   0x6   :  { %105 = vmatprep.subr.bf16.mxu0 %v229_v7  ;;  %146 = vmatprep.subr.bf16.mxu1 %v231_v8 }
   0x9   :  { %106 = vmatpush1.bf16.msra.mxu0 %v233_v11  ;;  %147 = vmatpush1.bf16.msra.mxu1 %v234_v12 }
   0xa   :  { %107 = vmatprep.subr.bf16.mxu0 %v235_v13  ;;  %148 = vmatprep.subr.bf16.mxu1 %v237_v14 }
   0xd   :  { %108 = vmatpush1.bf16.msra.mxu0 %v239_v15  ;;  %149 = vmatpush1.bf16.msra.mxu1 %v240_v16 }
  0x10   :  { %221 = vmatmul.mubr.msk.bf16.vlgmr.msra.gmra.mxu0 %vm76_vm1, %v15_v17  ;;  %223 = vmatmul.mubr.msk.bf16.vlgmr.msra.gmra.mxu1 %vm76_vm1, %v15_v17 }
  0xd0   :  { %v127_v18 = vpop.f32.mrf.mxu0  ;;  %v168_v19 = vpop.f32.mrf.mxu1 }
  0xd1   :  { %175 = vst [vmem:[%s320_s2] sm:$0xff] %v127_v18  ;;  %177 = vst [vmem:[%s320_s2 + $0x10] sm:$0xff] %v168_v19  ;;  %v186_v22 = vmul.f32 %v127_v18, %v127_v18  ;;  %v188_v23 = vmul.f32 %v168_v19, %v168_v19 }
  0xd2   :  { %v129_v20 = vpop.f32.mrf.mxu0  ;;  %v170_v21 = vpop.f32.mrf.mxu1 }
  0xd3   :  { %176 = vst [vmem:[%s320_s2 + $0x8] sm:$0xff] %v129_v20  ;;  %v179_v24 = vadd.f32 %v129_v20, %v127_v18  ;;  %v187_v25 = vmul.f32 %v129_v20, %v129_v20  ;;  %178 = vst [vmem:[%s320_s2 + $0x18] sm:$0xff] %v170_v21  ;;  %v189_v34 = vmul.f32 %v170_v21, %v170_v21 }
  0xd4   :  { %v131_v26 = vpop.f32.mrf.mxu0  ;;  %v172_v27 = vpop.f32.mrf.mxu1 }
  0xd5   :  { %v180_v28 = vadd.f32 %v179_v24, %v168_v19  ;;  %v190_v29 = vadd.f32 %v187_v25, %v186_v22 }
  0xd6   :  { %v132_v30 = vpop.f32.mrf.mxu0  ;;  %v173_v31 = vpop.f32.mrf.mxu1 }
  0xd7   :  { %v181_v32 = vadd.f32 %v180_v28, %v170_v21  ;;  %v191_v33 = vadd.f32 %v190_v29, %v188_v23 }
  0xd9   :  { %182 = vadd.xlane.f32.xlu0 %v181_v32  ;;  %v192_v35 = vadd.f32 %v191_v33, %v189_v34 }
  0xdd   :  { %193 = vadd.xlane.f32.xlu0 %v192_v35 }
 0x162   :  { %v183_v36 = vpop.xlane.xlu0 %182 }
 0x163   :  { %185 = vst.msk [vmem:[%s321_s3] sm:$0xff] %vm184_vm2, %v183_v36 }
 0x166   :  { %v194_v37 = vpop.xlane.xlu0 %193 }
 0x167   :  { %195 = vst.msk [vmem:[%s322_s4] sm:$0xff] %vm184_vm2, %v194_v37 }

// kernel: cons_net_forward.27
= control target key start
LH: loop header
LB: loop body
LE: loop exit
PB: predicated region body
PF: predicated region fallthrough
CT: control target
= control target key end

     0   :  { %vm128_vm0 = vcmask 1043456   ;;  %v309_v2 = vmov 0   ;;  %vm124_vm1 = vcmask 588800   ;;  %vm232_vm2 = vcmask 7168   ;;  %s410_s0 = inlined_call_operand.vmem [shape: bf16[72,512], index: 0, kind: input, shape index: {}]   ;;  %s411_s1 = inlined_call_operand.vmem [shape: bf16[8,72], index: 1, kind: input, shape index: {}]   ;;  %s412_s2 = inlined_call_operand.vmem [shape: f32[8,512], index: 2, kind: output, shape index: {0}]   ;;  %s413_s3 = inlined_call_operand.vmem [shape: f32[1,8,1], index: 3, kind: output, shape index: {1}]   ;;  %s414_s4 = inlined_call_operand.vmem [shape: f32[1,8,1], index: 4, kind: output, shape index: {2}]  }
   0x1   :  { %v32_v0 = vld [vmem:[%s410_s0 + $0x80] sm:$0xff]  ;;  %v33_v1 = vld [vmem:[%s410_s0 + $0x88] sm:$0xff]  ;;  %173 = vmatprep.mubr.bf16.mxu0 %v309_v2  ;;  %214 = vmatprep.mubr.bf16.mxu1 %v309_v2 }
   0x2   :  { %v273_v3 = vcombine.high %v32_v0, %v32_v0  ;;  %v275_v4 = vcombine.high %v33_v1, %v33_v1  ;;  %v272_v5 = vcombine.low %v32_v0, %v32_v0  ;;  %v274_v6 = vcombine.low %v33_v1, %v33_v1  ;;  %v285_v7 = vld [vmem:[%s410_s0 + $0x64] ss:$16 sps:$4 sm:$0xff]   ;;  %v287_v8 = vld [vmem:[%s410_s0 + $0x6c] ss:$16 sps:$4 sm:$0xff]   ;;  %v289_v11 = vld [vmem:[%s410_s0 + $0x60] ss:$16 sps:$4 sm:$0xff]  }
   0x3   :  { %v290_v12 = vld [vmem:[%s410_s0 + $0x68] ss:$16 sps:$4 sm:$0xff]   ;;  %v291_v13 = vld [vmem:[%s410_s0 + $0x44] ss:$16 sps:$4 sm:$0xff]   ;;  %v293_v14 = vld [vmem:[%s410_s0 + $0x4c] ss:$16 sps:$4 sm:$0xff]  }
   0x4   :  { %276 = vmatprep.subr.msk.bf16.mxu0 %vm128_vm0, %v273_v3  ;;  %278 = vmatprep.subr.msk.bf16.mxu1 %vm128_vm0, %v275_v4  ;;  %v130_v9 = vsel %vm128_vm0, %v272_v5, 0  ;;  %v136_v10 = vsel %vm128_vm0, %v274_v6, 0  ;;  %v295_v15 = vld [vmem:[%s410_s0 + $0x40] ss:$16 sps:$4 sm:$0xff]   ;;  %v296_v16 = vld [vmem:[%s410_s0 + $0x48] ss:$16 sps:$4 sm:$0xff]  }
   0x5   :  { %148 = vmatpush1.bf16.msra.mxu0 %v130_v9  ;;  %189 = vmatpush1.bf16.msra.mxu1 %v136_v10  ;;  %v297_v17 = vld [vmem:[%s410_s0 + $0x24] ss:$16 sps:$4 sm:$0xff]   ;;  %v299_v18 = vld [vmem:[%s410_s0 + $0x2c] ss:$16 sps:$4 sm:$0xff]   ;;  %v301_v19 = vld [vmem:[%s410_s0 + $0x20] ss:$16 sps:$4 sm:$0xff]  }
   0x6   :  { %149 = vmatprep.subr.bf16.mxu0 %v285_v7  ;;  %190 = vmatprep.subr.bf16.mxu1 %v287_v8  ;;  %v302_v20 = vld [vmem:[%s410_s0 + $0x28] ss:$16 sps:$4 sm:$0xff]   ;;  %v303_v21 = vld [vmem:[%s410_s0 + $0x4] ss:$16 sps:$4 sm:$0xff]   ;;  %v305_v22 = vld [vmem:[%s410_s0 + $0xc] ss:$16 sps:$4 sm:$0xff]  }
   0x7   :  { %v307_v23 = vld [vmem:[%s410_s0] ss:$16 sps:$4 sm:$0xff]   ;;  %v308_v24 = vld [vmem:[%s410_s0 + $0x8] ss:$16 sps:$4 sm:$0xff]  }
   0x8   :  { %v15_v25 = vld [vmem:[%s411_s1] sm:$0xf] }
   0x9   :  { %150 = vmatpush1.bf16.msra.mxu0 %v289_v11  ;;  %191 = vmatpush1.bf16.msra.mxu1 %v290_v12 }
   0xa   :  { %151 = vmatprep.subr.bf16.mxu0 %v291_v13  ;;  %192 = vmatprep.subr.bf16.mxu1 %v293_v14 }
   0xd   :  { %152 = vmatpush1.bf16.msra.mxu0 %v295_v15  ;;  %193 = vmatpush1.bf16.msra.mxu1 %v296_v16 }
   0xe   :  { %153 = vmatprep.subr.bf16.mxu0 %v297_v17  ;;  %194 = vmatprep.subr.bf16.mxu1 %v299_v18 }
  0x11   :  { %154 = vmatpush1.bf16.msra.mxu0 %v301_v19  ;;  %195 = vmatpush1.bf16.msra.mxu1 %v302_v20 }
  0x12   :  { %155 = vmatprep.subr.bf16.mxu0 %v303_v21  ;;  %196 = vmatprep.subr.bf16.mxu1 %v305_v22 }
  0x15   :  { %156 = vmatpush1.bf16.msra.mxu0 %v307_v23  ;;  %197 = vmatpush1.bf16.msra.mxu1 %v308_v24 }
  0x18   :  { %277 = vmatmul.mubr.msk.bf16.vlgmr.msra.gmra.mxu0 %vm124_vm1, %v15_v25  ;;  %279 = vmatmul.mubr.msk.bf16.vlgmr.msra.gmra.mxu1 %vm124_vm1, %v15_v25 }
  0xd8   :  { %v175_v26 = vpop.f32.mrf.mxu0  ;;  %v216_v27 = vpop.f32.mrf.mxu1 }
  0xd9   :  { %223 = vst [vmem:[%s412_s2] sm:$0xff] %v175_v26  ;;  %225 = vst [vmem:[%s412_s2 + $0x10] sm:$0xff] %v216_v27  ;;  %v234_v30 = vmul.f32 %v175_v26, %v175_v26  ;;  %v236_v31 = vmul.f32 %v216_v27, %v216_v27 }
  0xda   :  { %v177_v28 = vpop.f32.mrf.mxu0  ;;  %v218_v29 = vpop.f32.mrf.mxu1 }
  0xdb   :  { %224 = vst [vmem:[%s412_s2 + $0x8] sm:$0xff] %v177_v28  ;;  %v227_v32 = vadd.f32 %v177_v28, %v175_v26  ;;  %v235_v33 = vmul.f32 %v177_v28, %v177_v28  ;;  %226 = vst [vmem:[%s412_s2 + $0x18] sm:$0xff] %v218_v29  ;;  %v237_v42 = vmul.f32 %v218_v29, %v218_v29 }
  0xdc   :  { %v179_v34 = vpop.f32.mrf.mxu0  ;;  %v220_v35 = vpop.f32.mrf.mxu1 }
  0xdd   :  { %v228_v36 = vadd.f32 %v227_v32, %v216_v27  ;;  %v238_v37 = vadd.f32 %v235_v33, %v234_v30 }
  0xde   :  { %v180_v38 = vpop.f32.mrf.mxu0  ;;  %v221_v39 = vpop.f32.mrf.mxu1 }
  0xdf   :  { %v229_v40 = vadd.f32 %v228_v36, %v218_v29  ;;  %v239_v41 = vadd.f32 %v238_v37, %v236_v31 }
  0xe1   :  { %230 = vadd.xlane.f32.xlu0 %v229_v40  ;;  %v240_v43 = vadd.f32 %v239_v41, %v237_v42 }
  0xe5   :  { %241 = vadd.xlane.f32.xlu0 %v240_v43 }
 0x16a   :  { %v231_v44 = vpop.xlane.xlu0 %230 }
 0x16b   :  { %233 = vst.msk [vmem:[%s413_s3] sm:$0xff] %vm232_vm2, %v231_v44 }
 0x16e   :  { %v242_v45 = vpop.xlane.xlu0 %241 }
 0x16f   :  { %243 = vst.msk [vmem:[%s414_s4] sm:$0xff] %vm232_vm2, %v242_v45 }

// kernel: cons_net_forward.29
= control target key start
LH: loop header
LB: loop body
LE: loop exit
PB: predicated region body
PF: predicated region fallthrough
CT: control target
= control target key end

     0   :  { %s69_s0 = inlined_call_operand.vmem [shape: f32[8,128], index: 0, kind: input, shape index: {}]   ;;  %s70_s1 = inlined_call_operand.vmem [shape: f32[8,128], index: 1, kind: input, shape index: {}]   ;;  %s71_s2 = inlined_call_operand.vmem [shape: f32[8,128], index: 2, kind: input, shape index: {}]   ;;  %s72_s3 = inlined_call_operand.vmem [shape: f32[8,128], index: 3, kind: input, shape index: {}]   ;;  %s73_s4 = inlined_call_operand.vmem [shape: f32[8,128], index: 4, kind: output, shape index: {}]  }
   0x1   :  { %v17_v0 = vld [vmem:[%s69_s0] sm:$0xff] }
   0x2   :  { %v18_v1 = vld [vmem:[%s70_s1] sm:$0xff] }
   0x3   :  { %v20_v2 = vld [vmem:[%s71_s2] sm:$0xff]  ;;  %v19_v3 = vmax.f32 %v17_v0, %v18_v1 }
   0x4   :  { %v21_v4 = vld [vmem:[%s72_s3] sm:$0xff] }
   0x5   :  { %v22_v5 = vmax.f32 %v20_v2, %v21_v4 }
   0x7   :  { %v23_v6 = vmax.f32 %v19_v3, %v22_v5 }
   0x9   :  { %24 = vst [vmem:[%s73_s4] sm:$0xff] %v23_v6 }

// kernel: cons_net_forward.31
= control target key start
LH: loop header
LB: loop body
LE: loop exit
PB: predicated region body
PF: predicated region fallthrough
CT: control target
= control target key end

     0   :  { %v55_v0 = vmov 0   ;;  %s100_s2 = inlined_call_operand.vmem [shape: f32[16,1], index: 2, kind: input, shape index: {}]   ;;  %s101_s1 = inlined_call_operand.vmem [shape: f32[16,1], index: 1, kind: input, shape index: {}]   ;;  %s102_s0 = inlined_call_operand.vmem [shape: f32[16,128], index: 0, kind: input, shape index: {}]   ;;  %s103_s3 = inlined_call_operand.vmem [shape: f32[16,128], index: 3, kind: output, shape index: {}]  }
   0x1   :  { %54 = vset.pattern.permute.xlu1 %v55_v0  ;;  %53 = vset.pattern.permute.xlu0 %v55_v0  ;;  %v30_v1 = vld [vmem:[%s100_s2] sm:$0xff]  ;;  %v31_v3 = vld [vmem:[%s100_s2 + $0x8] sm:$0xff] }
   0x2   :  { %v16_v2 = vld [vmem:[%s101_s1] sm:$0xff]  ;;  %34 = vperm.xlu1 %54, %v30_v1   ;;  %v17_v4 = vld [vmem:[%s101_s1 + $0x8] sm:$0xff] }
   0x3   :  { %20 = vperm.xlu0 %53, %v16_v2   ;;  %v14_v5 = vld [vmem:[%s102_s0] sm:$0xff]  ;;  %v15_v9 = vld [vmem:[%s102_s0 + $0x8] sm:$0xff] }
   0x6   :  { %39 = vperm.xlu1 %54, %v31_v3  }
   0x7   :  { %25 = vperm.xlu0 %53, %v17_v4  }
  0x7d   :  { %v35_v6 = vpop.permute.xlu1 %34 }
  0x7e   :  { %v21_v7 = vpop.permute.xlu0 %20 }
  0x7f   :  { %v28_v8 = vmul.f32 %v21_v7, %v14_v5 }
  0x81   :  { %v42_v10 = vadd.f32 %v35_v6, %v28_v8  ;;  %v40_v14 = vpop.permute.xlu1 %39 }
  0x82   :  { %v26_v11 = vpop.permute.xlu0 %25 }
  0x83   :  { %v44_v12 = vmax.f32 %v42_v10, 0.0  ;;  %v29_v13 = vmul.f32 %v26_v11, %v15_v9 }
  0x85   :  { %46 = vst [vmem:[%s103_s3] sm:$0xff] %v44_v12  ;;  %v43_v15 = vadd.f32 %v40_v14, %v29_v13 }
  0x87   :  { %v45_v16 = vmax.f32 %v43_v15, 0.0 }
  0x89   :  { %47 = vst [vmem:[%s103_s3 + $0x8] sm:$0xff] %v45_v16 }

// kernel: cons_net_forward.30
= control target key start
LH: loop header
LB: loop body
LE: loop exit
PB: predicated region body
PF: predicated region fallthrough
CT: control target
= control target key end

     0   :  { %vm62_vm0 = vcmask 1043456   ;;  %v171_v0 = vmov 0.0   ;;  %vm172_vm1 = vmmov 0   ;;  %vm58_vm2 = vcmask 588800   ;;  %s234_s0 = inlined_call_operand.vmem [shape: bf16[72,128], index: 0, kind: input, shape index: {}]   ;;  %s235_s1 = inlined_call_operand.vmem [shape: bf16[16,72], index: 1, kind: input, shape index: {}]   ;;  %s236_s2 = inlined_call_operand.vmem [shape: f32[16,128], index: 2, kind: output, shape index: {0}]   ;;  %s237_s3 = inlined_call_operand.vmem [shape: f32[1,16,1], index: 3, kind: output, shape index: {1}]   ;;  %s238_s4 = inlined_call_operand.vmem [shape: f32[1,16,1], index: 4, kind: output, shape index: {2}]  }
   0x1   :  { %149 = vmatprep.subr.bf16.mxu0 %v171_v0  ;;  %v165_v1 = vld [vmem:[%s234_s0 + $0x20] ss:$0 sps:$4 sm:$0xff]   ;;  %159 = vmatprep.mubr.msk.bf16.mxu0 %vm172_vm1, %v171_v0  ;;  %v166_v3 = vld [vmem:[%s234_s0 + $0x18] sm:$0xff]   ;;  %v167_v4 = vld [vmem:[%s234_s0 + $0x10] sm:$0xff]   ;;  %vm113_vm3 = vcmask 7168  }
   0x2   :  { %v64_v2 = vsel %vm62_vm0, %v165_v1, 0  ;;  %v168_v5 = vld [vmem:[%s234_s0 + $0x8] sm:$0xff]   ;;  %v169_v6 = vld [vmem:[%s234_s0] sm:$0xff]  }
   0x3   :  { %150 = vmatpush3.bf16.msra.mxu0 %v64_v2  ;;  %v170_v7 = vld [vmem:[%s235_s1] sm:$0xff]  }
   0x4   :  { %151 = vmatprep.subr.bf16.mxu0 %v171_v0 }
   0x7   :  { %152 = vmatpush3.bf16.msra.mxu0 %v166_v3 }
   0x8   :  { %153 = vmatprep.subr.bf16.mxu0 %v171_v0 }
   0xb   :  { %154 = vmatpush3.bf16.msra.mxu0 %v167_v4 }
   0xc   :  { %155 = vmatprep.subr.bf16.mxu0 %v171_v0 }
   0xf   :  { %156 = vmatpush3.bf16.msra.mxu0 %v168_v5 }
  0x10   :  { %157 = vmatprep.subr.bf16.mxu0 %v171_v0 }
  0x13   :  { %158 = vmatpush3.bf16.msra.mxu0 %v169_v6 }
  0x16   :  { %160 = vmatmul.mubr.msk.bf16.vlgmr.msra.gmra.mxu0 %vm58_vm2, %v170_v7 }
  0xd6   :  { %v100_v8 = vpop.f32.mrf.mxu0 }
  0xd7   :  { %107 = vst [vmem:[%s236_s2] sm:$0xff] %v100_v8  ;;  %109 = vadd.xlane.f32.xlu0 %v100_v8  ;;  %v116_v9 = vmul.f32 %v100_v8, %v100_v8 }
  0xd8   :  { %v161_v10 = vpop.f32.mrf.mxu0 }
  0xd9   :  { %118 = vadd.xlane.f32.xlu1 %v116_v9 }
  0xda   :  { %v103_v11 = vpop.f32.mrf.mxu0 }
  0xdb   :  { %108 = vst [vmem:[%s236_s2 + $0x8] sm:$0xff] %v103_v11  ;;  %111 = vadd.xlane.f32.xlu0 %v103_v11  ;;  %v117_v12 = vmul.f32 %v103_v11, %v103_v11 }
  0xdc   :  { %v162_v13 = vpop.f32.mrf.mxu0 }
  0xdd   :  { %120 = vadd.xlane.f32.xlu1 %v117_v12 }
 0x160   :  { %v110_v14 = vpop.xlane.xlu0 %109 }
 0x161   :  { %114 = vst.msk [vmem:[%s237_s3] sm:$0xff] %vm113_vm3, %v110_v14 }
 0x162   :  { %v119_v15 = vpop.xlane.xlu1 %118 }
 0x163   :  { %122 = vst.msk [vmem:[%s238_s4] sm:$0xff] %vm113_vm3, %v119_v15 }
 0x164   :  { %v112_v16 = vpop.xlane.xlu0 %111 }
 0x165   :  { %115 = vst.msk [vmem:[%s237_s3 + $0x8] sm:$0xff] %vm113_vm3, %v112_v16 }
 0x166   :  { %v121_v17 = vpop.xlane.xlu1 %120 }
 0x167   :  { %123 = vst.msk [vmem:[%s238_s4 + $0x8] sm:$0xff] %vm113_vm3, %v121_v17 }

// kernel: cons_net_forward.34
= control target key start
LH: loop header
LB: loop body
LE: loop exit
PB: predicated region body
PF: predicated region fallthrough
CT: control target
= control target key end

     0   :  { %vm31_vm0 = vcmask 261120   ;;  %s93_s0 = inlined_call_operand.vmem [shape: f32[16,32], index: 0, kind: input, shape index: {}]   ;;  %s94_s1 = inlined_call_operand.vmem [shape: f32[16,32], index: 1, kind: input, shape index: {}]   ;;  %s95_s2 = inlined_call_operand.vmem [shape: f32[16,32], index: 2, kind: input, shape index: {}]   ;;  %s96_s3 = inlined_call_operand.vmem [shape: f32[16,32], index: 3, kind: input, shape index: {}]   ;;  %s97_s4 = inlined_call_operand.vmem [shape: f32[16,32], index: 4, kind: output, shape index: {}]  }
   0x1   :  { %v17_v0 = vld [vmem:[%s93_s0] sm:$0xff]  ;;  %v18_v5 = vld [vmem:[%s93_s0 + $0x8] sm:$0xff] }
   0x2   :  { %v19_v1 = vld [vmem:[%s94_s1] sm:$0xff]  ;;  %v20_v6 = vld [vmem:[%s94_s1 + $0x8] sm:$0xff] }
   0x3   :  { %v23_v2 = vld [vmem:[%s95_s2] sm:$0xff]  ;;  %v21_v3 = vmax.f32 %v17_v0, %v19_v1  ;;  %v22_v8 = vmax.f32 %v18_v5, %v20_v6  ;;  %v24_v9 = vld [vmem:[%s95_s2 + $0x8] sm:$0xff] }
   0x4   :  { %v25_v4 = vld [vmem:[%s96_s3] sm:$0xff]  ;;  %v26_v10 = vld [vmem:[%s96_s3 + $0x8] sm:$0xff] }
   0x5   :  { %v27_v7 = vmax.f32 %v23_v2, %v25_v4  ;;  %v28_v11 = vmax.f32 %v24_v9, %v26_v10 }
   0x7   :  { %v29_v12 = vmax.f32 %v21_v3, %v27_v7  ;;  %v30_v13 = vmax.f32 %v22_v8, %v28_v11 }
   0x9   :  { %32 = vst.msk [vmem:[%s97_s4] sm:$0xff] %vm31_vm0, %v29_v12  ;;  %33 = vst.msk [vmem:[%s97_s4 + $0x8] sm:$0xff] %vm31_vm0, %v30_v13 }

// kernel: cons_net_forward.32
= control target key start
LH: loop header
LB: loop body
LE: loop exit
PB: predicated region body
PF: predicated region fallthrough
CT: control target
= control target key end

     0   :  { %v197_v0 = vmov 0   ;;  %vm98_vm0 = vcmask 130048   ;;  %vm149_vm1 = vcmask 7168   ;;  %s274_s0 = inlined_call_operand.vmem [shape: bf16[144,128], index: 0, kind: input, shape index: {}]   ;;  %s275_s1 = inlined_call_operand.vmem [shape: bf16[16,144], index: 1, kind: input, shape index: {}]   ;;  %s276_s2 = inlined_call_operand.vmem [shape: f32[16,128], index: 2, kind: output, shape index: {0}]   ;;  %s277_s3 = inlined_call_operand.vmem [shape: f32[1,16,1], index: 3, kind: output, shape index: {1}]   ;;  %s278_s4 = inlined_call_operand.vmem [shape: f32[1,16,1], index: 4, kind: output, shape index: {2}]  }
   0x1   :  { %102 = vmatprep.subr.bf16.mxu0 %v197_v0  ;;  %v185_v1 = vld [vmem:[%s274_s0 + $0x38] sm:$0xff]   ;;  %v186_v2 = vld [vmem:[%s274_s0 + $0x30] sm:$0xff]   ;;  %v187_v3 = vld [vmem:[%s274_s0 + $0x28] sm:$0xff]  }
   0x2   :  { %103 = vmatpush1.bf16.msra.mxu0 %v185_v1  ;;  %v188_v4 = vld [vmem:[%s274_s0 + $0x20] sm:$0xff]   ;;  %v189_v6 = vld [vmem:[%s274_s0 + $0x18] sm:$0xff]   ;;  %v190_v7 = vld [vmem:[%s274_s0 + $0x10] sm:$0xff]  }
   0x3   :  { %104 = vmatprep.subr.bf16.mxu0 %v197_v0  ;;  %v196_v5 = vld [vmem:[%s275_s1 + $0x4] ss:$8 sps:$4 sm:$0xff]   ;;  %v194_v11 = vld [vmem:[%s275_s1] ss:$8 sps:$4 sm:$0xff]  }
   0x4   :  { %183 = vmatprep.mubr.msk.bf16.mxu0 %vm98_vm0, %v196_v5  ;;  %v191_v8 = vld [vmem:[%s274_s0 + $0x8] sm:$0xff]   ;;  %v192_v9 = vld [vmem:[%s274_s0] sm:$0xff]  }
   0x5   :  { %v193_v10 = vld [vmem:[%s274_s0 + $0x40] sm:$0xff]  }
   0x6   :  { %105 = vmatpush1.bf16.msra.mxu0 %v186_v2 }
   0x7   :  { %106 = vmatprep.subr.bf16.mxu0 %v197_v0 }
   0xa   :  { %107 = vmatpush1.bf16.msra.mxu0 %v187_v3 }
   0xb   :  { %108 = vmatprep.subr.bf16.mxu0 %v197_v0 }
   0xe   :  { %109 = vmatpush1.bf16.msra.mxu0 %v188_v4 }
   0xf   :  { %110 = vmatprep.subr.bf16.mxu0 %v197_v0 }
  0x12   :  { %111 = vmatpush1.bf16.msra.mxu0 %v189_v6 }
  0x13   :  { %112 = vmatprep.subr.bf16.mxu0 %v197_v0 }
  0x16   :  { %113 = vmatpush1.bf16.msra.mxu0 %v190_v7 }
  0x17   :  { %114 = vmatprep.subr.bf16.mxu0 %v197_v0 }
  0x1a   :  { %115 = vmatpush1.bf16.msra.mxu0 %v191_v8 }
  0x1b   :  { %116 = vmatprep.subr.bf16.mxu0 %v197_v0 }
  0x1e   :  { %117 = vmatpush1.bf16.msra.mxu0 %v192_v9 }
  0x1f   :  { %132 = vmatprep.subr.bf16.mxu0 %v197_v0 }
  0x22   :  { %133 = vmatpush2.bf16.msra.mxu0 %v193_v10 }
  0x25   :  { %135 = vmatmul.mubr.bf16.vlgmr.msra.gmra.mxu0 %v194_v11 }
  0xe5   :  { %v136_v12 = vpop.f32.mrf.mxu0 }
  0xe6   :  { %143 = vst [vmem:[%s276_s2] sm:$0xff] %v136_v12  ;;  %145 = vadd.xlane.f32.xlu0 %v136_v12  ;;  %v152_v13 = vmul.f32 %v136_v12, %v136_v12 }
  0xe7   :  { %v138_v14 = vpop.f32.mrf.mxu0 }
  0xe8   :  { %154 = vadd.xlane.f32.xlu1 %v152_v13 }
  0xe9   :  { %v139_v15 = vpop.f32.mrf.mxu0 }
  0xea   :  { %144 = vst [vmem:[%s276_s2 + $0x8] sm:$0xff] %v139_v15  ;;  %147 = vadd.xlane.f32.xlu0 %v139_v15  ;;  %v153_v16 = vmul.f32 %v139_v15, %v139_v15 }
  0xeb   :  { %v141_v17 = vpop.f32.mrf.mxu0 }
  0xec   :  { %156 = vadd.xlane.f32.xlu1 %v153_v16 }
 0x16f   :  { %v146_v18 = vpop.xlane.xlu0 %145 }
 0x170   :  { %150 = vst.msk [vmem:[%s277_s3] sm:$0xff] %vm149_vm1, %v146_v18 }
 0x171   :  { %v155_v19 = vpop.xlane.xlu1 %154 }
 0x172   :  { %158 = vst.msk [vmem:[%s278_s4] sm:$0xff] %vm149_vm1, %v155_v19 }
 0x173   :  { %v148_v20 = vpop.xlane.xlu0 %147 }
 0x174   :  { %151 = vst.msk [vmem:[%s277_s3 + $0x8] sm:$0xff] %vm149_vm1, %v148_v20 }
 0x175   :  { %v157_v21 = vpop.xlane.xlu1 %156 }
 0x176   :  { %159 = vst.msk [vmem:[%s278_s4 + $0x8] sm:$0xff] %vm149_vm1, %v157_v21 }

// kernel: cons_net_forward.36
= control target key start
LH: loop header
LB: loop body
LE: loop exit
PB: predicated region body
PF: predicated region fallthrough
CT: control target
= control target key end

     0   :  { %v90_v0 = vmov 0   ;;  %vm78_vm0 = vcmask 261120   ;;  %s159_s1 = inlined_call_operand.vmem [shape: f32[32,1], index: 1, kind: input, shape index: {}]   ;;  %s160_s2 = inlined_call_operand.vmem [shape: f32[32,1], index: 2, kind: input, shape index: {}]   ;;  %s161_s0 = inlined_call_operand.vmem [shape: f32[32,32], index: 0, kind: input, shape index: {}]   ;;  %s162_s3 = inlined_call_operand.vmem [shape: f32[32,32], index: 3, kind: output, shape index: {}]  }
   0x1   :  { %89 = vset.pattern.permute.xlu1 %v90_v0  ;;  %88 = vset.pattern.permute.xlu0 %v90_v0  ;;  %v20_v1 = vld [vmem:[%s159_s1 + $0x10] sm:$0xff]  ;;  %v18_v2 = vld [vmem:[%s159_s1] sm:$0xff]  ;;  %v21_v3 = vld [vmem:[%s159_s1 + $0x18] sm:$0xff] }
   0x2   :  { %34 = vperm.xlu1 %89, %v20_v1   ;;  %24 = vperm.xlu0 %88, %v18_v2   ;;  %v19_v4 = vld [vmem:[%s159_s1 + $0x8] sm:$0xff]  ;;  %v46_v6 = vld [vmem:[%s160_s2] sm:$0xff]  ;;  %v49_v7 = vld [vmem:[%s160_s2 + $0x18] sm:$0xff] }
   0x3   :  { %v47_v5 = vld [vmem:[%s160_s2 + $0x8] sm:$0xff]  ;;  %v48_v8 = vld [vmem:[%s160_s2 + $0x10] sm:$0xff]  ;;  %v14_v11 = vld [vmem:[%s161_s0] sm:$0xff] }
   0x4   :  { %v15_v14 = vld [vmem:[%s161_s0 + $0x8] sm:$0xff]  ;;  %v16_v17 = vld [vmem:[%s161_s0 + $0x10] sm:$0xff]  ;;  %v17_v18 = vld [vmem:[%s161_s0 + $0x18] sm:$0xff] }
   0x6   :  { %39 = vperm.xlu1 %89, %v21_v3   ;;  %29 = vperm.xlu0 %88, %v19_v4  }
   0xa   :  { %57 = vperm.xlu1 %89, %v47_v5   ;;  %52 = vperm.xlu0 %88, %v46_v6  }
   0xe   :  { %67 = vperm.xlu1 %89, %v49_v7   ;;  %62 = vperm.xlu0 %88, %v48_v8  }
  0x7d   :  { %v35_v9 = vpop.permute.xlu1 %34  ;;  %v25_v10 = vpop.permute.xlu0 %24 }
  0x7e   :  { %v42_v15 = vmul.f32 %v25_v10, %v14_v11  ;;  %v44_v23 = vmul.f32 %v35_v9, %v16_v17 }
  0x81   :  { %v40_v12 = vpop.permute.xlu1 %39  ;;  %v30_v13 = vpop.permute.xlu0 %29 }
  0x82   :  { %v43_v16 = vmul.f32 %v30_v13, %v15_v14  ;;  %v45_v24 = vmul.f32 %v40_v12, %v17_v18 }
  0x85   :  { %v58_v19 = vpop.permute.xlu1 %57  ;;  %v53_v20 = vpop.permute.xlu0 %52 }
  0x86   :  { %v71_v21 = vadd.f32 %v58_v19, %v43_v16  ;;  %v70_v22 = vadd.f32 %v53_v20, %v42_v15 }
  0x88   :  { %v75_v25 = vmax.f32 %v71_v21, 0.0  ;;  %v74_v26 = vmax.f32 %v70_v22, 0.0 }
  0x89   :  { %v68_v27 = vpop.permute.xlu1 %67  ;;  %v63_v28 = vpop.permute.xlu0 %62 }
  0x8a   :  { %80 = vst.msk [vmem:[%s162_s3 + $0x8] sm:$0xff] %vm78_vm0, %v75_v25  ;;  %79 = vst.msk [vmem:[%s162_s3] sm:$0xff] %vm78_vm0, %v74_v26  ;;  %v73_v29 = vadd.f32 %v68_v27, %v45_v24  ;;  %v72_v30 = vadd.f32 %v63_v28, %v44_v23 }
  0x8c   :  { %v77_v31 = vmax.f32 %v73_v29, 0.0  ;;  %v76_v32 = vmax.f32 %v72_v30, 0.0 }
  0x8e   :  { %82 = vst.msk [vmem:[%s162_s3 + $0x18] sm:$0xff] %vm78_vm0, %v77_v31  ;;  %81 = vst.msk [vmem:[%s162_s3 + $0x10] sm:$0xff] %vm78_vm0, %v76_v32 }

// kernel: cons_net_forward.35
= control target key start
LH: loop header
LB: loop body
LE: loop exit
PB: predicated region body
PF: predicated region fallthrough
CT: control target
= control target key end

     0   :  { %v268_v0 = vmov 0   ;;  %vm109_vm0 = vcmask 130048   ;;  %vm165_vm1 = vcmask 261120   ;;  %vm182_vm2 = vcmask 7168   ;;  %s389_s0 = inlined_call_operand.vmem [shape: bf16[144,32], index: 0, kind: input, shape index: {}]   ;;  %s390_s1 = inlined_call_operand.vmem [shape: bf16[32,144], index: 1, kind: input, shape index: {}]   ;;  %s391_s2 = inlined_call_operand.vmem [shape: f32[32,32], index: 2, kind: output, shape index: {0}]   ;;  %s392_s3 = inlined_call_operand.vmem [shape: f32[1,32,1], index: 3, kind: output, shape index: {1}]   ;;  %s393_s4 = inlined_call_operand.vmem [shape: f32[1,32,1], index: 4, kind: output, shape index: {2}]  }
   0x1   :  { %116 = vmatprep.subr.bf16.mxu0 %v268_v0  ;;  %234 = vmatprep.subr.bf16.mxu1 %v268_v0  ;;  %v253_v1 = vld [vmem:[%s389_s0 + $0x38] sm:$0xff]   ;;  %v254_v2 = vld [vmem:[%s389_s0 + $0x30] sm:$0xff]   ;;  %v255_v3 = vld [vmem:[%s389_s0 + $0x28] sm:$0xff]  }
   0x2   :  { %117 = vmatpush1.bf16.msra.mxu0 %v253_v1  ;;  %243 = vmatpush1.bf16.msra.mxu1 %v253_v1  ;;  %v256_v4 = vld [vmem:[%s389_s0 + $0x20] sm:$0xff]   ;;  %v267_v6 = vld [vmem:[%s390_s1 + $0x14] ss:$8 sps:$4 sm:$0xff]   ;;  %v259_v9 = vld [vmem:[%s389_s0 + $0x8] sm:$0xff]  }
   0x3   :  { %118 = vmatprep.subr.bf16.mxu0 %v268_v0  ;;  %235 = vmatprep.subr.bf16.mxu1 %v268_v0  ;;  %v264_v5 = vld [vmem:[%s390_s1 + $0x4] ss:$8 sps:$4 sm:$0xff]   ;;  %v257_v7 = vld [vmem:[%s389_s0 + $0x18] sm:$0xff]   ;;  %v258_v8 = vld [vmem:[%s389_s0 + $0x10] sm:$0xff]  }
   0x4   :  { %232 = vmatprep.mubr.msk.bf16.mxu0 %vm109_vm0, %v264_v5  ;;  %233 = vmatprep.mubr.msk.bf16.mxu1 %vm109_vm0, %v267_v6  ;;  %v260_v10 = vld [vmem:[%s389_s0] sm:$0xff]   ;;  %v265_v13 = vld [vmem:[%s390_s1 + $0x10] ss:$8 sps:$4 sm:$0xff]  }
   0x5   :  { %v261_v11 = vld [vmem:[%s389_s0 + $0x40] sm:$0xff]  }
   0x6   :  { %119 = vmatpush1.bf16.msra.mxu0 %v254_v2  ;;  %244 = vmatpush1.bf16.msra.mxu1 %v254_v2  ;;  %v262_v12 = vld [vmem:[%s390_s1] ss:$8 sps:$4 sm:$0xff]  }
   0x7   :  { %120 = vmatprep.subr.bf16.mxu0 %v268_v0  ;;  %236 = vmatprep.subr.bf16.mxu1 %v268_v0 }
   0xa   :  { %121 = vmatpush1.bf16.msra.mxu0 %v255_v3  ;;  %245 = vmatpush1.bf16.msra.mxu1 %v255_v3 }
   0xb   :  { %122 = vmatprep.subr.bf16.mxu0 %v268_v0  ;;  %237 = vmatprep.subr.bf16.mxu1 %v268_v0 }
   0xe   :  { %123 = vmatpush1.bf16.msra.mxu0 %v256_v4  ;;  %246 = vmatpush1.bf16.msra.mxu1 %v256_v4 }
   0xf   :  { %124 = vmatprep.subr.bf16.mxu0 %v268_v0  ;;  %238 = vmatprep.subr.bf16.mxu1 %v268_v0 }
  0x12   :  { %125 = vmatpush1.bf16.msra.mxu0 %v257_v7  ;;  %247 = vmatpush1.bf16.msra.mxu1 %v257_v7 }
  0x13   :  { %126 = vmatprep.subr.bf16.mxu0 %v268_v0  ;;  %239 = vmatprep.subr.bf16.mxu1 %v268_v0 }
  0x16   :  { %127 = vmatpush1.bf16.msra.mxu0 %v258_v8  ;;  %248 = vmatpush1.bf16.msra.mxu1 %v258_v8 }
  0x17   :  { %128 = vmatprep.subr.bf16.mxu0 %v268_v0  ;;  %240 = vmatprep.subr.bf16.mxu1 %v268_v0 }
  0x1a   :  { %129 = vmatpush1.bf16.msra.mxu0 %v259_v9  ;;  %249 = vmatpush1.bf16.msra.mxu1 %v259_v9 }
  0x1b   :  { %130 = vmatprep.subr.bf16.mxu0 %v268_v0  ;;  %241 = vmatprep.subr.bf16.mxu1 %v268_v0 }
  0x1e   :  { %131 = vmatpush1.bf16.msra.mxu0 %v260_v10  ;;  %250 = vmatpush1.bf16.msra.mxu1 %v260_v10 }
  0x1f   :  { %146 = vmatprep.subr.bf16.mxu0 %v268_v0  ;;  %242 = vmatprep.subr.bf16.mxu1 %v268_v0 }
  0x22   :  { %147 = vmatpush2.bf16.msra.mxu0 %v261_v11  ;;  %251 = vmatpush2.bf16.msra.mxu1 %v261_v11 }
  0x25   :  { %149 = vmatmul.mubr.bf16.vlgmr.msra.gmra.mxu0 %v262_v12  ;;  %157 = vmatmul.mubr.bf16.vlgmr.msra.gmra.mxu1 %v265_v13 }
  0xe5   :  { %v150_v14 = vpop.f32.mrf.mxu0  ;;  %v158_v15 = vpop.f32.mrf.mxu1 }
  0xe6   :  { %166 = vst.msk [vmem:[%s391_s2] sm:$0xff] %vm165_vm1, %v150_v14  ;;  %168 = vst.msk [vmem:[%s391_s2 + $0x10] sm:$0xff] %vm165_vm1, %v158_v15  ;;  %v176_v16 = vsel %vm165_vm1, %v158_v15, 0.0  ;;  %v170_v17 = vsel %vm165_vm1, %v150_v14, 0.0  ;;  %v187_v18 = vmul.f32 %v150_v14, %v150_v14  ;;  %v189_v31 = vmul.f32 %v158_v15, %v158_v15 }
  0xe7   :  { %177 = vadd.xlane.f32.xlu1 %v176_v16  ;;  %v160_v19 = vpop.f32.mrf.mxu1  ;;  %171 = vadd.xlane.f32.xlu0 %v170_v17  ;;  %v152_v20 = vpop.f32.mrf.mxu0 }
  0xe8   :  { %v191_v24 = vsel %vm165_vm1, %v187_v18, 0.0  ;;  %v197_v33 = vsel %vm165_vm1, %v189_v31, 0.0 }
  0xe9   :  { %v153_v21 = vpop.f32.mrf.mxu0  ;;  %v161_v22 = vpop.f32.mrf.mxu1 }
  0xea   :  { %167 = vst.msk [vmem:[%s391_s2 + $0x8] sm:$0xff] %vm165_vm1, %v153_v21  ;;  %169 = vst.msk [vmem:[%s391_s2 + $0x18] sm:$0xff] %vm165_vm1, %v161_v22  ;;  %v179_v23 = vsel %vm165_vm1, %v161_v22, 0.0  ;;  %v188_v25 = vmul.f32 %v153_v21, %v153_v21  ;;  %v173_v29 = vsel %vm165_vm1, %v153_v21, 0.0  ;;  %v190_v30 = vmul.f32 %v161_v22, %v161_v22 }
  0xeb   :  { %180 = vadd.xlane.f32.xlu1 %v179_v23  ;;  %v163_v26 = vpop.f32.mrf.mxu1  ;;  %192 = vadd.xlane.f32.xlu0 %v191_v24  ;;  %v155_v27 = vpop.f32.mrf.mxu0 }
  0xec   :  { %v194_v28 = vsel %vm165_vm1, %v188_v25, 0.0  ;;  %v200_v32 = vsel %vm165_vm1, %v190_v30, 0.0 }
  0xef   :  { %195 = vadd.xlane.f32.xlu1 %v194_v28  ;;  %174 = vadd.xlane.f32.xlu0 %v173_v29 }
  0xf3   :  { %201 = vadd.xlane.f32.xlu1 %v200_v32  ;;  %198 = vadd.xlane.f32.xlu0 %v197_v33 }
 0x170   :  { %v178_v34 = vpop.xlane.xlu1 %177  ;;  %v172_v35 = vpop.xlane.xlu0 %171 }
 0x171   :  { %185 = vst.msk [vmem:[%s392_s3 + $0x10] sm:$0xff] %vm182_vm2, %v178_v34  ;;  %183 = vst.msk [vmem:[%s392_s3] sm:$0xff] %vm182_vm2, %v172_v35 }
 0x174   :  { %v181_v36 = vpop.xlane.xlu1 %180  ;;  %v193_v37 = vpop.xlane.xlu0 %192 }
 0x175   :  { %186 = vst.msk [vmem:[%s392_s3 + $0x18] sm:$0xff] %vm182_vm2, %v181_v36  ;;  %203 = vst.msk [vmem:[%s393_s4] sm:$0xff] %vm182_vm2, %v193_v37 }
 0x178   :  { %v196_v38 = vpop.xlane.xlu1 %195  ;;  %v175_v39 = vpop.xlane.xlu0 %174 }
 0x179   :  { %204 = vst.msk [vmem:[%s393_s4 + $0x8] sm:$0xff] %vm182_vm2, %v196_v38  ;;  %184 = vst.msk [vmem:[%s392_s3 + $0x8] sm:$0xff] %vm182_vm2, %v175_v39 }
 0x17c   :  { %v202_v40 = vpop.xlane.xlu1 %201  ;;  %v199_v41 = vpop.xlane.xlu0 %198 }
 0x17d   :  { %206 = vst.msk [vmem:[%s393_s4 + $0x18] sm:$0xff] %vm182_vm2, %v202_v40  ;;  %205 = vst.msk [vmem:[%s393_s4 + $0x10] sm:$0xff] %vm182_vm2, %v199_v41 }

// kernel: cons_net_forward.39
= control target key start
LH: loop header
LB: loop body
LE: loop exit
PB: predicated region body
PF: predicated region fallthrough
CT: control target
= control target key end

     0   :  { %v267_v2 = vmov 0   ;;  %vm74_vm0 = vcmask 261120   ;;  %s388_s0 = inlined_call_operand.vmem [shape: f32[32,32], index: 0, kind: input, shape index: {}]   ;;  %s389_s1 = inlined_call_operand.vmem [shape: f32[64,32], index: 1, kind: input, shape index: {}]   ;;  %s390_s2 = inlined_call_operand.vmem [shape: f32[64,1], index: 2, kind: input, shape index: {}]   ;;  %s391_s3 = inlined_call_operand.vmem [shape: f32[64,32], index: 3, kind: output, shape index: {}]  }
   0x1   :  { %v25_v0 = vld [vmem:[%s388_s0 + $0x18] sm:$0xff]  ;;  %v24_v1 = vld [vmem:[%s388_s0 + $0x10] sm:$0xff]  ;;  %266 = vset.pattern.permute.xlu1 %v267_v2  ;;  %265 = vset.pattern.permute.xlu0 %v267_v2  ;;  %v23_v3 = vld [vmem:[%s388_s0 + $0x8] sm:$0xff] }
   0x2   :  { %236 = vmatprep.subr.mxu0 %v25_v0  ;;  %256 = vmatprep.subr.mxu1 %v25_v0  ;;  %v22_v4 = vld [vmem:[%s388_s0] sm:$0xff]  ;;  %v15_v7 = vld [vmem:[%s389_s1 + $0x8] sm:$0xff]  ;;  %v16_v9 = vld [vmem:[%s389_s1 + $0x10] sm:$0xff] }
   0x3   :  { %237 = vmatpush3.msra.mxu0 %v25_v0  ;;  %260 = vmatpush3.msra.mxu1 %v25_v0  ;;  %v14_v5 = vld [vmem:[%s389_s1] sm:$0xff]  ;;  %v19_v8 = vld [vmem:[%s389_s1 + $0x28] sm:$0xff]  ;;  %v20_v10 = vld [vmem:[%s389_s1 + $0x30] sm:$0xff] }
   0x4   :  { %238 = vmatprep.subr.mxu0 %v24_v1  ;;  %257 = vmatprep.subr.mxu1 %v24_v1  ;;  %v18_v6 = vld [vmem:[%s389_s1 + $0x20] sm:$0xff]  ;;  %v28_v11 = vld [vmem:[%s390_s2 + $0x10] sm:$0xff]  ;;  %v17_v13 = vld [vmem:[%s389_s1 + $0x18] sm:$0xff] }
   0x5   :  { %239 = vmatpush3.msra.mxu0 %v24_v1  ;;  %261 = vmatpush3.msra.mxu1 %v24_v1  ;;  %v26_v12 = vld [vmem:[%s390_s2] sm:$0xff]  ;;  %v21_v14 = vld [vmem:[%s389_s1 + $0x38] sm:$0xff]  ;;  %v27_v16 = vld [vmem:[%s390_s2 + $0x8] sm:$0xff] }
   0x6   :  { %240 = vmatprep.subr.mxu0 %v23_v3  ;;  %258 = vmatprep.subr.mxu1 %v23_v3  ;;  %v29_v15 = vld [vmem:[%s390_s2 + $0x18] sm:$0xff]  ;;  %v31_v17 = vld [vmem:[%s390_s2 + $0x28] sm:$0xff]  ;;  %v30_v18 = vld [vmem:[%s390_s2 + $0x20] sm:$0xff] }
   0x7   :  { %241 = vmatpush3.msra.mxu0 %v23_v3  ;;  %262 = vmatpush3.msra.mxu1 %v23_v3  ;;  %v33_v19 = vld [vmem:[%s390_s2 + $0x38] sm:$0xff]  ;;  %v32_v20 = vld [vmem:[%s390_s2 + $0x30] sm:$0xff] }
   0x8   :  { %242 = vmatprep.subr.mxu0 %v22_v4  ;;  %259 = vmatprep.subr.mxu1 %v22_v4 }
   0x9   :  { %243 = vmatpush3.msra.mxu0 %v22_v4  ;;  %263 = vmatpush3.msra.mxu1 %v22_v4 }
   0xa   :  { %244 = vmatprep.mubr.msk.f32.mxu0 %vm74_vm0, %v14_v5  ;;  %250 = vmatprep.mubr.msk.f32.mxu1 %vm74_vm0, %v18_v6 }
   0xb   :  { %245 = vmatmul.mubr.msk.f32.vlgmr.msra.gmra.mxu0 %vm74_vm0, %v15_v7  ;;  %251 = vmatmul.mubr.msk.f32.vlgmr.msra.gmra.mxu1 %vm74_vm0, %v19_v8 }
   0xc   :  { %247 = vmatprep.mubr.msk.f32.mxu0 %vm74_vm0, %v16_v9  ;;  %253 = vmatprep.mubr.msk.f32.mxu1 %vm74_vm0, %v20_v10 }
   0xd   :  { %46 = vperm.xlu1 %266, %v28_v11   ;;  %36 = vperm.xlu0 %265, %v26_v12  }
   0xf   :  { %248 = vmatmul.mubr.msk.f32.gmra.mxu0 %vm74_vm0, %v17_v13  ;;  %254 = vmatmul.mubr.msk.f32.gmra.mxu1 %vm74_vm0, %v21_v14 }
  0x11   :  { %51 = vperm.xlu1 %266, %v29_v15   ;;  %41 = vperm.xlu0 %265, %v27_v16  }
  0x15   :  { %61 = vperm.xlu1 %266, %v31_v17   ;;  %56 = vperm.xlu0 %265, %v30_v18  }
  0x19   :  { %71 = vperm.xlu1 %266, %v33_v19   ;;  %66 = vperm.xlu0 %265, %v32_v20  }
  0x88   :  { %v47_v21 = vpop.permute.xlu1 %46  ;;  %v37_v22 = vpop.permute.xlu0 %36 }
  0x8c   :  { %v52_v23 = vpop.permute.xlu1 %51  ;;  %v42_v24 = vpop.permute.xlu0 %41 }
  0x90   :  { %v62_v25 = vpop.permute.xlu1 %61  ;;  %v57_v26 = vpop.permute.xlu0 %56 }
  0x94   :  { %v72_v33 = vpop.permute.xlu1 %71  ;;  %v67_v38 = vpop.permute.xlu0 %66 }
  0xcb   :  { %v246_v27 = vpop.f32.mrf.mxu0  ;;  %v252_v28 = vpop.f32.mrf.mxu1 }
  0xcc   :  { %v171_v29 = vadd.f32 %v246_v27, %v42_v24  ;;  %v191_v30 = vadd.f32 %v252_v28, %v62_v25 }
  0xcd   :  { %v165_v31 = vpop.f32.mrf.mxu0  ;;  %v185_v32 = vpop.f32.mrf.mxu1 }
  0xce   :  { %205 = vst.msk [vmem:[%s391_s3 + $0x8] sm:$0xff] %vm74_vm0, %v171_v29  ;;  %209 = vst.msk [vmem:[%s391_s3 + $0x28] sm:$0xff] %vm74_vm0, %v191_v30  ;;  %v166_v34 = vadd.f32 %v165_v31, %v37_v22  ;;  %v186_v35 = vadd.f32 %v185_v32, %v57_v26 }
  0xcf   :  { %v249_v36 = vpop.f32.mrf.mxu0  ;;  %v255_v37 = vpop.f32.mrf.mxu1 }
  0xd0   :  { %204 = vst.msk [vmem:[%s391_s3] sm:$0xff] %vm74_vm0, %v166_v34  ;;  %208 = vst.msk [vmem:[%s391_s3 + $0x20] sm:$0xff] %vm74_vm0, %v186_v35  ;;  %v181_v39 = vadd.f32 %v249_v36, %v52_v23  ;;  %v201_v40 = vadd.f32 %v255_v37, %v72_v33 }
  0xd1   :  { %v175_v41 = vpop.f32.mrf.mxu0  ;;  %v195_v42 = vpop.f32.mrf.mxu1 }
  0xd2   :  { %207 = vst.msk [vmem:[%s391_s3 + $0x18] sm:$0xff] %vm74_vm0, %v181_v39  ;;  %211 = vst.msk [vmem:[%s391_s3 + $0x38] sm:$0xff] %vm74_vm0, %v201_v40  ;;  %v176_v43 = vadd.f32 %v175_v41, %v47_v21  ;;  %v196_v44 = vadd.f32 %v195_v42, %v67_v38 }
  0xd4   :  { %206 = vst.msk [vmem:[%s391_s3 + $0x10] sm:$0xff] %vm74_vm0, %v176_v43  ;;  %210 = vst.msk [vmem:[%s391_s3 + $0x30] sm:$0xff] %vm74_vm0, %v196_v44 }

// kernel: cons_net_forward.37
= control target key start
LH: loop header
LB: loop body
LE: loop exit
PB: predicated region body
PF: predicated region fallthrough
CT: control target
= control target key end

     0   :  { %vm197_vm0 = vcmask 261120   ;;  %vm318_vm1 = vcmask 7168   ;;  %s602_s0 = inlined_call_operand.vmem [shape: bf16[288,32], index: 0, kind: input, shape index: {}]   ;;  %s603_s1 = inlined_call_operand.vmem [shape: bf16[32,288], index: 1, kind: input, shape index: {}]   ;;  %s604_s2 = inlined_call_operand.vmem [shape: f32[32,32], index: 2, kind: output, shape index: {0}]   ;;  %s605_s3 = inlined_call_operand.vmem [shape: f32[1,32,1], index: 3, kind: output, shape index: {1}]   ;;  %s606_s4 = inlined_call_operand.vmem [shape: f32[1,32,1], index: 4, kind: output, shape index: {2}]  }
   0x1   :  { %v421_v0 = vld [vmem:[%s602_s0 + $0x78] sm:$0xff]   ;;  %v423_v2 = vld [vmem:[%s602_s0 + $0x70] sm:$0xff]   ;;  %v425_v4 = vld [vmem:[%s602_s0 + $0x68] sm:$0xff]  }
   0x2   :  { %v422_v1 = vld [vmem:[%s602_s0 + $0x38] sm:$0xff]   ;;  %381 = vmatprep.subr.bf16.mxu0 %v421_v0  ;;  %v424_v3 = vld [vmem:[%s602_s0 + $0x30] sm:$0xff]   ;;  %v426_v5 = vld [vmem:[%s602_s0 + $0x28] sm:$0xff]  }
   0x3   :  { %382 = vmatpush3.bf16.msra.mxu0 %v422_v1  ;;  %v427_v6 = vld [vmem:[%s602_s0 + $0x60] sm:$0xff]   ;;  %v432_v8 = vld [vmem:[%s602_s0 + $0x88] sm:$0xff]   ;;  %v429_v9 = vld [vmem:[%s602_s0 + $0x58] sm:$0xff]  }
   0x4   :  { %383 = vmatprep.subr.bf16.mxu0 %v423_v2  ;;  %v428_v7 = vld [vmem:[%s602_s0 + $0x20] sm:$0xff]   ;;  %v430_v10 = vld [vmem:[%s602_s0 + $0x18] sm:$0xff]   ;;  %413 = vmatprep.subr.bf16.mxu1 %v432_v8  ;;  %v431_v12 = vld [vmem:[%s602_s0 + $0x50] sm:$0xff]  }
   0x5   :  { %414 = vmatpush3.bf16.msra.mxu1 %v432_v8  ;;  %v435_v11 = vld [vmem:[%s602_s0 + $0x80] sm:$0xff]   ;;  %v437_v13 = vld [vmem:[%s603_s1 + $0x8] ss:$12 sps:$4 sm:$0xff]  }
   0x6   :  { %415 = vmatprep.subr.bf16.mxu1 %v435_v11  ;;  %417 = vmatprep.mubr.msk.bf16.mxu1 %vm197_vm0, %v437_v13  ;;  %v439_v14 = vld [vmem:[%s603_s1 + $0x20] ss:$12 sps:$4 sm:$0xff]   ;;  %v433_v15 = vld [vmem:[%s602_s0 + $0x10] sm:$0xff]   ;;  %v444_v22 = vld [vmem:[%s603_s1 + $0x1c] ss:$12 sps:$4 sm:$0xff]  }
   0x7   :  { %384 = vmatpush3.bf16.msra.mxu0 %v424_v3  ;;  %v434_v16 = vld [vmem:[%s602_s0 + $0x48] sm:$0xff]   ;;  %v443_v17 = vld [vmem:[%s603_s1 + $0x4] ss:$12 sps:$4 sm:$0xff]  }
   0x8   :  { %385 = vmatprep.subr.bf16.mxu0 %v425_v4  ;;  %v436_v18 = vld [vmem:[%s602_s0 + $0x8] sm:$0xff]   ;;  %236 = vmatprep.mubr.bf16.mxu0 %v443_v17  ;;  %v438_v19 = vld [vmem:[%s602_s0 + $0x40] sm:$0xff]  }
   0x9   :  { %416 = vmatpush3.bf16.msra.mxu1 %v435_v11  ;;  %v440_v20 = vld [vmem:[%s602_s0] sm:$0xff]  }
   0xa   :  { %v441_v21 = vld [vmem:[%s603_s1] ss:$12 sps:$4 sm:$0xff]   ;;  %v446_v23 = vld [vmem:[%s603_s1 + $0x18] ss:$12 sps:$4 sm:$0xff]  }
   0xb   :  { %386 = vmatpush3.bf16.msra.mxu0 %v426_v5 }
   0xc   :  { %387 = vmatprep.subr.bf16.mxu0 %v427_v6  ;;  %418 = vmatmul.mubr.msk.bf16.vlgmr.msra.gmra.mxu1 %vm197_vm0, %v439_v14 }
   0xf   :  { %388 = vmatpush3.bf16.msra.mxu0 %v428_v7 }
  0x10   :  { %389 = vmatprep.subr.bf16.mxu0 %v429_v9 }
  0x13   :  { %390 = vmatpush3.bf16.msra.mxu0 %v430_v10 }
  0x14   :  { %391 = vmatprep.subr.bf16.mxu0 %v431_v12 }
  0x17   :  { %392 = vmatpush3.bf16.msra.mxu0 %v433_v15 }
  0x18   :  { %393 = vmatprep.subr.bf16.mxu0 %v434_v16 }
  0x1b   :  { %394 = vmatpush3.bf16.msra.mxu0 %v436_v18 }
  0x1c   :  { %395 = vmatprep.subr.bf16.mxu0 %v438_v19 }
  0x1f   :  { %396 = vmatpush3.bf16.msra.mxu0 %v440_v20 }
  0x22   :  { %237 = vmatmul.mubr.bf16.vlgmr.msra.gmra.mxu0 %v441_v21 }
  0x23   :  { %244 = vmatprep.mubr.bf16.mxu0 %v444_v22 }
  0x2a   :  { %245 = vmatmul.mubr.bf16.gmra.mxu0 %v446_v23 }
  0xcc   :  { %v419_v24 = vpop.f32.mrf.mxu1 }
  0xce   :  { %v287_v25 = vpop.f32.mrf.mxu1 }
  0xd0   :  { %v420_v29 = vpop.f32.mrf.mxu1 }
  0xd2   :  { %v290_v36 = vpop.f32.mrf.mxu1 }
  0xe2   :  { %v397_v26 = vpop.f32.mrf.mxu0 }
  0xe4   :  { %v398_v27 = vpop.f32.mrf.mxu0 }
  0xe5   :  { %v399_v28 = vadd.f32 %v398_v27, %v397_v26 }
  0xe6   :  { %v400_v30 = vpop.f32.mrf.mxu0 }
  0xe7   :  { %v288_v31 = vadd.f32 %v399_v28, %v287_v25 }
  0xe8   :  { %v401_v32 = vpop.f32.mrf.mxu0 }
  0xe9   :  { %302 = vst.msk [vmem:[%s604_s2] sm:$0xff] %vm197_vm0, %v288_v31  ;;  %v402_v33 = vadd.f32 %v401_v32, %v400_v30  ;;  %v306_v34 = vsel %vm197_vm0, %v288_v31, 0.0  ;;  %v323_v35 = vmul.f32 %v288_v31, %v288_v31 }
  0xea   :  { %v403_v37 = vpop.f32.mrf.mxu0  ;;  %307 = vadd.xlane.f32.xlu0 %v306_v34 }
  0xeb   :  { %v291_v38 = vadd.f32 %v402_v33, %v290_v36  ;;  %v327_v41 = vsel %vm197_vm0, %v323_v35, 0.0 }
  0xec   :  { %v404_v39 = vpop.f32.mrf.mxu0 }
  0xed   :  { %303 = vst.msk [vmem:[%s604_s2 + $0x8] sm:$0xff] %vm197_vm0, %v291_v38  ;;  %v405_v40 = vadd.f32 %v404_v39, %v403_v37  ;;  %v324_v42 = vmul.f32 %v291_v38, %v291_v38  ;;  %v309_v48 = vsel %vm197_vm0, %v291_v38, 0.0 }
  0xee   :  { %v406_v43 = vpop.f32.mrf.mxu0  ;;  %328 = vadd.xlane.f32.xlu0 %v327_v41 }
  0xef   :  { %v296_v44 = vadd.f32 %v419_v24, %v405_v40  ;;  %v330_v45 = vsel %vm197_vm0, %v324_v42, 0.0 }
  0xf0   :  { %v407_v46 = vpop.f32.mrf.mxu0  ;;  %331 = vadd.xlane.f32.xlu1 %v330_v45 }
  0xf1   :  { %304 = vst.msk [vmem:[%s604_s2 + $0x10] sm:$0xff] %vm197_vm0, %v296_v44  ;;  %v408_v47 = vadd.f32 %v407_v46, %v406_v43  ;;  %v325_v49 = vmul.f32 %v296_v44, %v296_v44  ;;  %v312_v51 = vsel %vm197_vm0, %v296_v44, 0.0 }
  0xf2   :  { %310 = vadd.xlane.f32.xlu0 %v309_v48 }
  0xf3   :  { %v299_v50 = vadd.f32 %v420_v29, %v408_v47  ;;  %v333_v52 = vsel %vm197_vm0, %v325_v49, 0.0 }
  0xf4   :  { %313 = vadd.xlane.f32.xlu1 %v312_v51 }
  0xf5   :  { %305 = vst.msk [vmem:[%s604_s2 + $0x18] sm:$0xff] %vm197_vm0, %v299_v50  ;;  %v315_v53 = vsel %vm197_vm0, %v299_v50, 0.0  ;;  %v326_v54 = vmul.f32 %v299_v50, %v299_v50 }
  0xf6   :  { %334 = vadd.xlane.f32.xlu0 %v333_v52 }
  0xf7   :  { %v336_v55 = vsel %vm197_vm0, %v326_v54, 0.0 }
  0xf8   :  { %316 = vadd.xlane.f32.xlu1 %v315_v53 }
  0xfc   :  { %337 = vadd.xlane.f32.xlu1 %v336_v55 }
 0x173   :  { %v308_v56 = vpop.xlane.xlu0 %307 }
 0x174   :  { %319 = vst.msk [vmem:[%s605_s3] sm:$0xff] %vm318_vm1, %v308_v56 }
 0x177   :  { %v329_v57 = vpop.xlane.xlu0 %328 }
 0x178   :  { %339 = vst.msk [vmem:[%s606_s4] sm:$0xff] %vm318_vm1, %v329_v57 }
 0x179   :  { %v332_v58 = vpop.xlane.xlu1 %331 }
 0x17a   :  { %340 = vst.msk [vmem:[%s606_s4 + $0x8] sm:$0xff] %vm318_vm1, %v332_v58 }
 0x17b   :  { %v311_v59 = vpop.xlane.xlu0 %310 }
 0x17c   :  { %320 = vst.msk [vmem:[%s605_s3 + $0x8] sm:$0xff] %vm318_vm1, %v311_v59 }
 0x17d   :  { %v314_v60 = vpop.xlane.xlu1 %313 }
 0x17e   :  { %321 = vst.msk [vmem:[%s605_s3 + $0x10] sm:$0xff] %vm318_vm1, %v314_v60 }
 0x17f   :  { %v335_v61 = vpop.xlane.xlu0 %334 }
 0x180   :  { %341 = vst.msk [vmem:[%s606_s4 + $0x10] sm:$0xff] %vm318_vm1, %v335_v61 }
 0x181   :  { %v317_v62 = vpop.xlane.xlu1 %316 }
 0x182   :  { %322 = vst.msk [vmem:[%s605_s3 + $0x18] sm:$0xff] %vm318_vm1, %v317_v62 }
 0x185   :  { %v338_v63 = vpop.xlane.xlu1 %337 }
 0x186   :  { %342 = vst.msk [vmem:[%s606_s4 + $0x18] sm:$0xff] %vm318_vm1, %v338_v63 }

// kernel: cons_net_forward.44
= control target key start
LH: loop header
LB: loop body
LE: loop exit
PB: predicated region body
PF: predicated region fallthrough
CT: control target
= control target key end

     0   :  { %v177_v2 = vmov 0   ;;  %vm44_vm0 = vcmask 130048   ;;  %s240_s0 = inlined_call_operand.vmem [shape: f32[16,128], index: 0, kind: input, shape index: {}]   ;;  %s241_s1 = inlined_call_operand.vmem [shape: f32[32,16], index: 1, kind: input, shape index: {}]   ;;  %s242_s2 = inlined_call_operand.vmem [shape: f32[32,1], index: 2, kind: input, shape index: {}]   ;;  %s243_s3 = inlined_call_operand.vmem [shape: f32[32,128], index: 3, kind: output, shape index: {}]  }
   0x1   :  { %v19_v0 = vld [vmem:[%s240_s0 + $0x8] sm:$0xff]  ;;  %v18_v1 = vld [vmem:[%s240_s0] sm:$0xff]  ;;  %176 = vset.pattern.permute.xlu1 %v177_v2  ;;  %175 = vset.pattern.permute.xlu0 %v177_v2  ;;  %v16_v4 = vld [vmem:[%s241_s1 + $0x10] sm:$0xff] }
   0x2   :  { %160 = vmatprep.subr.mxu0 %v19_v0  ;;  %170 = vmatprep.subr.mxu1 %v19_v0  ;;  %v14_v3 = vld [vmem:[%s241_s1] sm:$0xff]  ;;  %v15_v5 = vld [vmem:[%s241_s1 + $0x8] sm:$0xff]  ;;  %v17_v6 = vld [vmem:[%s241_s1 + $0x18] sm:$0xff] }
   0x3   :  { %161 = vmatpush3.msra.mxu0 %v19_v0  ;;  %172 = vmatpush3.msra.mxu1 %v19_v0  ;;  %v22_v7 = vld [vmem:[%s242_s2 + $0x10] sm:$0xff]  ;;  %v20_v8 = vld [vmem:[%s242_s2] sm:$0xff]  ;;  %v23_v9 = vld [vmem:[%s242_s2 + $0x18] sm:$0xff] }
   0x4   :  { %162 = vmatprep.subr.mxu0 %v18_v1  ;;  %171 = vmatprep.subr.mxu1 %v18_v1  ;;  %v21_v10 = vld [vmem:[%s242_s2 + $0x8] sm:$0xff] }
   0x5   :  { %163 = vmatpush3.msra.mxu0 %v18_v1  ;;  %173 = vmatpush3.msra.mxu1 %v18_v1 }
   0x6   :  { %164 = vmatprep.mubr.msk.f32.mxu0 %vm44_vm0, %v14_v3  ;;  %167 = vmatprep.mubr.msk.f32.mxu1 %vm44_vm0, %v16_v4 }
   0x7   :  { %165 = vmatmul.mubr.msk.f32.vlgmr.msra.gmra.mxu0 %vm44_vm0, %v15_v5  ;;  %168 = vmatmul.mubr.msk.f32.vlgmr.msra.gmra.mxu1 %vm44_vm0, %v17_v6 }
   0x8   :  { %36 = vperm.xlu1 %176, %v22_v7   ;;  %26 = vperm.xlu0 %175, %v20_v8  }
   0xc   :  { %41 = vperm.xlu1 %176, %v23_v9   ;;  %31 = vperm.xlu0 %175, %v21_v10  }
  0x83   :  { %v37_v11 = vpop.permute.xlu1 %36  ;;  %v27_v12 = vpop.permute.xlu0 %26 }
  0x87   :  { %v42_v13 = vpop.permute.xlu1 %41  ;;  %v32_v14 = vpop.permute.xlu0 %31 }
  0xc7   :  { %v166_v15 = vpop.f32.mrf.mxu0  ;;  %v169_v16 = vpop.f32.mrf.mxu1 }
  0xc8   :  { %v129_v17 = vadd.f32 %v166_v15, %v32_v14  ;;  %v139_v18 = vadd.f32 %v169_v16, %v42_v13 }
  0xc9   :  { %v123_v19 = vpop.f32.mrf.mxu0  ;;  %v133_v20 = vpop.f32.mrf.mxu1 }
  0xca   :  { %143 = vst [vmem:[%s243_s3 + $0x8] sm:$0xff] %v129_v17  ;;  %145 = vst [vmem:[%s243_s3 + $0x18] sm:$0xff] %v139_v18  ;;  %v124_v21 = vadd.f32 %v123_v19, %v27_v12  ;;  %v134_v22 = vadd.f32 %v133_v20, %v37_v11 }
  0xcc   :  { %142 = vst [vmem:[%s243_s3] sm:$0xff] %v124_v21  ;;  %144 = vst [vmem:[%s243_s3 + $0x10] sm:$0xff] %v134_v22 }

// kernel: cons_net_forward.40
= control target key start
LH: loop header
LB: loop body
LE: loop exit
PB: predicated region body
PF: predicated region fallthrough
CT: control target
= control target key end

     0   :  { %v372_v1 = vmov 0.0   ;;  %vm373_vm0 = vmmov 0   ;;  %vm178_vm1 = vcmask 261120   ;;  %vm270_vm2 = vcmask 7168   ;;  %s480_s0 = inlined_call_operand.vmem [shape: bf16[288,128], index: 0, kind: input, shape index: {}]   ;;  %s481_s1 = inlined_call_operand.vmem [shape: bf16[16,288], index: 1, kind: input, shape index: {}]   ;;  %s482_s2 = inlined_call_operand.vmem [shape: f32[16,128], index: 2, kind: output, shape index: {0}]   ;;  %s483_s3 = inlined_call_operand.vmem [shape: f32[1,16,1], index: 3, kind: output, shape index: {1}]   ;;  %s484_s4 = inlined_call_operand.vmem [shape: f32[1,16,1], index: 4, kind: output, shape index: {2}]  }
   0x1   :  { %v350_v0 = vld [vmem:[%s480_s0 + $0x78] sm:$0xff]   ;;  %340 = vmatprep.subr.bf16.mxu1 %v372_v1  ;;  %344 = vmatprep.mubr.msk.bf16.mxu1 %vm373_vm0, %v372_v1  ;;  %v352_v3 = vld [vmem:[%s480_s0 + $0x70] sm:$0xff]   ;;  %v354_v5 = vld [vmem:[%s480_s0 + $0x68] sm:$0xff]  }
   0x2   :  { %v351_v2 = vld [vmem:[%s480_s0 + $0x38] sm:$0xff]   ;;  %315 = vmatprep.subr.bf16.mxu0 %v350_v0  ;;  %v353_v4 = vld [vmem:[%s480_s0 + $0x30] sm:$0xff]   ;;  %v355_v6 = vld [vmem:[%s480_s0 + $0x28] sm:$0xff]  }
   0x3   :  { %316 = vmatpush3.bf16.msra.mxu0 %v351_v2  ;;  %v356_v7 = vld [vmem:[%s480_s0 + $0x60] sm:$0xff]   ;;  %v358_v9 = vld [vmem:[%s480_s0 + $0x58] sm:$0xff]   ;;  %v362_v10 = vld [vmem:[%s480_s0 + $0x88] sm:$0xff]  }
   0x4   :  { %317 = vmatprep.subr.bf16.mxu0 %v352_v3  ;;  %v357_v8 = vld [vmem:[%s480_s0 + $0x20] sm:$0xff]   ;;  %v359_v11 = vld [vmem:[%s480_s0 + $0x18] sm:$0xff]   ;;  %341 = vmatpush3.bf16.msra.mxu1 %v362_v10  ;;  %v360_v13 = vld [vmem:[%s480_s0 + $0x50] sm:$0xff]  }
   0x5   :  { %342 = vmatprep.subr.bf16.mxu1 %v372_v1  ;;  %v365_v12 = vld [vmem:[%s480_s0 + $0x80] sm:$0xff]   ;;  %v368_v14 = vld [vmem:[%s481_s1 + $0x8] ss:$12 sps:$4 sm:$0xff]  }
   0x6   :  { %v361_v15 = vld [vmem:[%s480_s0 + $0x10] sm:$0xff]   ;;  %v363_v16 = vld [vmem:[%s480_s0 + $0x48] sm:$0xff]   ;;  %v366_v19 = vld [vmem:[%s480_s0 + $0x40] sm:$0xff]  }
   0x7   :  { %318 = vmatpush3.bf16.msra.mxu0 %v353_v4  ;;  %v371_v17 = vld [vmem:[%s481_s1 + $0x4] ss:$12 sps:$4 sm:$0xff]   ;;  %v364_v18 = vld [vmem:[%s480_s0 + $0x8] sm:$0xff]  }
   0x8   :  { %319 = vmatprep.subr.bf16.mxu0 %v354_v5  ;;  %343 = vmatpush3.bf16.msra.mxu1 %v365_v12  ;;  %v367_v20 = vld [vmem:[%s480_s0] sm:$0xff]  }
   0x9   :  { %214 = vmatprep.mubr.bf16.mxu0 %v371_v17  ;;  %v369_v21 = vld [vmem:[%s481_s1] ss:$12 sps:$4 sm:$0xff]  }
   0xb   :  { %320 = vmatpush3.bf16.msra.mxu0 %v355_v6  ;;  %345 = vmatmul.mubr.msk.bf16.vlgmr.msra.gmra.mxu1 %vm178_vm1, %v368_v14 }
   0xc   :  { %321 = vmatprep.subr.bf16.mxu0 %v356_v7 }
   0xf   :  { %322 = vmatpush3.bf16.msra.mxu0 %v357_v8 }
  0x10   :  { %323 = vmatprep.subr.bf16.mxu0 %v358_v9 }
  0x13   :  { %324 = vmatpush3.bf16.msra.mxu0 %v359_v11 }
  0x14   :  { %325 = vmatprep.subr.bf16.mxu0 %v360_v13 }
  0x17   :  { %326 = vmatpush3.bf16.msra.mxu0 %v361_v15 }
  0x18   :  { %327 = vmatprep.subr.bf16.mxu0 %v363_v16 }
  0x1b   :  { %328 = vmatpush3.bf16.msra.mxu0 %v364_v18 }
  0x1c   :  { %329 = vmatprep.subr.bf16.mxu0 %v366_v19 }
  0x1f   :  { %330 = vmatpush3.bf16.msra.mxu0 %v367_v20 }
  0x22   :  { %215 = vmatmul.mubr.bf16.vlgmr.msra.gmra.mxu0 %v369_v21 }
  0xcb   :  { %v257_v22 = vpop.f32.mrf.mxu1 }
  0xcd   :  { %v346_v23 = vpop.f32.mrf.mxu1 }
  0xcf   :  { %v260_v24 = vpop.f32.mrf.mxu1 }
  0xd1   :  { %v347_v25 = vpop.f32.mrf.mxu1 }
  0xe2   :  { %v331_v26 = vpop.f32.mrf.mxu0 }
  0xe4   :  { %v332_v27 = vpop.f32.mrf.mxu0 }
  0xe5   :  { %v333_v28 = vadd.f32 %v332_v27, %v331_v26 }
  0xe6   :  { %v334_v29 = vpop.f32.mrf.mxu0 }
  0xe7   :  { %v258_v30 = vadd.f32 %v333_v28, %v257_v22 }
  0xe8   :  { %v335_v31 = vpop.f32.mrf.mxu0 }
  0xe9   :  { %264 = vst [vmem:[%s482_s2] sm:$0xff] %v258_v30  ;;  %v336_v32 = vadd.f32 %v335_v31, %v334_v29  ;;  %266 = vadd.xlane.f32.xlu0 %v258_v30  ;;  %v273_v33 = vmul.f32 %v258_v30, %v258_v30 }
  0xeb   :  { %v261_v34 = vadd.f32 %v336_v32, %v260_v24  ;;  %275 = vadd.xlane.f32.xlu1 %v273_v33 }
  0xed   :  { %265 = vst [vmem:[%s482_s2 + $0x8] sm:$0xff] %v261_v34  ;;  %268 = vadd.xlane.f32.xlu0 %v261_v34  ;;  %v274_v35 = vmul.f32 %v261_v34, %v261_v34 }
  0xef   :  { %277 = vadd.xlane.f32.xlu1 %v274_v35 }
 0x172   :  { %v267_v36 = vpop.xlane.xlu0 %266 }
 0x173   :  { %271 = vst.msk [vmem:[%s483_s3] sm:$0xff] %vm270_vm2, %v267_v36 }
 0x174   :  { %v276_v37 = vpop.xlane.xlu1 %275 }
 0x175   :  { %279 = vst.msk [vmem:[%s484_s4] sm:$0xff] %vm270_vm2, %v276_v37 }
 0x176   :  { %v269_v38 = vpop.xlane.xlu0 %268 }
 0x177   :  { %272 = vst.msk [vmem:[%s483_s3 + $0x8] sm:$0xff] %vm270_vm2, %v269_v38 }
 0x178   :  { %v278_v39 = vpop.xlane.xlu1 %277 }
 0x179   :  { %280 = vst.msk [vmem:[%s484_s4 + $0x8] sm:$0xff] %vm270_vm2, %v278_v39 }

// kernel: cons_net_forward.45
= control target key start
LH: loop header
LB: loop body
LE: loop exit
PB: predicated region body
PF: predicated region fallthrough
CT: control target
= control target key end

     0   :  { %vm238_vm0 = vcmask 130048   ;;  %vm333_vm1 = vcmask 7168   ;;  %s607_s0 = inlined_call_operand.vmem [shape: bf16[144,512], index: 0, kind: input, shape index: {}]   ;;  %s608_s1 = inlined_call_operand.vmem [shape: bf16[8,144], index: 1, kind: input, shape index: {}]   ;;  %s609_s2 = inlined_call_operand.vmem [shape: f32[8,512], index: 2, kind: output, shape index: {0}]   ;;  %s610_s3 = inlined_call_operand.vmem [shape: f32[1,8,1], index: 3, kind: output, shape index: {1}]   ;;  %s611_s4 = inlined_call_operand.vmem [shape: f32[1,8,1], index: 4, kind: output, shape index: {2}]  }
   0x1   :  { %v397_v0 = vld [vmem:[%s607_s0 + $0xe4] ss:$16 sps:$4 sm:$0xff]   ;;  %v399_v1 = vld [vmem:[%s607_s0 + $0xec] ss:$16 sps:$4 sm:$0xff]   ;;  %v401_v2 = vld [vmem:[%s607_s0 + $0xe0] ss:$16 sps:$4 sm:$0xff]  }
   0x2   :  { %242 = vmatprep.subr.bf16.mxu0 %v397_v0  ;;  %v402_v3 = vld [vmem:[%s607_s0 + $0xe8] ss:$16 sps:$4 sm:$0xff]   ;;  %283 = vmatprep.subr.bf16.mxu1 %v399_v1  ;;  %v403_v4 = vld [vmem:[%s607_s0 + $0xc4] ss:$16 sps:$4 sm:$0xff]   ;;  %v405_v5 = vld [vmem:[%s607_s0 + $0xcc] ss:$16 sps:$4 sm:$0xff]  }
   0x3   :  { %243 = vmatpush1.bf16.msra.mxu0 %v401_v2  ;;  %284 = vmatpush1.bf16.msra.mxu1 %v402_v3  ;;  %v407_v6 = vld [vmem:[%s607_s0 + $0xc0] ss:$16 sps:$4 sm:$0xff]   ;;  %v408_v7 = vld [vmem:[%s607_s0 + $0xc8] ss:$16 sps:$4 sm:$0xff]   ;;  %v409_v8 = vld [vmem:[%s607_s0 + $0xa4] ss:$16 sps:$4 sm:$0xff]  }
   0x4   :  { %244 = vmatprep.subr.bf16.mxu0 %v403_v4  ;;  %285 = vmatprep.subr.bf16.mxu1 %v405_v5  ;;  %v411_v9 = vld [vmem:[%s607_s0 + $0xac] ss:$16 sps:$4 sm:$0xff]   ;;  %v413_v10 = vld [vmem:[%s607_s0 + $0xa0] ss:$16 sps:$4 sm:$0xff]   ;;  %v414_v11 = vld [vmem:[%s607_s0 + $0xa8] ss:$16 sps:$4 sm:$0xff]  }
   0x5   :  { %v415_v12 = vld [vmem:[%s607_s0 + $0x84] ss:$16 sps:$4 sm:$0xff]   ;;  %v417_v13 = vld [vmem:[%s607_s0 + $0x8c] ss:$16 sps:$4 sm:$0xff]   ;;  %v419_v14 = vld [vmem:[%s607_s0 + $0x80] ss:$16 sps:$4 sm:$0xff]  }
   0x6   :  { %v420_v15 = vld [vmem:[%s607_s0 + $0x88] ss:$16 sps:$4 sm:$0xff]   ;;  %v421_v16 = vld [vmem:[%s607_s0 + $0x64] ss:$16 sps:$4 sm:$0xff]   ;;  %v423_v17 = vld [vmem:[%s607_s0 + $0x6c] ss:$16 sps:$4 sm:$0xff]  }
   0x7   :  { %245 = vmatpush1.bf16.msra.mxu0 %v407_v6  ;;  %286 = vmatpush1.bf16.msra.mxu1 %v408_v7  ;;  %v425_v18 = vld [vmem:[%s607_s0 + $0x60] ss:$16 sps:$4 sm:$0xff]   ;;  %v426_v19 = vld [vmem:[%s607_s0 + $0x68] ss:$16 sps:$4 sm:$0xff]   ;;  %v427_v20 = vld [vmem:[%s607_s0 + $0x44] ss:$16 sps:$4 sm:$0xff]  }
   0x8   :  { %246 = vmatprep.subr.bf16.mxu0 %v409_v8  ;;  %287 = vmatprep.subr.bf16.mxu1 %v411_v9  ;;  %v429_v21 = vld [vmem:[%s607_s0 + $0x4c] ss:$16 sps:$4 sm:$0xff]   ;;  %v431_v22 = vld [vmem:[%s607_s0 + $0x40] ss:$16 sps:$4 sm:$0xff]   ;;  %v432_v23 = vld [vmem:[%s607_s0 + $0x48] ss:$16 sps:$4 sm:$0xff]  }
   0x9   :  { %v433_v24 = vld [vmem:[%s607_s0 + $0x24] ss:$16 sps:$4 sm:$0xff]   ;;  %v435_v25 = vld [vmem:[%s607_s0 + $0x2c] ss:$16 sps:$4 sm:$0xff]   ;;  %v437_v26 = vld [vmem:[%s607_s0 + $0x20] ss:$16 sps:$4 sm:$0xff]  }
   0xa   :  { %v438_v27 = vld [vmem:[%s607_s0 + $0x28] ss:$16 sps:$4 sm:$0xff]   ;;  %v15_v28 = vld [vmem:[%s608_s1] sm:$0xff]  ;;  %v441_v30 = vld [vmem:[%s607_s0 + $0xc] ss:$16 sps:$4 sm:$0xff]  }
   0xb   :  { %247 = vmatpush1.bf16.msra.mxu0 %v413_v10  ;;  %288 = vmatpush1.bf16.msra.mxu1 %v414_v11  ;;  %v439_v29 = vld [vmem:[%s607_s0 + $0x4] ss:$16 sps:$4 sm:$0xff]   ;;  %v358_v31 = vcombine.high %v15_v28, %v15_v28  ;;  %v443_v32 = vld [vmem:[%s607_s0] ss:$16 sps:$4 sm:$0xff]   ;;  %v444_v33 = vld [vmem:[%s607_s0 + $0x8] ss:$16 sps:$4 sm:$0xff]   ;;  %v357_v38 = vcombine.low %v15_v28, %v15_v28 }
   0xc   :  { %248 = vmatprep.subr.bf16.mxu0 %v415_v12  ;;  %289 = vmatprep.subr.bf16.mxu1 %v417_v13  ;;  %v445_v34 = vld [vmem:[%s607_s0 + $0x104] ss:$16 sps:$4 sm:$0xff]   ;;  %v447_v35 = vld [vmem:[%s607_s0 + $0x10c] ss:$16 sps:$4 sm:$0xff]   ;;  %v449_v36 = vld [vmem:[%s607_s0 + $0x100] ss:$16 sps:$4 sm:$0xff]  }
   0xd   :  { %395 = vmatprep.mubr.msk.bf16.mxu0 %vm238_vm0, %v358_v31  ;;  %396 = vmatprep.mubr.msk.bf16.mxu1 %vm238_vm0, %v358_v31  ;;  %v450_v37 = vld [vmem:[%s607_s0 + $0x108] ss:$16 sps:$4 sm:$0xff]  }
   0xf   :  { %249 = vmatpush1.bf16.msra.mxu0 %v419_v14  ;;  %290 = vmatpush1.bf16.msra.mxu1 %v420_v15 }
  0x10   :  { %250 = vmatprep.subr.bf16.mxu0 %v421_v16  ;;  %291 = vmatprep.subr.bf16.mxu1 %v423_v17 }
  0x13   :  { %251 = vmatpush1.bf16.msra.mxu0 %v425_v18  ;;  %292 = vmatpush1.bf16.msra.mxu1 %v426_v19 }
  0x14   :  { %252 = vmatprep.subr.bf16.mxu0 %v427_v20  ;;  %293 = vmatprep.subr.bf16.mxu1 %v429_v21 }
  0x17   :  { %253 = vmatpush1.bf16.msra.mxu0 %v431_v22  ;;  %294 = vmatpush1.bf16.msra.mxu1 %v432_v23 }
  0x18   :  { %254 = vmatprep.subr.bf16.mxu0 %v433_v24  ;;  %295 = vmatprep.subr.bf16.mxu1 %v435_v25 }
  0x1b   :  { %255 = vmatpush1.bf16.msra.mxu0 %v437_v26  ;;  %296 = vmatpush1.bf16.msra.mxu1 %v438_v27 }
  0x1c   :  { %256 = vmatprep.subr.bf16.mxu0 %v439_v29  ;;  %297 = vmatprep.subr.bf16.mxu1 %v441_v30 }
  0x1f   :  { %257 = vmatpush1.bf16.msra.mxu0 %v443_v32  ;;  %298 = vmatpush1.bf16.msra.mxu1 %v444_v33 }
  0x20   :  { %272 = vmatprep.subr.bf16.mxu0 %v445_v34  ;;  %313 = vmatprep.subr.bf16.mxu1 %v447_v35 }
  0x23   :  { %273 = vmatpush2.bf16.msra.mxu0 %v449_v36  ;;  %314 = vmatpush2.bf16.msra.mxu1 %v450_v37 }
  0x26   :  { %275 = vmatmul.mubr.bf16.vlgmr.msra.gmra.mxu0 %v357_v38  ;;  %316 = vmatmul.mubr.bf16.vlgmr.msra.gmra.mxu1 %v357_v38 }
  0xe6   :  { %v276_v39 = vpop.f32.mrf.mxu0  ;;  %v317_v40 = vpop.f32.mrf.mxu1 }
  0xe7   :  { %324 = vst [vmem:[%s609_s2] sm:$0xff] %v276_v39  ;;  %326 = vst [vmem:[%s609_s2 + $0x10] sm:$0xff] %v317_v40  ;;  %v335_v43 = vmul.f32 %v276_v39, %v276_v39  ;;  %v337_v44 = vmul.f32 %v317_v40, %v317_v40 }
  0xe8   :  { %v278_v41 = vpop.f32.mrf.mxu0  ;;  %v319_v42 = vpop.f32.mrf.mxu1 }
  0xe9   :  { %325 = vst [vmem:[%s609_s2 + $0x8] sm:$0xff] %v278_v41  ;;  %v328_v45 = vadd.f32 %v278_v41, %v276_v39  ;;  %v336_v46 = vmul.f32 %v278_v41, %v278_v41  ;;  %327 = vst [vmem:[%s609_s2 + $0x18] sm:$0xff] %v319_v42  ;;  %v338_v55 = vmul.f32 %v319_v42, %v319_v42 }
  0xea   :  { %v280_v47 = vpop.f32.mrf.mxu0  ;;  %v321_v48 = vpop.f32.mrf.mxu1 }
  0xeb   :  { %v329_v49 = vadd.f32 %v328_v45, %v317_v40  ;;  %v339_v50 = vadd.f32 %v336_v46, %v335_v43 }
  0xec   :  { %v281_v51 = vpop.f32.mrf.mxu0  ;;  %v322_v52 = vpop.f32.mrf.mxu1 }
  0xed   :  { %v330_v53 = vadd.f32 %v329_v49, %v319_v42  ;;  %v340_v54 = vadd.f32 %v339_v50, %v337_v44 }
  0xef   :  { %331 = vadd.xlane.f32.xlu0 %v330_v53  ;;  %v341_v56 = vadd.f32 %v340_v54, %v338_v55 }
  0xf3   :  { %342 = vadd.xlane.f32.xlu0 %v341_v56 }
 0x178   :  { %v332_v57 = vpop.xlane.xlu0 %331 }
 0x179   :  { %334 = vst.msk [vmem:[%s610_s3] sm:$0xff] %vm333_vm1, %v332_v57 }
 0x17c   :  { %v343_v58 = vpop.xlane.xlu0 %342 }
 0x17d   :  { %344 = vst.msk [vmem:[%s611_s4] sm:$0xff] %vm333_vm1, %v343_v58 }

// kernel: cons_net_forward.49
= control target key start
LH: loop header
LB: loop body
LE: loop exit
PB: predicated region body
PF: predicated region fallthrough
CT: control target
= control target key end

     0   :  { %v274_v3 = vmov 0.0   ;;  %vm28_vm0 = vcmask 64512   ;;  %v275_v7 = vmov 0   ;;  %v186_v8 = vlaneseq  ;;  %s350_s0 = inlined_call_operand.vmem [shape: f32[8,512], index: 0, kind: input, shape index: {}]   ;;  %s351_s2 = inlined_call_operand.vmem [shape: f32[4,8], index: 2, kind: input, shape index: {}]   ;;  %s352_s3 = inlined_call_operand.vmem [shape: f32[4,1], index: 3, kind: input, shape index: {}]   ;;  %s353_s1 = inlined_call_operand.vmem [shape: f32[4,512], index: 1, kind: input, shape index: {}]   ;;  %s354_s4 = inlined_call_operand.vmem [shape: f32[4,512], index: 4, kind: output, shape index: {}]  }
   0x1   :  { %v19_v0 = vld [vmem:[%s350_s0 + $0x8] sm:$0xff]  ;;  %v21_v1 = vld [vmem:[%s350_s0 + $0x18] sm:$0xff]  ;;  %v18_v2 = vld [vmem:[%s350_s0] sm:$0xff]  ;;  %96 = vmatprep.mubr.f32.mxu0 %v274_v3  ;;  %167 = vmatprep.mubr.f32.mxu1 %v274_v3  ;;  %vm199_vm2 = vcmask 1043456  }
   0x2   :  { %62 = vmatprep.subr.mxu0 %v19_v0  ;;  %133 = vmatprep.subr.mxu1 %v21_v1  ;;  %v20_v4 = vld [vmem:[%s350_s0 + $0x10] sm:$0xff]  ;;  %v17_v5 = vld [vmem:[%s351_s2] sm:$0xf]  ;;  %v319_v9 = vshrl.u32 %v186_v8, 7  ;;  %v175_v12 = vld [vmem:[%s353_s1 + $0x8] sm:$0xff] }
   0x3   :  { %63 = vmatpush1.msra.mxu0 %v18_v2  ;;  %134 = vmatpush1.msra.mxu1 %v20_v4  ;;  %v22_v6 = vld [vmem:[%s352_s3] sm:$0xf]  ;;  %v179_v18 = vcombine.high %v175_v12, %v175_v12 }
   0x4   :  { %258 = vmatmul.mubr.msk.f32.vlgmr.msra.gmra.mxu0 %vm28_vm0, %v17_v5  ;;  %259 = vmatmul.mubr.msk.f32.vlgmr.msra.gmra.mxu1 %vm28_vm0, %v17_v5  ;;  %v174_v11 = vld [vmem:[%s353_s1] sm:$0xff]  ;;  %vm188_vm1 = vcmp.ge.s32.totalorder %v319_v9, 1 }
   0x5   :  { %263 = vset.pattern.permute.xlu0 %v275_v7  ;;  %v178_v17 = vcombine.high %v174_v11, %v174_v11  ;;  %v260_v25 = vsel %vm188_vm1, 1.0, %v274_v3 }
   0x6   :  { %25 = vperm.xlu0 %263, %v22_v6  }
  0x81   :  { %v26_v10 = vpop.permute.xlu0 %25 }
  0xc4   :  { %v98_v13 = vpop.f32.mrf.mxu0  ;;  %v169_v14 = vpop.f32.mrf.mxu1 }
  0xc5   :  { %v99_v15 = vadd.f32 %v98_v13, %v26_v10  ;;  %v170_v16 = vadd.f32 %v169_v14, %v26_v10 }
  0xc6   :  { %v100_v19 = vpop.f32.mrf.mxu0  ;;  %v171_v20 = vpop.f32.mrf.mxu1 }
  0xc7   :  { %v182_v21 = vadd.f32 %v174_v11, %v99_v15  ;;  %v328_v22 = vadd.f32 %v175_v12, %v170_v16  ;;  %v101_v23 = vadd.f32 %v100_v19, %v26_v10  ;;  %v172_v24 = vadd.f32 %v171_v20, %v26_v10 }
  0xc9   :  { %v191_v26 = vmul.f32 %v182_v21, %v182_v21  ;;  %v193_v27 = vmul.f32 %v328_v22, %v328_v22  ;;  %v183_v28 = vadd.f32 %v178_v17, %v101_v23  ;;  %v185_v29 = vadd.f32 %v179_v18, %v172_v24 }
  0xcb   :  { %v195_v30 = vmul.f32 %v260_v25, %v191_v26  ;;  %v197_v31 = vmul.f32 %v260_v25, %v193_v27  ;;  %v192_v32 = vmul.f32 %v183_v28, %v183_v28  ;;  %v194_v33 = vmul.f32 %v185_v29, %v185_v29 }
  0xcd   :  { %v200_v34 = vsel %vm199_vm2, %v195_v30, 0.0  ;;  %v214_v35 = vsel %vm199_vm2, %v197_v31, 0.0  ;;  %v196_v36 = vmul.f32 %v260_v25, %v192_v32  ;;  %v198_v37 = vmul.f32 %v260_v25, %v194_v33 }
  0xce   :  { %v201_v38 = vrot.slane %v200_v34, 4  ;;  %v215_v39 = vrot.slane %v214_v35, 4 }
  0xcf   :  { %v207_v40 = vsel %vm199_vm2, %v196_v36, 0.0  ;;  %v221_v41 = vsel %vm199_vm2, %v198_v37, 0.0 }
  0xd0   :  { %v202_v42 = vadd.f32 %v201_v38, %v200_v34  ;;  %v216_v43 = vadd.f32 %v215_v39, %v214_v35  ;;  %v208_v44 = vrot.slane %v207_v40, 4  ;;  %v222_v45 = vrot.slane %v221_v41, 4 }
  0xd2   :  { %v203_v46 = vrot.slane %v202_v42, 2  ;;  %v217_v47 = vrot.slane %v216_v43, 2  ;;  %v209_v48 = vadd.f32 %v208_v44, %v207_v40  ;;  %v223_v49 = vadd.f32 %v222_v45, %v221_v41 }
  0xd4   :  { %v204_v50 = vadd.f32 %v203_v46, %v202_v42  ;;  %v218_v51 = vadd.f32 %v217_v47, %v216_v43  ;;  %v210_v52 = vrot.slane %v209_v48, 2  ;;  %v224_v53 = vrot.slane %v223_v49, 2 }
  0xd6   :  { %v205_v54 = vrot.slane %v204_v50, 1  ;;  %v219_v55 = vrot.slane %v218_v51, 1  ;;  %v211_v56 = vadd.f32 %v210_v52, %v209_v48  ;;  %v225_v57 = vadd.f32 %v224_v53, %v223_v49 }
  0xd8   :  { %v206_v58 = vadd.f32 %v205_v54, %v204_v50  ;;  %v220_v59 = vadd.f32 %v219_v55, %v218_v51  ;;  %v212_v60 = vrot.slane %v211_v56, 1  ;;  %v226_v61 = vrot.slane %v225_v57, 1 }
  0xda   :  { %v228_v62 = vmax.f32 %v206_v58, 1e-24  ;;  %v230_v63 = vmax.f32 %v220_v59, 1e-24  ;;  %v213_v0 = vadd.f32 %v212_v60, %v211_v56  ;;  %v227_v1 = vadd.f32 %v226_v61, %v225_v57 }
  0xdc   :  { %266 = vrsqrt.f32 %v228_v62  ;;  %v229_v2 = vmax.f32 %v213_v0, 1e-24  ;;  %v231_v3 = vmax.f32 %v227_v1, 1e-24 }
  0xdd   :  { %268 = vrsqrt.f32 %v230_v63 }
  0xde   :  { %270 = vrsqrt.f32 %v229_v2 }
  0xdf   :  { %272 = vrsqrt.f32 %v231_v3 }
  0xe9   :  { %v267_v4 = vpop.eup %266 }
  0xea   :  { %v269_v5 = vpop.eup %268  ;;  %v236_v6 = vmul.f32 %v267_v4, %v182_v21 }
  0xeb   :  { %v271_v7 = vpop.eup %270  ;;  %v238_v8 = vmul.f32 %v269_v5, %v328_v22 }
  0xec   :  { %v273_v10 = vpop.eup %272  ;;  %v237_v11 = vmul.f32 %v271_v7, %v183_v28  ;;  %v240_v13 = vsel %vm188_vm1, %v236_v6, %v182_v21 }
  0xed   :  { %v239_v12 = vmul.f32 %v273_v10, %v185_v29  ;;  %v242_v15 = vsel %vm188_vm1, %v238_v8, %v328_v22 }
  0xee   :  { %v241_v14 = vsel %vm188_vm1, %v237_v11, %v183_v28 }
  0xef   :  { %v248_v16 = vcombine.low %v240_v13, %v241_v14  ;;  %v243_v17 = vsel %vm188_vm1, %v239_v12, %v185_v29 }
  0xf0   :  { %v249_v18 = vcombine.low %v242_v15, %v243_v17 }
  0xf1   :  { %252 = vst [vmem:[%s354_s4] sm:$0xff] %v248_v16 }
  0xf2   :  { %253 = vst [vmem:[%s354_s4 + $0x8] sm:$0xff] %v249_v18 }

</bundles_post_ra>
